<compile_context>
chip_gen: v6e
topology: v6e:2x2x1
jax: 0.10.0
libtpu: 0.0.40
codegen_flags: <defaults>
</compile_context>

<pallas_src>
import functools

import jax
import jax.numpy as jnp
from jax.experimental import pallas as pl
from jax.experimental.pallas import tpu as pltpu


def _lrelu(x):
    return jnp.where(x >= 0, x, 0.1 * x)  # LeakyReLU(negative_slope=0.1)


def _tap_slab(ref, dh, dw, ho, wo, stride):
    """(ho, wo, C) conv-tap window of a spatially padded (Hp, Wp, C) VMEM ref."""
    if stride == 1:
        return ref[dh:dh + ho, dw:dw + wo, :]
    return ref[pl.ds(dh, ho, stride=stride), pl.ds(dw, wo, stride=stride), :]


def _make_block_kernel(H, W, Cin, Cout, stride, equal_in_out, needs_act):
    """Fully fused WideResNet BasicBlock kernel for one batch element."""
    Ho = (H - 1) // stride + 1   # 3x3, padding 1
    Wo = (W - 1) // stride + 1

    def kernel(*refs):
        if equal_in_out:
            (x_ref, s1_ref, b1_ref, w1_ref, s2_ref, b2_ref, w2_ref,
             o_ref, apad_ref, mid_ref) = refs
            wsc_ref = None
        else:
            (x_ref, s1_ref, b1_ref, w1_ref, s2_ref, b2_ref, w2_ref, wsc_ref,
             o_ref, apad_ref, mid_ref) = refs

        x = x_ref[0]                                   # (H, W, Cin) f32

        # ---- BN1 + LeakyReLU fused as conv1 prologue; stage zero-padded ----
        if needs_act:
            a = _lrelu(x * s1_ref[...] + b1_ref[...])
        else:
            a = x                                      # BN1 output unused here
        apad_ref[...] = jnp.zeros_like(apad_ref)       # zero spatial border
        apad_ref[1:H + 1, 1:W + 1, :] = a

        # ---- conv1: 3x3, stride, 9-tap accumulation on the MXU (bf16) ----
        acc = jnp.zeros((Ho * Wo, Cout), jnp.float32)
        for dh in range(3):
            for dw in range(3):
                t = _tap_slab(apad_ref, dh, dw, Ho, Wo, stride)
                t2 = t.reshape(Ho * Wo, Cin).astype(jnp.bfloat16)
                acc = acc + jnp.dot(t2, w1_ref[3 * dh + dw],
                                    preferred_element_type=jnp.float32)

        # ---- BN2 + LeakyReLU fused epilogue; stage padded conv2 input ----
        mid = _lrelu(acc * s2_ref[...] + b2_ref[...])
        # TODO(synk): dropout not implemented (drop_rate=0.0 -> identity)
        mid_ref[...] = jnp.zeros_like(mid_ref)
        mid_ref[1:Ho + 1, 1:Wo + 1, :] = mid.reshape(Ho, Wo, Cout)

        # ---- conv2: 3x3, stride 1, 9-tap accumulation ----
        acc2 = jnp.zeros((Ho * Wo, Cout), jnp.float32)
        for dh in range(3):
            for dw in range(3):
                t = mid_ref[dh:dh + Ho, dw:dw + Wo, :]
                t2 = t.reshape(Ho * Wo, Cout).astype(jnp.bfloat16)
                acc2 = acc2 + jnp.dot(t2, w2_ref[3 * dh + dw],
                                      preferred_element_type=jnp.float32)

        # ---- shortcut path + residual add, fused in the same kernel ----
        if equal_in_out:
            res = x.reshape(H * W, Cin)                # identity shortcut (f32)
        else:
            base = _tap_slab(apad_ref, 1, 1, Ho, Wo, stride)   # 1x1 conv, stride
            res = jnp.dot(base.reshape(Ho * Wo, Cin).astype(jnp.bfloat16),
                          wsc_ref[...], preferred_element_type=jnp.float32)

        y = acc2 + res
        o_ref[...] = y.reshape(1, Ho, Wo, Cout).astype(o_ref.dtype)

    return kernel, Ho, Wo


def basic_block(x, p, stride, equal_in_out, activate_before_residual):
    """x: (N, H, W, Cin) NHWC float32 -> (N, Ho, Wo, Cout). One pallas_call."""
    N, H, W, Cin = x.shape
    Cout = p["conv1_w"].shape[-1]
    needs_act = equal_in_out or activate_before_residual

    kernel, Ho, Wo = _make_block_kernel(H, W, Cin, Cout, stride,
                                        equal_in_out, needs_act)

    # Weights resident in VMEM, pre-cast to bf16 (native MXU path).
    w1 = p["conv1_w"].reshape(9, Cin, Cout).astype(jnp.bfloat16)
    w2 = p["conv2_w"].reshape(9, Cout, Cout).astype(jnp.bfloat16)
    s1 = p["bn1_scale"].reshape(1, Cin)
    b1 = p["bn1_bias"].reshape(1, Cin)
    s2 = p["bn2_scale"].reshape(1, Cout)
    b2 = p["bn2_bias"].reshape(1, Cout)

    const2 = lambda n: (0, 0)
    const3 = lambda n: (0, 0, 0)

    in_specs = [
        pl.BlockSpec((1, H, W, Cin), lambda n: (n, 0, 0, 0)),
        pl.BlockSpec((1, Cin), const2),
        pl.BlockSpec((1, Cin), const2),
        pl.BlockSpec((9, Cin, Cout), const3),
        pl.BlockSpec((1, Cout), const2),
        pl.BlockSpec((1, Cout), const2),
        pl.BlockSpec((9, Cout, Cout), const3),
    ]
    args = [x, s1, b1, w1, s2, b2, w2]
    if not equal_in_out:
        in_specs.append(pl.BlockSpec((Cin, Cout), const2))
        args.append(p["shortcut_w"].astype(jnp.bfloat16))

    out = pl.pallas_call(
        kernel,
        out_shape=jax.ShapeDtypeStruct((N, Ho, Wo, Cout), jnp.float32),
        grid=(N,),
        in_specs=in_specs,
        out_specs=pl.BlockSpec((1, Ho, Wo, Cout), lambda n: (n, 0, 0, 0)),
        scratch_shapes=[pltpu.VMEM((H + 2, W + 2, Cin), jnp.float32),
                        pltpu.VMEM((Ho + 2, Wo + 2, Cout), jnp.float32)],
        compiler_params=pltpu.CompilerParams(
            dimension_semantics=("parallel",)),
    )(*args)
    return out


def network_block_forward(x_nchw, params, in_planes, out_planes, stride,
                          activate_before_residual=False):
    x = jnp.transpose(x_nchw, (0, 2, 3, 1))            # NCHW -> NHWC
    for i, p in enumerate(params):
        cin = in_planes if i == 0 else out_planes
        s = stride if i == 0 else 1
        x = basic_block(x, p, s, equal_in_out=(cin == out_planes),
                        activate_before_residual=activate_before_residual)
    return jnp.transpose(x, (0, 3, 1, 2))              # back to NCHW


# ------------------------- deterministic params ----------------------------

def init_params(key, nb_layers, in_planes, out_planes):
    eps = 1e-5
    params = []
    for i in range(nb_layers):
        cin = in_planes if i == 0 else out_planes
        key, k1, k2, k3, k4, k5 = jax.random.split(key, 6)
        std = (2.0 / (9 * out_planes)) ** 0.5
        g1 = 1.0 + 0.1 * jax.random.normal(k4, (cin,))
        b1 = 0.1 * jax.random.normal(k4, (cin,))
        m1 = 0.05 * jax.random.normal(k5, (cin,))
        v1 = 1.0 + 0.1 * jax.random.uniform(k5, (cin,))
        g2 = 1.0 + 0.1 * jax.random.normal(k3, (out_planes,))
        b2 = 0.1 * jax.random.normal(k3, (out_planes,))
        m2 = 0.05 * jax.random.normal(k2, (out_planes,))
        v2 = 1.0 + 0.1 * jax.random.uniform(k2, (out_planes,))
        s1 = g1 / jnp.sqrt(v1 + eps)
        s2 = g2 / jnp.sqrt(v2 + eps)
        p = {
            "bn1_scale": s1.astype(jnp.float32),
            "bn1_bias": (b1 - m1 * s1).astype(jnp.float32),
            "bn2_scale": s2.astype(jnp.float32),
            "bn2_bias": (b2 - m2 * s2).astype(jnp.float32),
            "conv1_w": std * jax.random.normal(k1, (3, 3, cin, out_planes),
                                               jnp.float32),
            "conv2_w": std * jax.random.normal(k2, (3, 3, out_planes, out_planes),
                                               jnp.float32),
        }
        if cin != out_planes:
            p["shortcut_w"] = ((2.0 / out_planes) ** 0.5) * jax.random.normal(
                k5, (cin, out_planes), jnp.float32)
        params.append(p)
    return params


if __name__ == "__main__":
    nb_layers, in_planes, out_planes, stride = 2, 4, 8, 2
    key = jax.random.PRNGKey(0)
    kx, kp = jax.random.split(key)
    x = jax.random.normal(kx, (2, in_planes, 16, 16), jnp.float32)  # NCHW
    params = init_params(kp, nb_layers, in_planes, out_planes)

    fwd = jax.jit(functools.partial(
        network_block_forward, in_planes=in_planes, out_planes=out_planes,
        stride=stride, activate_before_residual=True))
    y = fwd(x, params)
    y = jax.block_until_ready(y)
    assert y.shape == (2, out_planes, 8, 8), y.shape
    assert bool(jnp.all(jnp.isfinite(y)))
    print("KERNEL_OK")
</pallas_src>

<mosaic_0001>
module attributes {stable_mosaic.version = 11 : i64} {
  func.func @kernel(%arg0: i32, %arg1: memref<1x16x16x4xf32, #tpu.memory_space<vmem>>, %arg2: memref<1x4xf32, #tpu.memory_space<vmem>>, %arg3: memref<1x4xf32, #tpu.memory_space<vmem>>, %arg4: memref<9x4x8xbf16, #tpu.memory_space<vmem>>, %arg5: memref<1x8xf32, #tpu.memory_space<vmem>>, %arg6: memref<1x8xf32, #tpu.memory_space<vmem>>, %arg7: memref<9x8x8xbf16, #tpu.memory_space<vmem>>, %arg8: memref<4x8xbf16, #tpu.memory_space<vmem>>, %arg9: memref<1x8x8x8xf32, #tpu.memory_space<vmem>>, %arg10: memref<18x18x4xf32, #tpu.memory_space<vmem>>, %arg11: memref<10x10x8xf32, #tpu.memory_space<vmem>>) attributes {dimension_semantics = [#tpu.dimension_semantics<parallel>], iteration_bounds = array<i64: 2>, scalar_prefetch = 0 : i64, scratch_operands = 2 : i64, tpu.core_type = #tpu.core_type<tc>, window_params = [{transform_indices = @transform_0, window_bounds = array<i64: 1, 16, 16, 4>}, {pipeline_mode = #tpu.pipeline_mode<synchronous>, transform_indices = @transform_1, window_bounds = array<i64: 1, 4>}, {pipeline_mode = #tpu.pipeline_mode<synchronous>, transform_indices = @transform_2, window_bounds = array<i64: 1, 4>}, {pipeline_mode = #tpu.pipeline_mode<synchronous>, transform_indices = @transform_3, window_bounds = array<i64: 9, 4, 8>}, {pipeline_mode = #tpu.pipeline_mode<synchronous>, transform_indices = @transform_4, window_bounds = array<i64: 1, 8>}, {pipeline_mode = #tpu.pipeline_mode<synchronous>, transform_indices = @transform_5, window_bounds = array<i64: 1, 8>}, {pipeline_mode = #tpu.pipeline_mode<synchronous>, transform_indices = @transform_6, window_bounds = array<i64: 9, 8, 8>}, {pipeline_mode = #tpu.pipeline_mode<synchronous>, transform_indices = @transform_7, window_bounds = array<i64: 4, 8>}, {transform_indices = @transform_8, window_bounds = array<i64: 1, 8, 8, 8>}]} {
    %c0 = arith.constant 0 : index
    %c0_0 = arith.constant 0 : index
    %c0_1 = arith.constant 0 : index
    %c0_2 = arith.constant 0 : index
    %0 = vector.load %arg1[%c0, %c0_0, %c0_1, %c0_2] : memref<1x16x16x4xf32, #tpu.memory_space<vmem>>, vector<1x16x16x4xf32>
    %1 = vector.shape_cast %0 : vector<1x16x16x4xf32> to vector<16x16x4xf32>
    %c0_3 = arith.constant 0 : index
    %c0_4 = arith.constant 0 : index
    %2 = vector.load %arg2[%c0_3, %c0_4] : memref<1x4xf32, #tpu.memory_space<vmem>>, vector<1x4xf32>
    %3 = vector.shape_cast %2 : vector<1x4xf32> to vector<1x1x4xf32>
    %4 = vector.broadcast %3 : vector<1x1x4xf32> to vector<16x16x4xf32>
    %5 = arith.mulf %1, %4 : vector<16x16x4xf32>
    %c0_5 = arith.constant 0 : index
    %c0_6 = arith.constant 0 : index
    %6 = vector.load %arg3[%c0_5, %c0_6] : memref<1x4xf32, #tpu.memory_space<vmem>>, vector<1x4xf32>
    %7 = vector.shape_cast %6 : vector<1x4xf32> to vector<1x1x4xf32>
    %8 = vector.broadcast %7 : vector<1x1x4xf32> to vector<16x16x4xf32>
    %9 = arith.addf %5, %8 : vector<16x16x4xf32>
    %cst = arith.constant 0.000000e+00 : f32
    %10 = vector.broadcast %cst : f32 to vector<16x16x4xf32>
    %11 = arith.cmpf oge, %9, %10 : vector<16x16x4xf32>
    %cst_7 = arith.constant 1.000000e-01 : f32
    %12 = vector.broadcast %cst_7 : f32 to vector<16x16x4xf32>
    %13 = arith.mulf %12, %9 : vector<16x16x4xf32>
    %14 = arith.select %11, %9, %13 : vector<16x16x4xi1>, vector<16x16x4xf32>
    %cst_8 = arith.constant 0.000000e+00 : f32
    %15 = vector.broadcast %cst_8 : f32 to vector<18x18x4xf32>
    %c0_9 = arith.constant 0 : index
    %c0_10 = arith.constant 0 : index
    %c0_11 = arith.constant 0 : index
    %16 = vector.load %arg10[%c0_9, %c0_10, %c0_11] : memref<18x18x4xf32, #tpu.memory_space<vmem>>, vector<18x18x4xf32>
    tpu.vector_store %arg10[%c0_9, %c0_10, %c0_11], %15 {strides = array<i32>} : memref<18x18x4xf32, #tpu.memory_space<vmem>>, vector<18x18x4xf32>,
    %c1 = arith.constant 1 : index
    %c1_12 = arith.constant 1 : index
    %c0_13 = arith.constant 0 : index
    %17 = vector.load %arg10[%c1, %c1_12, %c0_13] : memref<18x18x4xf32, #tpu.memory_space<vmem>>, vector<16x16x4xf32>
    tpu.vector_store %arg10[%c1, %c1_12, %c0_13], %14 {strides = array<i32>} : memref<18x18x4xf32, #tpu.memory_space<vmem>>, vector<16x16x4xf32>,
    %cst_14 = arith.constant 0.000000e+00 : f32
    %18 = vector.broadcast %cst_14 : f32 to vector<64x8xf32>
    %c0_15 = arith.constant 0 : index
    %c0_16 = arith.constant 0 : index
    %c0_17 = arith.constant 0 : index
    %19 = tpu.strided_load %arg10[%c0_15, %c0_16, %c0_17] {strides = array<i32: 2, 2, 1>} : memref<18x18x4xf32, #tpu.memory_space<vmem>>, vector<8x8x4xf32>
    %20 = vector.shape_cast %19 : vector<8x8x4xf32> to vector<64x4xf32>
    %21 = arith.truncf %20 : vector<64x4xf32> to vector<64x4xbf16>
    %c0_18 = arith.constant 0 : index
    %c0_19 = arith.constant 0 : index
    %c0_20 = arith.constant 0 : index
    %22 = vector.load %arg4[%c0_18, %c0_19, %c0_20] : memref<9x4x8xbf16, #tpu.memory_space<vmem>>, vector<1x4x8xbf16>
    %23 = vector.shape_cast %22 : vector<1x4x8xbf16> to vector<4x8xbf16>
    %cst_21 = arith.constant dense<0.000000e+00> : vector<64x8xf32>
    %24 = tpu.matmul %21, %23, %cst_21 {dimension_numbers = #tpu.dot_dimension_numbers<[1], [0], [0], [1], [0, 0, 1, 1], [], []>} : vector<64x4xbf16>, vector<4x8xbf16>, vector<64x8xf32> -> vector<64x8xf32>
    %25 = arith.addf %18, %24 : vector<64x8xf32>
    %c0_22 = arith.constant 0 : index
    %c1_23 = arith.constant 1 : index
    %c0_24 = arith.constant 0 : index
    %26 = tpu.strided_load %arg10[%c0_22, %c1_23, %c0_24] {strides = array<i32: 2, 2, 1>} : memref<18x18x4xf32, #tpu.memory_space<vmem>>, vector<8x8x4xf32>
    %27 = vector.shape_cast %26 : vector<8x8x4xf32> to vector<64x4xf32>
    %28 = arith.truncf %27 : vector<64x4xf32> to vector<64x4xbf16>
    %c1_25 = arith.constant 1 : index
    %c0_26 = arith.constant 0 : index
    %c0_27 = arith.constant 0 : index
    %29 = vector.load %arg4[%c1_25, %c0_26, %c0_27] : memref<9x4x8xbf16, #tpu.memory_space<vmem>>, vector<1x4x8xbf16>
    %30 = vector.shape_cast %29 : vector<1x4x8xbf16> to vector<4x8xbf16>
    %cst_28 = arith.constant dense<0.000000e+00> : vector<64x8xf32>
    %31 = tpu.matmul %28, %30, %cst_28 {dimension_numbers = #tpu.dot_dimension_numbers<[1], [0], [0], [1], [0, 0, 1, 1], [], []>} : vector<64x4xbf16>, vector<4x8xbf16>, vector<64x8xf32> -> vector<64x8xf32>
    %32 = arith.addf %25, %31 : vector<64x8xf32>
    %c0_29 = arith.constant 0 : index
    %c2 = arith.constant 2 : index
    %c0_30 = arith.constant 0 : index
    %33 = tpu.strided_load %arg10[%c0_29, %c2, %c0_30] {strides = array<i32: 2, 2, 1>} : memref<18x18x4xf32, #tpu.memory_space<vmem>>, vector<8x8x4xf32>
    %34 = vector.shape_cast %33 : vector<8x8x4xf32> to vector<64x4xf32>
    %35 = arith.truncf %34 : vector<64x4xf32> to vector<64x4xbf16>
    %c2_31 = arith.constant 2 : index
    %c0_32 = arith.constant 0 : index
    %c0_33 = arith.constant 0 : index
    %36 = vector.load %arg4[%c2_31, %c0_32, %c0_33] : memref<9x4x8xbf16, #tpu.memory_space<vmem>>, vector<1x4x8xbf16>
    %37 = vector.shape_cast %36 : vector<1x4x8xbf16> to vector<4x8xbf16>
    %cst_34 = arith.constant dense<0.000000e+00> : vector<64x8xf32>
    %38 = tpu.matmul %35, %37, %cst_34 {dimension_numbers = #tpu.dot_dimension_numbers<[1], [0], [0], [1], [0, 0, 1, 1], [], []>} : vector<64x4xbf16>, vector<4x8xbf16>, vector<64x8xf32> -> vector<64x8xf32>
    %39 = arith.addf %32, %38 : vector<64x8xf32>
    %c1_35 = arith.constant 1 : index
    %c0_36 = arith.constant 0 : index
    %c0_37 = arith.constant 0 : index
    %40 = tpu.strided_load %arg10[%c1_35, %c0_36, %c0_37] {strides = array<i32: 2, 2, 1>} : memref<18x18x4xf32, #tpu.memory_space<vmem>>, vector<8x8x4xf32>
    %41 = vector.shape_cast %40 : vector<8x8x4xf32> to vector<64x4xf32>
    %42 = arith.truncf %41 : vector<64x4xf32> to vector<64x4xbf16>
    %c3 = arith.constant 3 : index
    %c0_38 = arith.constant 0 : index
    %c0_39 = arith.constant 0 : index
    %43 = vector.load %arg4[%c3, %c0_38, %c0_39] : memref<9x4x8xbf16, #tpu.memory_space<vmem>>, vector<1x4x8xbf16>
    %44 = vector.shape_cast %43 : vector<1x4x8xbf16> to vector<4x8xbf16>
    %cst_40 = arith.constant dense<0.000000e+00> : vector<64x8xf32>
    %45 = tpu.matmul %42, %44, %cst_40 {dimension_numbers = #tpu.dot_dimension_numbers<[1], [0], [0], [1], [0, 0, 1, 1], [], []>} : vector<64x4xbf16>, vector<4x8xbf16>, vector<64x8xf32> -> vector<64x8xf32>
    %46 = arith.addf %39, %45 : vector<64x8xf32>
    %c1_41 = arith.constant 1 : index
    %c1_42 = arith.constant 1 : index
    %c0_43 = arith.constant 0 : index
    %47 = tpu.strided_load %arg10[%c1_41, %c1_42, %c0_43] {strides = array<i32: 2, 2, 1>} : memref<18x18x4xf32, #tpu.memory_space<vmem>>, vector<8x8x4xf32>
    %48 = vector.shape_cast %47 : vector<8x8x4xf32> to vector<64x4xf32>
    %49 = arith.truncf %48 : vector<64x4xf32> to vector<64x4xbf16>
    %c4 = arith.constant 4 : index
    %c0_44 = arith.constant 0 : index
    %c0_45 = arith.constant 0 : index
    %50 = vector.load %arg4[%c4, %c0_44, %c0_45] : memref<9x4x8xbf16, #tpu.memory_space<vmem>>, vector<1x4x8xbf16>
    %51 = vector.shape_cast %50 : vector<1x4x8xbf16> to vector<4x8xbf16>
    %cst_46 = arith.constant dense<0.000000e+00> : vector<64x8xf32>
    %52 = tpu.matmul %49, %51, %cst_46 {dimension_numbers = #tpu.dot_dimension_numbers<[1], [0], [0], [1], [0, 0, 1, 1], [], []>} : vector<64x4xbf16>, vector<4x8xbf16>, vector<64x8xf32> -> vector<64x8xf32>
    %53 = arith.addf %46, %52 : vector<64x8xf32>
    %c1_47 = arith.constant 1 : index
    %c2_48 = arith.constant 2 : index
    %c0_49 = arith.constant 0 : index
    %54 = tpu.strided_load %arg10[%c1_47, %c2_48, %c0_49] {strides = array<i32: 2, 2, 1>} : memref<18x18x4xf32, #tpu.memory_space<vmem>>, vector<8x8x4xf32>
    %55 = vector.shape_cast %54 : vector<8x8x4xf32> to vector<64x4xf32>
    %56 = arith.truncf %55 : vector<64x4xf32> to vector<64x4xbf16>
    %c5 = arith.constant 5 : index
    %c0_50 = arith.constant 0 : index
    %c0_51 = arith.constant 0 : index
    %57 = vector.load %arg4[%c5, %c0_50, %c0_51] : memref<9x4x8xbf16, #tpu.memory_space<vmem>>, vector<1x4x8xbf16>
    %58 = vector.shape_cast %57 : vector<1x4x8xbf16> to vector<4x8xbf16>
    %cst_52 = arith.constant dense<0.000000e+00> : vector<64x8xf32>
    %59 = tpu.matmul %56, %58, %cst_52 {dimension_numbers = #tpu.dot_dimension_numbers<[1], [0], [0], [1], [0, 0, 1, 1], [], []>} : vector<64x4xbf16>, vector<4x8xbf16>, vector<64x8xf32> -> vector<64x8xf32>
    %60 = arith.addf %53, %59 : vector<64x8xf32>
    %c2_53 = arith.constant 2 : index
    %c0_54 = arith.constant 0 : index
    %c0_55 = arith.constant 0 : index
    %61 = tpu.strided_load %arg10[%c2_53, %c0_54, %c0_55] {strides = array<i32: 2, 2, 1>} : memref<18x18x4xf32, #tpu.memory_space<vmem>>, vector<8x8x4xf32>
    %62 = vector.shape_cast %61 : vector<8x8x4xf32> to vector<64x4xf32>
    %63 = arith.truncf %62 : vector<64x4xf32> to vector<64x4xbf16>
    %c6 = arith.constant 6 : index
    %c0_56 = arith.constant 0 : index
    %c0_57 = arith.constant 0 : index
    %64 = vector.load %arg4[%c6, %c0_56, %c0_57] : memref<9x4x8xbf16, #tpu.memory_space<vmem>>, vector<1x4x8xbf16>
    %65 = vector.shape_cast %64 : vector<1x4x8xbf16> to vector<4x8xbf16>
    %cst_58 = arith.constant dense<0.000000e+00> : vector<64x8xf32>
    %66 = tpu.matmul %63, %65, %cst_58 {dimension_numbers = #tpu.dot_dimension_numbers<[1], [0], [0], [1], [0, 0, 1, 1], [], []>} : vector<64x4xbf16>, vector<4x8xbf16>, vector<64x8xf32> -> vector<64x8xf32>
    %67 = arith.addf %60, %66 : vector<64x8xf32>
    %c2_59 = arith.constant 2 : index
    %c1_60 = arith.constant 1 : index
    %c0_61 = arith.constant 0 : index
    %68 = tpu.strided_load %arg10[%c2_59, %c1_60, %c0_61] {strides = array<i32: 2, 2, 1>} : memref<18x18x4xf32, #tpu.memory_space<vmem>>, vector<8x8x4xf32>
    %69 = vector.shape_cast %68 : vector<8x8x4xf32> to vector<64x4xf32>
    %70 = arith.truncf %69 : vector<64x4xf32> to vector<64x4xbf16>
    %c7 = arith.constant 7 : index
    %c0_62 = arith.constant 0 : index
    %c0_63 = arith.constant 0 : index
    %71 = vector.load %arg4[%c7, %c0_62, %c0_63] : memref<9x4x8xbf16, #tpu.memory_space<vmem>>, vector<1x4x8xbf16>
    %72 = vector.shape_cast %71 : vector<1x4x8xbf16> to vector<4x8xbf16>
    %cst_64 = arith.constant dense<0.000000e+00> : vector<64x8xf32>
    %73 = tpu.matmul %70, %72, %cst_64 {dimension_numbers = #tpu.dot_dimension_numbers<[1], [0], [0], [1], [0, 0, 1, 1], [], []>} : vector<64x4xbf16>, vector<4x8xbf16>, vector<64x8xf32> -> vector<64x8xf32>
    %74 = arith.addf %67, %73 : vector<64x8xf32>
    %c2_65 = arith.constant 2 : index
    %c2_66 = arith.constant 2 : index
    %c0_67 = arith.constant 0 : index
    %75 = tpu.strided_load %arg10[%c2_65, %c2_66, %c0_67] {strides = array<i32: 2, 2, 1>} : memref<18x18x4xf32, #tpu.memory_space<vmem>>, vector<8x8x4xf32>
    %76 = vector.shape_cast %75 : vector<8x8x4xf32> to vector<64x4xf32>
    %77 = arith.truncf %76 : vector<64x4xf32> to vector<64x4xbf16>
    %c8 = arith.constant 8 : index
    %c0_68 = arith.constant 0 : index
    %c0_69 = arith.constant 0 : index
    %78 = vector.load %arg4[%c8, %c0_68, %c0_69] : memref<9x4x8xbf16, #tpu.memory_space<vmem>>, vector<1x4x8xbf16>
    %79 = vector.shape_cast %78 : vector<1x4x8xbf16> to vector<4x8xbf16>
    %cst_70 = arith.constant dense<0.000000e+00> : vector<64x8xf32>
    %80 = tpu.matmul %77, %79, %cst_70 {dimension_numbers = #tpu.dot_dimension_numbers<[1], [0], [0], [1], [0, 0, 1, 1], [], []>} : vector<64x4xbf16>, vector<4x8xbf16>, vector<64x8xf32> -> vector<64x8xf32>
    %81 = arith.addf %74, %80 : vector<64x8xf32>
    %c0_71 = arith.constant 0 : index
    %c0_72 = arith.constant 0 : index
    %82 = vector.load %arg5[%c0_71, %c0_72] : memref<1x8xf32, #tpu.memory_space<vmem>>, vector<1x8xf32>
    %83 = vector.broadcast %82 : vector<1x8xf32> to vector<64x8xf32>
    %84 = arith.mulf %81, %83 : vector<64x8xf32>
    %c0_73 = arith.constant 0 : index
    %c0_74 = arith.constant 0 : index
    %85 = vector.load %arg6[%c0_73, %c0_74] : memref<1x8xf32, #tpu.memory_space<vmem>>, vector<1x8xf32>
    %86 = vector.broadcast %85 : vector<1x8xf32> to vector<64x8xf32>
    %87 = arith.addf %84, %86 : vector<64x8xf32>
    %cst_75 = arith.constant 0.000000e+00 : f32
    %88 = vector.broadcast %cst_75 : f32 to vector<64x8xf32>
    %89 = arith.cmpf oge, %87, %88 : vector<64x8xf32>
    %cst_76 = arith.constant 1.000000e-01 : f32
    %90 = vector.broadcast %cst_76 : f32 to vector<64x8xf32>
    %91 = arith.mulf %90, %87 : vector<64x8xf32>
    %92 = arith.select %89, %87, %91 : vector<64x8xi1>, vector<64x8xf32>
    %cst_77 = arith.constant 0.000000e+00 : f32
    %93 = vector.broadcast %cst_77 : f32 to vector<10x10x8xf32>
    %c0_78 = arith.constant 0 : index
    %c0_79 = arith.constant 0 : index
    %c0_80 = arith.constant 0 : index
    %94 = vector.load %arg11[%c0_78, %c0_79, %c0_80] : memref<10x10x8xf32, #tpu.memory_space<vmem>>, vector<10x10x8xf32>
    tpu.vector_store %arg11[%c0_78, %c0_79, %c0_80], %93 {strides = array<i32>} : memref<10x10x8xf32, #tpu.memory_space<vmem>>, vector<10x10x8xf32>,
    %95 = vector.shape_cast %92 : vector<64x8xf32> to vector<8x8x8xf32>
    %c1_81 = arith.constant 1 : index
    %c1_82 = arith.constant 1 : index
    %c0_83 = arith.constant 0 : index
    %96 = vector.load %arg11[%c1_81, %c1_82, %c0_83] : memref<10x10x8xf32, #tpu.memory_space<vmem>>, vector<8x8x8xf32>
    tpu.vector_store %arg11[%c1_81, %c1_82, %c0_83], %95 {strides = array<i32>} : memref<10x10x8xf32, #tpu.memory_space<vmem>>, vector<8x8x8xf32>,
    %cst_84 = arith.constant 0.000000e+00 : f32
    %97 = vector.broadcast %cst_84 : f32 to vector<64x8xf32>
    %c0_85 = arith.constant 0 : index
    %c0_86 = arith.constant 0 : index
    %c0_87 = arith.constant 0 : index
    %98 = vector.load %arg11[%c0_85, %c0_86, %c0_87] : memref<10x10x8xf32, #tpu.memory_space<vmem>>, vector<8x8x8xf32>
    %99 = vector.shape_cast %98 : vector<8x8x8xf32> to vector<64x8xf32>
    %100 = arith.truncf %99 : vector<64x8xf32> to vector<64x8xbf16>
    %c0_88 = arith.constant 0 : index
    %c0_89 = arith.constant 0 : index
    %c0_90 = arith.constant 0 : index
    %101 = vector.load %arg7[%c0_88, %c0_89, %c0_90] : memref<9x8x8xbf16, #tpu.memory_space<vmem>>, vector<1x8x8xbf16>
    %102 = vector.shape_cast %101 : vector<1x8x8xbf16> to vector<8x8xbf16>
    %cst_91 = arith.constant dense<0.000000e+00> : vector<64x8xf32>
    %103 = tpu.matmul %100, %102, %cst_91 {dimension_numbers = #tpu.dot_dimension_numbers<[1], [0], [0], [1], [0, 0, 1, 1], [], []>} : vector<64x8xbf16>, vector<8x8xbf16>, vector<64x8xf32> -> vector<64x8xf32>
    %104 = arith.addf %97, %103 : vector<64x8xf32>
    %c0_92 = arith.constant 0 : index
    %c1_93 = arith.constant 1 : index
    %c0_94 = arith.constant 0 : index
    %105 = vector.load %arg11[%c0_92, %c1_93, %c0_94] : memref<10x10x8xf32, #tpu.memory_space<vmem>>, vector<8x8x8xf32>
    %106 = vector.shape_cast %105 : vector<8x8x8xf32> to vector<64x8xf32>
    %107 = arith.truncf %106 : vector<64x8xf32> to vector<64x8xbf16>
    %c1_95 = arith.constant 1 : index
    %c0_96 = arith.constant 0 : index
    %c0_97 = arith.constant 0 : index
    %108 = vector.load %arg7[%c1_95, %c0_96, %c0_97] : memref<9x8x8xbf16, #tpu.memory_space<vmem>>, vector<1x8x8xbf16>
    %109 = vector.shape_cast %108 : vector<1x8x8xbf16> to vector<8x8xbf16>
    %cst_98 = arith.constant dense<0.000000e+00> : vector<64x8xf32>
    %110 = tpu.matmul %107, %109, %cst_98 {dimension_numbers = #tpu.dot_dimension_numbers<[1], [0], [0], [1], [0, 0, 1, 1], [], []>} : vector<64x8xbf16>, vector<8x8xbf16>, vector<64x8xf32> -> vector<64x8xf32>
    %111 = arith.addf %104, %110 : vector<64x8xf32>
    %c0_99 = arith.constant 0 : index
    %c2_100 = arith.constant 2 : index
    %c0_101 = arith.constant 0 : index
    %112 = vector.load %arg11[%c0_99, %c2_100, %c0_101] : memref<10x10x8xf32, #tpu.memory_space<vmem>>, vector<8x8x8xf32>
    %113 = vector.shape_cast %112 : vector<8x8x8xf32> to vector<64x8xf32>
    %114 = arith.truncf %113 : vector<64x8xf32> to vector<64x8xbf16>
    %c2_102 = arith.constant 2 : index
    %c0_103 = arith.constant 0 : index
    %c0_104 = arith.constant 0 : index
    %115 = vector.load %arg7[%c2_102, %c0_103, %c0_104] : memref<9x8x8xbf16, #tpu.memory_space<vmem>>, vector<1x8x8xbf16>
    %116 = vector.shape_cast %115 : vector<1x8x8xbf16> to vector<8x8xbf16>
    %cst_105 = arith.constant dense<0.000000e+00> : vector<64x8xf32>
    %117 = tpu.matmul %114, %116, %cst_105 {dimension_numbers = #tpu.dot_dimension_numbers<[1], [0], [0], [1], [0, 0, 1, 1], [], []>} : vector<64x8xbf16>, vector<8x8xbf16>, vector<64x8xf32> -> vector<64x8xf32>
    %118 = arith.addf %111, %117 : vector<64x8xf32>
    %c1_106 = arith.constant 1 : index
    %c0_107 = arith.constant 0 : index
    %c0_108 = arith.constant 0 : index
    %119 = vector.load %arg11[%c1_106, %c0_107, %c0_108] : memref<10x10x8xf32, #tpu.memory_space<vmem>>, vector<8x8x8xf32>
    %120 = vector.shape_cast %119 : vector<8x8x8xf32> to vector<64x8xf32>
    %121 = arith.truncf %120 : vector<64x8xf32> to vector<64x8xbf16>
    %c3_109 = arith.constant 3 : index
    %c0_110 = arith.constant 0 : index
    %c0_111 = arith.constant 0 : index
    %122 = vector.load %arg7[%c3_109, %c0_110, %c0_111] : memref<9x8x8xbf16, #tpu.memory_space<vmem>>, vector<1x8x8xbf16>
    %123 = vector.shape_cast %122 : vector<1x8x8xbf16> to vector<8x8xbf16>
    %cst_112 = arith.constant dense<0.000000e+00> : vector<64x8xf32>
    %124 = tpu.matmul %121, %123, %cst_112 {dimension_numbers = #tpu.dot_dimension_numbers<[1], [0], [0], [1], [0, 0, 1, 1], [], []>} : vector<64x8xbf16>, vector<8x8xbf16>, vector<64x8xf32> -> vector<64x8xf32>
    %125 = arith.addf %118, %124 : vector<64x8xf32>
    %c1_113 = arith.constant 1 : index
    %c1_114 = arith.constant 1 : index
    %c0_115 = arith.constant 0 : index
    %126 = vector.load %arg11[%c1_113, %c1_114, %c0_115] : memref<10x10x8xf32, #tpu.memory_space<vmem>>, vector<8x8x8xf32>
    %127 = vector.shape_cast %126 : vector<8x8x8xf32> to vector<64x8xf32>
    %128 = arith.truncf %127 : vector<64x8xf32> to vector<64x8xbf16>
    %c4_116 = arith.constant 4 : index
    %c0_117 = arith.constant 0 : index
    %c0_118 = arith.constant 0 : index
    %129 = vector.load %arg7[%c4_116, %c0_117, %c0_118] : memref<9x8x8xbf16, #tpu.memory_space<vmem>>, vector<1x8x8xbf16>
    %130 = vector.shape_cast %129 : vector<1x8x8xbf16> to vector<8x8xbf16>
    %cst_119 = arith.constant dense<0.000000e+00> : vector<64x8xf32>
    %131 = tpu.matmul %128, %130, %cst_119 {dimension_numbers = #tpu.dot_dimension_numbers<[1], [0], [0], [1], [0, 0, 1, 1], [], []>} : vector<64x8xbf16>, vector<8x8xbf16>, vector<64x8xf32> -> vector<64x8xf32>
    %132 = arith.addf %125, %131 : vector<64x8xf32>
    %c1_120 = arith.constant 1 : index
    %c2_121 = arith.constant 2 : index
    %c0_122 = arith.constant 0 : index
    %133 = vector.load %arg11[%c1_120, %c2_121, %c0_122] : memref<10x10x8xf32, #tpu.memory_space<vmem>>, vector<8x8x8xf32>
    %134 = vector.shape_cast %133 : vector<8x8x8xf32> to vector<64x8xf32>
    %135 = arith.truncf %134 : vector<64x8xf32> to vector<64x8xbf16>
    %c5_123 = arith.constant 5 : index
    %c0_124 = arith.constant 0 : index
    %c0_125 = arith.constant 0 : index
    %136 = vector.load %arg7[%c5_123, %c0_124, %c0_125] : memref<9x8x8xbf16, #tpu.memory_space<vmem>>, vector<1x8x8xbf16>
    %137 = vector.shape_cast %136 : vector<1x8x8xbf16> to vector<8x8xbf16>
    %cst_126 = arith.constant dense<0.000000e+00> : vector<64x8xf32>
    %138 = tpu.matmul %135, %137, %cst_126 {dimension_numbers = #tpu.dot_dimension_numbers<[1], [0], [0], [1], [0, 0, 1, 1], [], []>} : vector<64x8xbf16>, vector<8x8xbf16>, vector<64x8xf32> -> vector<64x8xf32>
    %139 = arith.addf %132, %138 : vector<64x8xf32>
    %c2_127 = arith.constant 2 : index
    %c0_128 = arith.constant 0 : index
    %c0_129 = arith.constant 0 : index
    %140 = vector.load %arg11[%c2_127, %c0_128, %c0_129] : memref<10x10x8xf32, #tpu.memory_space<vmem>>, vector<8x8x8xf32>
    %141 = vector.shape_cast %140 : vector<8x8x8xf32> to vector<64x8xf32>
    %142 = arith.truncf %141 : vector<64x8xf32> to vector<64x8xbf16>
    %c6_130 = arith.constant 6 : index
    %c0_131 = arith.constant 0 : index
    %c0_132 = arith.constant 0 : index
    %143 = vector.load %arg7[%c6_130, %c0_131, %c0_132] : memref<9x8x8xbf16, #tpu.memory_space<vmem>>, vector<1x8x8xbf16>
    %144 = vector.shape_cast %143 : vector<1x8x8xbf16> to vector<8x8xbf16>
    %cst_133 = arith.constant dense<0.000000e+00> : vector<64x8xf32>
    %145 = tpu.matmul %142, %144, %cst_133 {dimension_numbers = #tpu.dot_dimension_numbers<[1], [0], [0], [1], [0, 0, 1, 1], [], []>} : vector<64x8xbf16>, vector<8x8xbf16>, vector<64x8xf32> -> vector<64x8xf32>
    %146 = arith.addf %139, %145 : vector<64x8xf32>
    %c2_134 = arith.constant 2 : index
    %c1_135 = arith.constant 1 : index
    %c0_136 = arith.constant 0 : index
    %147 = vector.load %arg11[%c2_134, %c1_135, %c0_136] : memref<10x10x8xf32, #tpu.memory_space<vmem>>, vector<8x8x8xf32>
    %148 = vector.shape_cast %147 : vector<8x8x8xf32> to vector<64x8xf32>
    %149 = arith.truncf %148 : vector<64x8xf32> to vector<64x8xbf16>
    %c7_137 = arith.constant 7 : index
    %c0_138 = arith.constant 0 : index
    %c0_139 = arith.constant 0 : index
    %150 = vector.load %arg7[%c7_137, %c0_138, %c0_139] : memref<9x8x8xbf16, #tpu.memory_space<vmem>>, vector<1x8x8xbf16>
    %151 = vector.shape_cast %150 : vector<1x8x8xbf16> to vector<8x8xbf16>
    %cst_140 = arith.constant dense<0.000000e+00> : vector<64x8xf32>
    %152 = tpu.matmul %149, %151, %cst_140 {dimension_numbers = #tpu.dot_dimension_numbers<[1], [0], [0], [1], [0, 0, 1, 1], [], []>} : vector<64x8xbf16>, vector<8x8xbf16>, vector<64x8xf32> -> vector<64x8xf32>
    %153 = arith.addf %146, %152 : vector<64x8xf32>
    %c2_141 = arith.constant 2 : index
    %c2_142 = arith.constant 2 : index
    %c0_143 = arith.constant 0 : index
    %154 = vector.load %arg11[%c2_141, %c2_142, %c0_143] : memref<10x10x8xf32, #tpu.memory_space<vmem>>, vector<8x8x8xf32>
    %155 = vector.shape_cast %154 : vector<8x8x8xf32> to vector<64x8xf32>
    %156 = arith.truncf %155 : vector<64x8xf32> to vector<64x8xbf16>
    %c8_144 = arith.constant 8 : index
    %c0_145 = arith.constant 0 : index
    %c0_146 = arith.constant 0 : index
    %157 = vector.load %arg7[%c8_144, %c0_145, %c0_146] : memref<9x8x8xbf16, #tpu.memory_space<vmem>>, vector<1x8x8xbf16>
    %158 = vector.shape_cast %157 : vector<1x8x8xbf16> to vector<8x8xbf16>
    %cst_147 = arith.constant dense<0.000000e+00> : vector<64x8xf32>
    %159 = tpu.matmul %156, %158, %cst_147 {dimension_numbers = #tpu.dot_dimension_numbers<[1], [0], [0], [1], [0, 0, 1, 1], [], []>} : vector<64x8xbf16>, vector<8x8xbf16>, vector<64x8xf32> -> vector<64x8xf32>
    %160 = arith.addf %153, %159 : vector<64x8xf32>
    %c1_148 = arith.constant 1 : index
    %c1_149 = arith.constant 1 : index
    %c0_150 = arith.constant 0 : index
    %161 = tpu.strided_load %arg10[%c1_148, %c1_149, %c0_150] {strides = array<i32: 2, 2, 1>} : memref<18x18x4xf32, #tpu.memory_space<vmem>>, vector<8x8x4xf32>
    %162 = vector.shape_cast %161 : vector<8x8x4xf32> to vector<64x4xf32>
    %163 = arith.truncf %162 : vector<64x4xf32> to vector<64x4xbf16>
    %c0_151 = arith.constant 0 : index
    %c0_152 = arith.constant 0 : index
    %164 = vector.load %arg8[%c0_151, %c0_152] : memref<4x8xbf16, #tpu.memory_space<vmem>>, vector<4x8xbf16>
    %cst_153 = arith.constant dense<0.000000e+00> : vector<64x8xf32>
    %165 = tpu.matmul %163, %164, %cst_153 {dimension_numbers = #tpu.dot_dimension_numbers<[1], [0], [0], [1], [0, 0, 1, 1], [], []>} : vector<64x4xbf16>, vector<4x8xbf16>, vector<64x8xf32> -> vector<64x8xf32>
    %166 = arith.addf %160, %165 : vector<64x8xf32>
    %167 = vector.shape_cast %166 : vector<64x8xf32> to vector<1x8x8x8xf32>
    %c0_154 = arith.constant 0 : index
    %c0_155 = arith.constant 0 : index
    %c0_156 = arith.constant 0 : index
    %c0_157 = arith.constant 0 : index
    %168 = vector.load %arg9[%c0_154, %c0_155, %c0_156, %c0_157] : memref<1x8x8x8xf32, #tpu.memory_space<vmem>>, vector<1x8x8x8xf32>
    tpu.vector_store %arg9[%c0_154, %c0_155, %c0_156, %c0_157], %167 {strides = array<i32>} : memref<1x8x8x8xf32, #tpu.memory_space<vmem>>, vector<1x8x8x8xf32>,
    return
  }
  func.func @transform_0(%arg0: i32) -> (i32, i32, i32, i32) {
    %c0_i32 = arith.constant 0 : i32
    %c0_i32_0 = arith.constant 0 : i32
    %c0_i32_1 = arith.constant 0 : i32
    %c0_i32_2 = arith.constant 0 : i32
    return %arg0, %c0_i32, %c0_i32_0, %c0_i32_1 : i32, i32, i32, i32
  }
  func.func @transform_1(%arg0: i32) -> (i32, i32) {
    %c0_i32 = arith.constant 0 : i32
    %c0_i32_0 = arith.constant 0 : i32
    %c0_i32_1 = arith.constant 0 : i32
    return %c0_i32, %c0_i32_0 : i32, i32
  }
  func.func @transform_2(%arg0: i32) -> (i32, i32) {
    %c0_i32 = arith.constant 0 : i32
    %c0_i32_0 = arith.constant 0 : i32
    %c0_i32_1 = arith.constant 0 : i32
    return %c0_i32, %c0_i32_0 : i32, i32
  }
  func.func @transform_3(%arg0: i32) -> (i32, i32, i32) {
    %c0_i32 = arith.constant 0 : i32
    %c0_i32_0 = arith.constant 0 : i32
    %c0_i32_1 = arith.constant 0 : i32
    %c0_i32_2 = arith.constant 0 : i32
    return %c0_i32, %c0_i32_0, %c0_i32_1 : i32, i32, i32
  }
  func.func @transform_4(%arg0: i32) -> (i32, i32) {
    %c0_i32 = arith.constant 0 : i32
    %c0_i32_0 = arith.constant 0 : i32
    %c0_i32_1 = arith.constant 0 : i32
    return %c0_i32, %c0_i32_0 : i32, i32
  }
  func.func @transform_5(%arg0: i32) -> (i32, i32) {
    %c0_i32 = arith.constant 0 : i32
    %c0_i32_0 = arith.constant 0 : i32
    %c0_i32_1 = arith.constant 0 : i32
    return %c0_i32, %c0_i32_0 : i32, i32
  }
  func.func @transform_6(%arg0: i32) -> (i32, i32, i32) {
    %c0_i32 = arith.constant 0 : i32
    %c0_i32_0 = arith.constant 0 : i32
    %c0_i32_1 = arith.constant 0 : i32
    %c0_i32_2 = arith.constant 0 : i32
    return %c0_i32, %c0_i32_0, %c0_i32_1 : i32, i32, i32
  }
  func.func @transform_7(%arg0: i32) -> (i32, i32) {
    %c0_i32 = arith.constant 0 : i32
    %c0_i32_0 = arith.constant 0 : i32
    %c0_i32_1 = arith.constant 0 : i32
    return %c0_i32, %c0_i32_0 : i32, i32
  }
  func.func @transform_8(%arg0: i32) -> (i32, i32, i32, i32) {
    %c0_i32 = arith.constant 0 : i32
    %c0_i32_0 = arith.constant 0 : i32
    %c0_i32_1 = arith.constant 0 : i32
    %c0_i32_2 = arith.constant 0 : i32
    return %arg0, %c0_i32, %c0_i32_0, %c0_i32_1 : i32, i32, i32, i32
  }
}

module attributes {stable_mosaic.version = 11 : i64} {
  func.func @kernel(%arg0: i32, %arg1: memref<1x8x8x8xf32, #tpu.memory_space<vmem>>, %arg2: memref<1x8xf32, #tpu.memory_space<vmem>>, %arg3: memref<1x8xf32, #tpu.memory_space<vmem>>, %arg4: memref<9x8x8xbf16, #tpu.memory_space<vmem>>, %arg5: memref<1x8xf32, #tpu.memory_space<vmem>>, %arg6: memref<1x8xf32, #tpu.memory_space<vmem>>, %arg7: memref<9x8x8xbf16, #tpu.memory_space<vmem>>, %arg8: memref<1x8x8x8xf32, #tpu.memory_space<vmem>>, %arg9: memref<10x10x8xf32, #tpu.memory_space<vmem>>, %arg10: memref<10x10x8xf32, #tpu.memory_space<vmem>>) attributes {dimension_semantics = [#tpu.dimension_semantics<parallel>], iteration_bounds = array<i64: 2>, scalar_prefetch = 0 : i64, scratch_operands = 2 : i64, tpu.core_type = #tpu.core_type<tc>, window_params = [{transform_indices = @transform_0, window_bounds = array<i64: 1, 8, 8, 8>}, {pipeline_mode = #tpu.pipeline_mode<synchronous>, transform_indices = @transform_1, window_bounds = array<i64: 1, 8>}, {pipeline_mode = #tpu.pipeline_mode<synchronous>, transform_indices = @transform_2, window_bounds = array<i64: 1, 8>}, {pipeline_mode = #tpu.pipeline_mode<synchronous>, transform_indices = @transform_3, window_bounds = array<i64: 9, 8, 8>}, {pipeline_mode = #tpu.pipeline_mode<synchronous>, transform_indices = @transform_4, window_bounds = array<i64: 1, 8>}, {pipeline_mode = #tpu.pipeline_mode<synchronous>, transform_indices = @transform_5, window_bounds = array<i64: 1, 8>}, {pipeline_mode = #tpu.pipeline_mode<synchronous>, transform_indices = @transform_6, window_bounds = array<i64: 9, 8, 8>}, {transform_indices = @transform_7, window_bounds = array<i64: 1, 8, 8, 8>}]} {
    %c0 = arith.constant 0 : index
    %c0_0 = arith.constant 0 : index
    %c0_1 = arith.constant 0 : index
    %c0_2 = arith.constant 0 : index
    %0 = vector.load %arg1[%c0, %c0_0, %c0_1, %c0_2] : memref<1x8x8x8xf32, #tpu.memory_space<vmem>>, vector<1x8x8x8xf32>
    %1 = vector.shape_cast %0 : vector<1x8x8x8xf32> to vector<8x8x8xf32>
    %c0_3 = arith.constant 0 : index
    %c0_4 = arith.constant 0 : index
    %2 = vector.load %arg2[%c0_3, %c0_4] : memref<1x8xf32, #tpu.memory_space<vmem>>, vector<1x8xf32>
    %3 = vector.shape_cast %2 : vector<1x8xf32> to vector<1x1x8xf32>
    %4 = vector.broadcast %3 : vector<1x1x8xf32> to vector<8x8x8xf32>
    %5 = arith.mulf %1, %4 : vector<8x8x8xf32>
    %c0_5 = arith.constant 0 : index
    %c0_6 = arith.constant 0 : index
    %6 = vector.load %arg3[%c0_5, %c0_6] : memref<1x8xf32, #tpu.memory_space<vmem>>, vector<1x8xf32>
    %7 = vector.shape_cast %6 : vector<1x8xf32> to vector<1x1x8xf32>
    %8 = vector.broadcast %7 : vector<1x1x8xf32> to vector<8x8x8xf32>
    %9 = arith.addf %5, %8 : vector<8x8x8xf32>
    %cst = arith.constant 0.000000e+00 : f32
    %10 = vector.broadcast %cst : f32 to vector<8x8x8xf32>
    %11 = arith.cmpf oge, %9, %10 : vector<8x8x8xf32>
    %cst_7 = arith.constant 1.000000e-01 : f32
    %12 = vector.broadcast %cst_7 : f32 to vector<8x8x8xf32>
    %13 = arith.mulf %12, %9 : vector<8x8x8xf32>
    %14 = arith.select %11, %9, %13 : vector<8x8x8xi1>, vector<8x8x8xf32>
    %cst_8 = arith.constant 0.000000e+00 : f32
    %15 = vector.broadcast %cst_8 : f32 to vector<10x10x8xf32>
    %c0_9 = arith.constant 0 : index
    %c0_10 = arith.constant 0 : index
    %c0_11 = arith.constant 0 : index
    %16 = vector.load %arg9[%c0_9, %c0_10, %c0_11] : memref<10x10x8xf32, #tpu.memory_space<vmem>>, vector<10x10x8xf32>
    tpu.vector_store %arg9[%c0_9, %c0_10, %c0_11], %15 {strides = array<i32>} : memref<10x10x8xf32, #tpu.memory_space<vmem>>, vector<10x10x8xf32>,
    %c1 = arith.constant 1 : index
    %c1_12 = arith.constant 1 : index
    %c0_13 = arith.constant 0 : index
    %17 = vector.load %arg9[%c1, %c1_12, %c0_13] : memref<10x10x8xf32, #tpu.memory_space<vmem>>, vector<8x8x8xf32>
    tpu.vector_store %arg9[%c1, %c1_12, %c0_13], %14 {strides = array<i32>} : memref<10x10x8xf32, #tpu.memory_space<vmem>>, vector<8x8x8xf32>,
    %cst_14 = arith.constant 0.000000e+00 : f32
    %18 = vector.broadcast %cst_14 : f32 to vector<64x8xf32>
    %c0_15 = arith.constant 0 : index
    %c0_16 = arith.constant 0 : index
    %c0_17 = arith.constant 0 : index
    %19 = vector.load %arg9[%c0_15, %c0_16, %c0_17] : memref<10x10x8xf32, #tpu.memory_space<vmem>>, vector<8x8x8xf32>
    %20 = vector.shape_cast %19 : vector<8x8x8xf32> to vector<64x8xf32>
    %21 = arith.truncf %20 : vector<64x8xf32> to vector<64x8xbf16>
    %c0_18 = arith.constant 0 : index
    %c0_19 = arith.constant 0 : index
    %c0_20 = arith.constant 0 : index
    %22 = vector.load %arg4[%c0_18, %c0_19, %c0_20] : memref<9x8x8xbf16, #tpu.memory_space<vmem>>, vector<1x8x8xbf16>
    %23 = vector.shape_cast %22 : vector<1x8x8xbf16> to vector<8x8xbf16>
    %cst_21 = arith.constant dense<0.000000e+00> : vector<64x8xf32>
    %24 = tpu.matmul %21, %23, %cst_21 {dimension_numbers = #tpu.dot_dimension_numbers<[1], [0], [0], [1], [0, 0, 1, 1], [], []>} : vector<64x8xbf16>, vector<8x8xbf16>, vector<64x8xf32> -> vector<64x8xf32>
    %25 = arith.addf %18, %24 : vector<64x8xf32>
    %c0_22 = arith.constant 0 : index
    %c1_23 = arith.constant 1 : index
    %c0_24 = arith.constant 0 : index
    %26 = vector.load %arg9[%c0_22, %c1_23, %c0_24] : memref<10x10x8xf32, #tpu.memory_space<vmem>>, vector<8x8x8xf32>
    %27 = vector.shape_cast %26 : vector<8x8x8xf32> to vector<64x8xf32>
    %28 = arith.truncf %27 : vector<64x8xf32> to vector<64x8xbf16>
    %c1_25 = arith.constant 1 : index
    %c0_26 = arith.constant 0 : index
    %c0_27 = arith.constant 0 : index
    %29 = vector.load %arg4[%c1_25, %c0_26, %c0_27] : memref<9x8x8xbf16, #tpu.memory_space<vmem>>, vector<1x8x8xbf16>
    %30 = vector.shape_cast %29 : vector<1x8x8xbf16> to vector<8x8xbf16>
    %cst_28 = arith.constant dense<0.000000e+00> : vector<64x8xf32>
    %31 = tpu.matmul %28, %30, %cst_28 {dimension_numbers = #tpu.dot_dimension_numbers<[1], [0], [0], [1], [0, 0, 1, 1], [], []>} : vector<64x8xbf16>, vector<8x8xbf16>, vector<64x8xf32> -> vector<64x8xf32>
    %32 = arith.addf %25, %31 : vector<64x8xf32>
    %c0_29 = arith.constant 0 : index
    %c2 = arith.constant 2 : index
    %c0_30 = arith.constant 0 : index
    %33 = vector.load %arg9[%c0_29, %c2, %c0_30] : memref<10x10x8xf32, #tpu.memory_space<vmem>>, vector<8x8x8xf32>
    %34 = vector.shape_cast %33 : vector<8x8x8xf32> to vector<64x8xf32>
    %35 = arith.truncf %34 : vector<64x8xf32> to vector<64x8xbf16>
    %c2_31 = arith.constant 2 : index
    %c0_32 = arith.constant 0 : index
    %c0_33 = arith.constant 0 : index
    %36 = vector.load %arg4[%c2_31, %c0_32, %c0_33] : memref<9x8x8xbf16, #tpu.memory_space<vmem>>, vector<1x8x8xbf16>
    %37 = vector.shape_cast %36 : vector<1x8x8xbf16> to vector<8x8xbf16>
    %cst_34 = arith.constant dense<0.000000e+00> : vector<64x8xf32>
    %38 = tpu.matmul %35, %37, %cst_34 {dimension_numbers = #tpu.dot_dimension_numbers<[1], [0], [0], [1], [0, 0, 1, 1], [], []>} : vector<64x8xbf16>, vector<8x8xbf16>, vector<64x8xf32> -> vector<64x8xf32>
    %39 = arith.addf %32, %38 : vector<64x8xf32>
    %c1_35 = arith.constant 1 : index
    %c0_36 = arith.constant 0 : index
    %c0_37 = arith.constant 0 : index
    %40 = vector.load %arg9[%c1_35, %c0_36, %c0_37] : memref<10x10x8xf32, #tpu.memory_space<vmem>>, vector<8x8x8xf32>
    %41 = vector.shape_cast %40 : vector<8x8x8xf32> to vector<64x8xf32>
    %42 = arith.truncf %41 : vector<64x8xf32> to vector<64x8xbf16>
    %c3 = arith.constant 3 : index
    %c0_38 = arith.constant 0 : index
    %c0_39 = arith.constant 0 : index
    %43 = vector.load %arg4[%c3, %c0_38, %c0_39] : memref<9x8x8xbf16, #tpu.memory_space<vmem>>, vector<1x8x8xbf16>
    %44 = vector.shape_cast %43 : vector<1x8x8xbf16> to vector<8x8xbf16>
    %cst_40 = arith.constant dense<0.000000e+00> : vector<64x8xf32>
    %45 = tpu.matmul %42, %44, %cst_40 {dimension_numbers = #tpu.dot_dimension_numbers<[1], [0], [0], [1], [0, 0, 1, 1], [], []>} : vector<64x8xbf16>, vector<8x8xbf16>, vector<64x8xf32> -> vector<64x8xf32>
    %46 = arith.addf %39, %45 : vector<64x8xf32>
    %c1_41 = arith.constant 1 : index
    %c1_42 = arith.constant 1 : index
    %c0_43 = arith.constant 0 : index
    %47 = vector.load %arg9[%c1_41, %c1_42, %c0_43] : memref<10x10x8xf32, #tpu.memory_space<vmem>>, vector<8x8x8xf32>
    %48 = vector.shape_cast %47 : vector<8x8x8xf32> to vector<64x8xf32>
    %49 = arith.truncf %48 : vector<64x8xf32> to vector<64x8xbf16>
    %c4 = arith.constant 4 : index
    %c0_44 = arith.constant 0 : index
    %c0_45 = arith.constant 0 : index
    %50 = vector.load %arg4[%c4, %c0_44, %c0_45] : memref<9x8x8xbf16, #tpu.memory_space<vmem>>, vector<1x8x8xbf16>
    %51 = vector.shape_cast %50 : vector<1x8x8xbf16> to vector<8x8xbf16>
    %cst_46 = arith.constant dense<0.000000e+00> : vector<64x8xf32>
    %52 = tpu.matmul %49, %51, %cst_46 {dimension_numbers = #tpu.dot_dimension_numbers<[1], [0], [0], [1], [0, 0, 1, 1], [], []>} : vector<64x8xbf16>, vector<8x8xbf16>, vector<64x8xf32> -> vector<64x8xf32>
    %53 = arith.addf %46, %52 : vector<64x8xf32>
    %c1_47 = arith.constant 1 : index
    %c2_48 = arith.constant 2 : index
    %c0_49 = arith.constant 0 : index
    %54 = vector.load %arg9[%c1_47, %c2_48, %c0_49] : memref<10x10x8xf32, #tpu.memory_space<vmem>>, vector<8x8x8xf32>
    %55 = vector.shape_cast %54 : vector<8x8x8xf32> to vector<64x8xf32>
    %56 = arith.truncf %55 : vector<64x8xf32> to vector<64x8xbf16>
    %c5 = arith.constant 5 : index
    %c0_50 = arith.constant 0 : index
    %c0_51 = arith.constant 0 : index
    %57 = vector.load %arg4[%c5, %c0_50, %c0_51] : memref<9x8x8xbf16, #tpu.memory_space<vmem>>, vector<1x8x8xbf16>
    %58 = vector.shape_cast %57 : vector<1x8x8xbf16> to vector<8x8xbf16>
    %cst_52 = arith.constant dense<0.000000e+00> : vector<64x8xf32>
    %59 = tpu.matmul %56, %58, %cst_52 {dimension_numbers = #tpu.dot_dimension_numbers<[1], [0], [0], [1], [0, 0, 1, 1], [], []>} : vector<64x8xbf16>, vector<8x8xbf16>, vector<64x8xf32> -> vector<64x8xf32>
    %60 = arith.addf %53, %59 : vector<64x8xf32>
    %c2_53 = arith.constant 2 : index
    %c0_54 = arith.constant 0 : index
    %c0_55 = arith.constant 0 : index
    %61 = vector.load %arg9[%c2_53, %c0_54, %c0_55] : memref<10x10x8xf32, #tpu.memory_space<vmem>>, vector<8x8x8xf32>
    %62 = vector.shape_cast %61 : vector<8x8x8xf32> to vector<64x8xf32>
    %63 = arith.truncf %62 : vector<64x8xf32> to vector<64x8xbf16>
    %c6 = arith.constant 6 : index
    %c0_56 = arith.constant 0 : index
    %c0_57 = arith.constant 0 : index
    %64 = vector.load %arg4[%c6, %c0_56, %c0_57] : memref<9x8x8xbf16, #tpu.memory_space<vmem>>, vector<1x8x8xbf16>
    %65 = vector.shape_cast %64 : vector<1x8x8xbf16> to vector<8x8xbf16>
    %cst_58 = arith.constant dense<0.000000e+00> : vector<64x8xf32>
    %66 = tpu.matmul %63, %65, %cst_58 {dimension_numbers = #tpu.dot_dimension_numbers<[1], [0], [0], [1], [0, 0, 1, 1], [], []>} : vector<64x8xbf16>, vector<8x8xbf16>, vector<64x8xf32> -> vector<64x8xf32>
    %67 = arith.addf %60, %66 : vector<64x8xf32>
    %c2_59 = arith.constant 2 : index
    %c1_60 = arith.constant 1 : index
    %c0_61 = arith.constant 0 : index
    %68 = vector.load %arg9[%c2_59, %c1_60, %c0_61] : memref<10x10x8xf32, #tpu.memory_space<vmem>>, vector<8x8x8xf32>
    %69 = vector.shape_cast %68 : vector<8x8x8xf32> to vector<64x8xf32>
    %70 = arith.truncf %69 : vector<64x8xf32> to vector<64x8xbf16>
    %c7 = arith.constant 7 : index
    %c0_62 = arith.constant 0 : index
    %c0_63 = arith.constant 0 : index
    %71 = vector.load %arg4[%c7, %c0_62, %c0_63] : memref<9x8x8xbf16, #tpu.memory_space<vmem>>, vector<1x8x8xbf16>
    %72 = vector.shape_cast %71 : vector<1x8x8xbf16> to vector<8x8xbf16>
    %cst_64 = arith.constant dense<0.000000e+00> : vector<64x8xf32>
    %73 = tpu.matmul %70, %72, %cst_64 {dimension_numbers = #tpu.dot_dimension_numbers<[1], [0], [0], [1], [0, 0, 1, 1], [], []>} : vector<64x8xbf16>, vector<8x8xbf16>, vector<64x8xf32> -> vector<64x8xf32>
    %74 = arith.addf %67, %73 : vector<64x8xf32>
    %c2_65 = arith.constant 2 : index
    %c2_66 = arith.constant 2 : index
    %c0_67 = arith.constant 0 : index
    %75 = vector.load %arg9[%c2_65, %c2_66, %c0_67] : memref<10x10x8xf32, #tpu.memory_space<vmem>>, vector<8x8x8xf32>
    %76 = vector.shape_cast %75 : vector<8x8x8xf32> to vector<64x8xf32>
    %77 = arith.truncf %76 : vector<64x8xf32> to vector<64x8xbf16>
    %c8 = arith.constant 8 : index
    %c0_68 = arith.constant 0 : index
    %c0_69 = arith.constant 0 : index
    %78 = vector.load %arg4[%c8, %c0_68, %c0_69] : memref<9x8x8xbf16, #tpu.memory_space<vmem>>, vector<1x8x8xbf16>
    %79 = vector.shape_cast %78 : vector<1x8x8xbf16> to vector<8x8xbf16>
    %cst_70 = arith.constant dense<0.000000e+00> : vector<64x8xf32>
    %80 = tpu.matmul %77, %79, %cst_70 {dimension_numbers = #tpu.dot_dimension_numbers<[1], [0], [0], [1], [0, 0, 1, 1], [], []>} : vector<64x8xbf16>, vector<8x8xbf16>, vector<64x8xf32> -> vector<64x8xf32>
    %81 = arith.addf %74, %80 : vector<64x8xf32>
    %c0_71 = arith.constant 0 : index
    %c0_72 = arith.constant 0 : index
    %82 = vector.load %arg5[%c0_71, %c0_72] : memref<1x8xf32, #tpu.memory_space<vmem>>, vector<1x8xf32>
    %83 = vector.broadcast %82 : vector<1x8xf32> to vector<64x8xf32>
    %84 = arith.mulf %81, %83 : vector<64x8xf32>
    %c0_73 = arith.constant 0 : index
    %c0_74 = arith.constant 0 : index
    %85 = vector.load %arg6[%c0_73, %c0_74] : memref<1x8xf32, #tpu.memory_space<vmem>>, vector<1x8xf32>
    %86 = vector.broadcast %85 : vector<1x8xf32> to vector<64x8xf32>
    %87 = arith.addf %84, %86 : vector<64x8xf32>
    %cst_75 = arith.constant 0.000000e+00 : f32
    %88 = vector.broadcast %cst_75 : f32 to vector<64x8xf32>
    %89 = arith.cmpf oge, %87, %88 : vector<64x8xf32>
    %cst_76 = arith.constant 1.000000e-01 : f32
    %90 = vector.broadcast %cst_76 : f32 to vector<64x8xf32>
    %91 = arith.mulf %90, %87 : vector<64x8xf32>
    %92 = arith.select %89, %87, %91 : vector<64x8xi1>, vector<64x8xf32>
    %cst_77 = arith.constant 0.000000e+00 : f32
    %93 = vector.broadcast %cst_77 : f32 to vector<10x10x8xf32>
    %c0_78 = arith.constant 0 : index
    %c0_79 = arith.constant 0 : index
    %c0_80 = arith.constant 0 : index
    %94 = vector.load %arg10[%c0_78, %c0_79, %c0_80] : memref<10x10x8xf32, #tpu.memory_space<vmem>>, vector<10x10x8xf32>
    tpu.vector_store %arg10[%c0_78, %c0_79, %c0_80], %93 {strides = array<i32>} : memref<10x10x8xf32, #tpu.memory_space<vmem>>, vector<10x10x8xf32>,
    %95 = vector.shape_cast %92 : vector<64x8xf32> to vector<8x8x8xf32>
    %c1_81 = arith.constant 1 : index
    %c1_82 = arith.constant 1 : index
    %c0_83 = arith.constant 0 : index
    %96 = vector.load %arg10[%c1_81, %c1_82, %c0_83] : memref<10x10x8xf32, #tpu.memory_space<vmem>>, vector<8x8x8xf32>
    tpu.vector_store %arg10[%c1_81, %c1_82, %c0_83], %95 {strides = array<i32>} : memref<10x10x8xf32, #tpu.memory_space<vmem>>, vector<8x8x8xf32>,
    %cst_84 = arith.constant 0.000000e+00 : f32
    %97 = vector.broadcast %cst_84 : f32 to vector<64x8xf32>
    %c0_85 = arith.constant 0 : index
    %c0_86 = arith.constant 0 : index
    %c0_87 = arith.constant 0 : index
    %98 = vector.load %arg10[%c0_85, %c0_86, %c0_87] : memref<10x10x8xf32, #tpu.memory_space<vmem>>, vector<8x8x8xf32>
    %99 = vector.shape_cast %98 : vector<8x8x8xf32> to vector<64x8xf32>
    %100 = arith.truncf %99 : vector<64x8xf32> to vector<64x8xbf16>
    %c0_88 = arith.constant 0 : index
    %c0_89 = arith.constant 0 : index
    %c0_90 = arith.constant 0 : index
    %101 = vector.load %arg7[%c0_88, %c0_89, %c0_90] : memref<9x8x8xbf16, #tpu.memory_space<vmem>>, vector<1x8x8xbf16>
    %102 = vector.shape_cast %101 : vector<1x8x8xbf16> to vector<8x8xbf16>
    %cst_91 = arith.constant dense<0.000000e+00> : vector<64x8xf32>
    %103 = tpu.matmul %100, %102, %cst_91 {dimension_numbers = #tpu.dot_dimension_numbers<[1], [0], [0], [1], [0, 0, 1, 1], [], []>} : vector<64x8xbf16>, vector<8x8xbf16>, vector<64x8xf32> -> vector<64x8xf32>
    %104 = arith.addf %97, %103 : vector<64x8xf32>
    %c0_92 = arith.constant 0 : index
    %c1_93 = arith.constant 1 : index
    %c0_94 = arith.constant 0 : index
    %105 = vector.load %arg10[%c0_92, %c1_93, %c0_94] : memref<10x10x8xf32, #tpu.memory_space<vmem>>, vector<8x8x8xf32>
    %106 = vector.shape_cast %105 : vector<8x8x8xf32> to vector<64x8xf32>
    %107 = arith.truncf %106 : vector<64x8xf32> to vector<64x8xbf16>
    %c1_95 = arith.constant 1 : index
    %c0_96 = arith.constant 0 : index
    %c0_97 = arith.constant 0 : index
    %108 = vector.load %arg7[%c1_95, %c0_96, %c0_97] : memref<9x8x8xbf16, #tpu.memory_space<vmem>>, vector<1x8x8xbf16>
    %109 = vector.shape_cast %108 : vector<1x8x8xbf16> to vector<8x8xbf16>
    %cst_98 = arith.constant dense<0.000000e+00> : vector<64x8xf32>
    %110 = tpu.matmul %107, %109, %cst_98 {dimension_numbers = #tpu.dot_dimension_numbers<[1], [0], [0], [1], [0, 0, 1, 1], [], []>} : vector<64x8xbf16>, vector<8x8xbf16>, vector<64x8xf32> -> vector<64x8xf32>
    %111 = arith.addf %104, %110 : vector<64x8xf32>
    %c0_99 = arith.constant 0 : index
    %c2_100 = arith.constant 2 : index
    %c0_101 = arith.constant 0 : index
    %112 = vector.load %arg10[%c0_99, %c2_100, %c0_101] : memref<10x10x8xf32, #tpu.memory_space<vmem>>, vector<8x8x8xf32>
    %113 = vector.shape_cast %112 : vector<8x8x8xf32> to vector<64x8xf32>
    %114 = arith.truncf %113 : vector<64x8xf32> to vector<64x8xbf16>
    %c2_102 = arith.constant 2 : index
    %c0_103 = arith.constant 0 : index
    %c0_104 = arith.constant 0 : index
    %115 = vector.load %arg7[%c2_102, %c0_103, %c0_104] : memref<9x8x8xbf16, #tpu.memory_space<vmem>>, vector<1x8x8xbf16>
    %116 = vector.shape_cast %115 : vector<1x8x8xbf16> to vector<8x8xbf16>
    %cst_105 = arith.constant dense<0.000000e+00> : vector<64x8xf32>
    %117 = tpu.matmul %114, %116, %cst_105 {dimension_numbers = #tpu.dot_dimension_numbers<[1], [0], [0], [1], [0, 0, 1, 1], [], []>} : vector<64x8xbf16>, vector<8x8xbf16>, vector<64x8xf32> -> vector<64x8xf32>
    %118 = arith.addf %111, %117 : vector<64x8xf32>
    %c1_106 = arith.constant 1 : index
    %c0_107 = arith.constant 0 : index
    %c0_108 = arith.constant 0 : index
    %119 = vector.load %arg10[%c1_106, %c0_107, %c0_108] : memref<10x10x8xf32, #tpu.memory_space<vmem>>, vector<8x8x8xf32>
    %120 = vector.shape_cast %119 : vector<8x8x8xf32> to vector<64x8xf32>
    %121 = arith.truncf %120 : vector<64x8xf32> to vector<64x8xbf16>
    %c3_109 = arith.constant 3 : index
    %c0_110 = arith.constant 0 : index
    %c0_111 = arith.constant 0 : index
    %122 = vector.load %arg7[%c3_109, %c0_110, %c0_111] : memref<9x8x8xbf16, #tpu.memory_space<vmem>>, vector<1x8x8xbf16>
    %123 = vector.shape_cast %122 : vector<1x8x8xbf16> to vector<8x8xbf16>
    %cst_112 = arith.constant dense<0.000000e+00> : vector<64x8xf32>
    %124 = tpu.matmul %121, %123, %cst_112 {dimension_numbers = #tpu.dot_dimension_numbers<[1], [0], [0], [1], [0, 0, 1, 1], [], []>} : vector<64x8xbf16>, vector<8x8xbf16>, vector<64x8xf32> -> vector<64x8xf32>
    %125 = arith.addf %118, %124 : vector<64x8xf32>
    %c1_113 = arith.constant 1 : index
    %c1_114 = arith.constant 1 : index
    %c0_115 = arith.constant 0 : index
    %126 = vector.load %arg10[%c1_113, %c1_114, %c0_115] : memref<10x10x8xf32, #tpu.memory_space<vmem>>, vector<8x8x8xf32>
    %127 = vector.shape_cast %126 : vector<8x8x8xf32> to vector<64x8xf32>
    %128 = arith.truncf %127 : vector<64x8xf32> to vector<64x8xbf16>
    %c4_116 = arith.constant 4 : index
    %c0_117 = arith.constant 0 : index
    %c0_118 = arith.constant 0 : index
    %129 = vector.load %arg7[%c4_116, %c0_117, %c0_118] : memref<9x8x8xbf16, #tpu.memory_space<vmem>>, vector<1x8x8xbf16>
    %130 = vector.shape_cast %129 : vector<1x8x8xbf16> to vector<8x8xbf16>
    %cst_119 = arith.constant dense<0.000000e+00> : vector<64x8xf32>
    %131 = tpu.matmul %128, %130, %cst_119 {dimension_numbers = #tpu.dot_dimension_numbers<[1], [0], [0], [1], [0, 0, 1, 1], [], []>} : vector<64x8xbf16>, vector<8x8xbf16>, vector<64x8xf32> -> vector<64x8xf32>
    %132 = arith.addf %125, %131 : vector<64x8xf32>
    %c1_120 = arith.constant 1 : index
    %c2_121 = arith.constant 2 : index
    %c0_122 = arith.constant 0 : index
    %133 = vector.load %arg10[%c1_120, %c2_121, %c0_122] : memref<10x10x8xf32, #tpu.memory_space<vmem>>, vector<8x8x8xf32>
    %134 = vector.shape_cast %133 : vector<8x8x8xf32> to vector<64x8xf32>
    %135 = arith.truncf %134 : vector<64x8xf32> to vector<64x8xbf16>
    %c5_123 = arith.constant 5 : index
    %c0_124 = arith.constant 0 : index
    %c0_125 = arith.constant 0 : index
    %136 = vector.load %arg7[%c5_123, %c0_124, %c0_125] : memref<9x8x8xbf16, #tpu.memory_space<vmem>>, vector<1x8x8xbf16>
    %137 = vector.shape_cast %136 : vector<1x8x8xbf16> to vector<8x8xbf16>
    %cst_126 = arith.constant dense<0.000000e+00> : vector<64x8xf32>
    %138 = tpu.matmul %135, %137, %cst_126 {dimension_numbers = #tpu.dot_dimension_numbers<[1], [0], [0], [1], [0, 0, 1, 1], [], []>} : vector<64x8xbf16>, vector<8x8xbf16>, vector<64x8xf32> -> vector<64x8xf32>
    %139 = arith.addf %132, %138 : vector<64x8xf32>
    %c2_127 = arith.constant 2 : index
    %c0_128 = arith.constant 0 : index
    %c0_129 = arith.constant 0 : index
    %140 = vector.load %arg10[%c2_127, %c0_128, %c0_129] : memref<10x10x8xf32, #tpu.memory_space<vmem>>, vector<8x8x8xf32>
    %141 = vector.shape_cast %140 : vector<8x8x8xf32> to vector<64x8xf32>
    %142 = arith.truncf %141 : vector<64x8xf32> to vector<64x8xbf16>
    %c6_130 = arith.constant 6 : index
    %c0_131 = arith.constant 0 : index
    %c0_132 = arith.constant 0 : index
    %143 = vector.load %arg7[%c6_130, %c0_131, %c0_132] : memref<9x8x8xbf16, #tpu.memory_space<vmem>>, vector<1x8x8xbf16>
    %144 = vector.shape_cast %143 : vector<1x8x8xbf16> to vector<8x8xbf16>
    %cst_133 = arith.constant dense<0.000000e+00> : vector<64x8xf32>
    %145 = tpu.matmul %142, %144, %cst_133 {dimension_numbers = #tpu.dot_dimension_numbers<[1], [0], [0], [1], [0, 0, 1, 1], [], []>} : vector<64x8xbf16>, vector<8x8xbf16>, vector<64x8xf32> -> vector<64x8xf32>
    %146 = arith.addf %139, %145 : vector<64x8xf32>
    %c2_134 = arith.constant 2 : index
    %c1_135 = arith.constant 1 : index
    %c0_136 = arith.constant 0 : index
    %147 = vector.load %arg10[%c2_134, %c1_135, %c0_136] : memref<10x10x8xf32, #tpu.memory_space<vmem>>, vector<8x8x8xf32>
    %148 = vector.shape_cast %147 : vector<8x8x8xf32> to vector<64x8xf32>
    %149 = arith.truncf %148 : vector<64x8xf32> to vector<64x8xbf16>
    %c7_137 = arith.constant 7 : index
    %c0_138 = arith.constant 0 : index
    %c0_139 = arith.constant 0 : index
    %150 = vector.load %arg7[%c7_137, %c0_138, %c0_139] : memref<9x8x8xbf16, #tpu.memory_space<vmem>>, vector<1x8x8xbf16>
    %151 = vector.shape_cast %150 : vector<1x8x8xbf16> to vector<8x8xbf16>
    %cst_140 = arith.constant dense<0.000000e+00> : vector<64x8xf32>
    %152 = tpu.matmul %149, %151, %cst_140 {dimension_numbers = #tpu.dot_dimension_numbers<[1], [0], [0], [1], [0, 0, 1, 1], [], []>} : vector<64x8xbf16>, vector<8x8xbf16>, vector<64x8xf32> -> vector<64x8xf32>
    %153 = arith.addf %146, %152 : vector<64x8xf32>
    %c2_141 = arith.constant 2 : index
    %c2_142 = arith.constant 2 : index
    %c0_143 = arith.constant 0 : index
    %154 = vector.load %arg10[%c2_141, %c2_142, %c0_143] : memref<10x10x8xf32, #tpu.memory_space<vmem>>, vector<8x8x8xf32>
    %155 = vector.shape_cast %154 : vector<8x8x8xf32> to vector<64x8xf32>
    %156 = arith.truncf %155 : vector<64x8xf32> to vector<64x8xbf16>
    %c8_144 = arith.constant 8 : index
    %c0_145 = arith.constant 0 : index
    %c0_146 = arith.constant 0 : index
    %157 = vector.load %arg7[%c8_144, %c0_145, %c0_146] : memref<9x8x8xbf16, #tpu.memory_space<vmem>>, vector<1x8x8xbf16>
    %158 = vector.shape_cast %157 : vector<1x8x8xbf16> to vector<8x8xbf16>
    %cst_147 = arith.constant dense<0.000000e+00> : vector<64x8xf32>
    %159 = tpu.matmul %156, %158, %cst_147 {dimension_numbers = #tpu.dot_dimension_numbers<[1], [0], [0], [1], [0, 0, 1, 1], [], []>} : vector<64x8xbf16>, vector<8x8xbf16>, vector<64x8xf32> -> vector<64x8xf32>
    %160 = arith.addf %153, %159 : vector<64x8xf32>
    %161 = vector.shape_cast %1 : vector<8x8x8xf32> to vector<64x8xf32>
    %162 = arith.addf %160, %161 : vector<64x8xf32>
    %163 = vector.shape_cast %162 : vector<64x8xf32> to vector<1x8x8x8xf32>
    %c0_148 = arith.constant 0 : index
    %c0_149 = arith.constant 0 : index
    %c0_150 = arith.constant 0 : index
    %c0_151 = arith.constant 0 : index
    %164 = vector.load %arg8[%c0_148, %c0_149, %c0_150, %c0_151] : memref<1x8x8x8xf32, #tpu.memory_space<vmem>>, vector<1x8x8x8xf32>
    tpu.vector_store %arg8[%c0_148, %c0_149, %c0_150, %c0_151], %163 {strides = array<i32>} : memref<1x8x8x8xf32, #tpu.memory_space<vmem>>, vector<1x8x8x8xf32>,
    return
  }
  func.func @transform_0(%arg0: i32) -> (i32, i32, i32, i32) {
    %c0_i32 = arith.constant 0 : i32
    %c0_i32_0 = arith.constant 0 : i32
    %c0_i32_1 = arith.constant 0 : i32
    %c0_i32_2 = arith.constant 0 : i32
    return %arg0, %c0_i32, %c0_i32_0, %c0_i32_1 : i32, i32, i32, i32
  }
  func.func @transform_1(%arg0: i32) -> (i32, i32) {
    %c0_i32 = arith.constant 0 : i32
    %c0_i32_0 = arith.constant 0 : i32
    %c0_i32_1 = arith.constant 0 : i32
    return %c0_i32, %c0_i32_0 : i32, i32
  }
  func.func @transform_2(%arg0: i32) -> (i32, i32) {
    %c0_i32 = arith.constant 0 : i32
    %c0_i32_0 = arith.constant 0 : i32
    %c0_i32_1 = arith.constant 0 : i32
    return %c0_i32, %c0_i32_0 : i32, i32
  }
  func.func @transform_3(%arg0: i32) -> (i32, i32, i32) {
    %c0_i32 = arith.constant 0 : i32
    %c0_i32_0 = arith.constant 0 : i32
    %c0_i32_1 = arith.constant 0 : i32
    %c0_i32_2 = arith.constant 0 : i32
    return %c0_i32, %c0_i32_0, %c0_i32_1 : i32, i32, i32
  }
  func.func @transform_4(%arg0: i32) -> (i32, i32) {
    %c0_i32 = arith.constant 0 : i32
    %c0_i32_0 = arith.constant 0 : i32
    %c0_i32_1 = arith.constant 0 : i32
    return %c0_i32, %c0_i32_0 : i32, i32
  }
  func.func @transform_5(%arg0: i32) -> (i32, i32) {
    %c0_i32 = arith.constant 0 : i32
    %c0_i32_0 = arith.constant 0 : i32
    %c0_i32_1 = arith.constant 0 : i32
    return %c0_i32, %c0_i32_0 : i32, i32
  }
  func.func @transform_6(%arg0: i32) -> (i32, i32, i32) {
    %c0_i32 = arith.constant 0 : i32
    %c0_i32_0 = arith.constant 0 : i32
    %c0_i32_1 = arith.constant 0 : i32
    %c0_i32_2 = arith.constant 0 : i32
    return %c0_i32, %c0_i32_0, %c0_i32_1 : i32, i32, i32
  }
  func.func @transform_7(%arg0: i32) -> (i32, i32, i32, i32) {
    %c0_i32 = arith.constant 0 : i32
    %c0_i32_0 = arith.constant 0 : i32
    %c0_i32_1 = arith.constant 0 : i32
    %c0_i32_2 = arith.constant 0 : i32
    return %arg0, %c0_i32, %c0_i32_0, %c0_i32_1 : i32, i32, i32, i32
  }
}

</mosaic_0001>

<bundles_post_ra>
// kernel: network_block_forward.3
= control target key start
LH: loop header
LB: loop body
LE: loop exit
PB: predicated region body
PF: predicated region fallthrough
CT: control target
= control target key end

     0   :  { %s2791_s24 = smov 0   ;;  %s3237_s0 = inlined_call_operand.vmem [shape: f32[2,8,8,8], index: 0, kind: input, shape index: {}]   ;;  %s3238_s1 = inlined_call_operand.vmem [shape: f32[1,8], index: 1, kind: input, shape index: {}]   ;;  %s3239_s2 = inlined_call_operand.vmem [shape: f32[1,8], index: 2, kind: input, shape index: {}]   ;;  %s3240_s3 = inlined_call_operand.vmem [shape: bf16[9,8,8], index: 3, kind: input, shape index: {}]   ;;  %s3241_s4 = inlined_call_operand.vmem [shape: f32[1,8], index: 4, kind: input, shape index: {}]   ;;  %s3242_s5 = inlined_call_operand.vmem [shape: f32[1,8], index: 5, kind: input, shape index: {}]   ;;  %s3243_s6 = inlined_call_operand.vmem [shape: bf16[9,8,8], index: 6, kind: input, shape index: {}]   ;;  %s3244_s7 = inlined_call_operand.vmem [shape: f32[2,8,8,8], index: 7, kind: output, shape index: {}]  }
   0x1 LB: > { %s2332_s25 = sadd.s32 4294967295, %s2748_s24   ;;  %p2336_p0 = scmp.ge.s32.totalorder %s2748_s24, 1  ;;  %s2748_s24 = sphi %s2791_s24, %s17_s24  }
   0x2   : > { %p237_p1 = scmp.lt.s32.totalorder %s2748_s24, 3 }
   0x4   : > { %p238_p2 = pnand %p2336_p0, %p237_p1 }
   0x6   : > { %241 = sbr.rel (%p238_p2) target bundleno = 605 (0x25d), region = 48 }
   0xb   : > { %v2343_v0 = vld [vmem:[%s3240_s3 + $0x4] sm:$0xf]  ;;  %vm412_vm0 = vcmask 1043456   ;;  %v385_v1 = vld [vmem:[%s3240_s3] sm:$0xf]  ;;  %p269_p3 = scmp.lt.s32.totalorder %s2332_s25, 1 }
   0xc   : > { %2707 = vmatprep.subr.msk.bf16.mxu0 %vm412_vm0, %v2343_v0  ;;  %v414_v2 = vsel %vm412_vm0, %v2343_v0, 0  ;;  %2708 = vmatprep.subr.msk.bf16.mxu1 %vm412_vm0, %v385_v1  ;;  %v494_v3 = vsel %vm412_vm0, %v385_v1, 0  ;;  %vm342_vm1 = vcmask 64512   ;;  %vm344_vm2 = vcmask 58368   ;;  %v2814_v4 = vld [vmem:[%s3240_s3 + $0x8] sm:$0xf] }
   0xd   : > { %2528 = vmatpush3.bf16.msra.mxu0 %v414_v2  ;;  %2538 = vmatpush3.bf16.msra.mxu1 %v494_v3  ;;  %s3262_s25 = smov (!%p269_p3, %s2332_s25), 1  ;;  %v2750_v5 = vmov 0.0   ;;  %v2861_v6 = vld [vmem:[%s3240_s3 + $0xc] sm:$0xf]  ;;  %v2341_v7 = vld [vmem:[%s3238_s1] ss:$0 sm:$0xff] }
   0xe   : > { %343 = vst.msk [vmem:[#allocation2] sm:$0xff] %vm342_vm1, %v2750_v5  ;;  %346 = vst.msk [vmem:[#allocation2 + $0x10] sm:$0xff] %vm342_vm1, %v2750_v5  ;;  %2709 = vmatprep.subr.msk.bf16.mxu0 %vm412_vm0, %v2814_v4  ;;  %s2435_s11 = sshll.u32 %s3262_s25, 6  ;;  %2710 = vmatprep.subr.msk.bf16.mxu1 %vm412_vm0, %v2861_v6  ;;  %v2342_v8 = vld [vmem:[%s3239_s2] ss:$0 sm:$0xff]  ;;  %v588_v60 = vsel %vm412_vm0, %v2814_v4, 0 }
   0xf   : > { %345 = vst.msk [vmem:[#allocation2 + $0x8] sm:$0x3] %vm344_vm2, %v2750_v5  ;;  %347 = vst.msk [vmem:[#allocation2 + $0x18] sm:$0x3] %vm344_vm2, %v2750_v5  ;;  %s2874_s16 = scalar_lea.vmem %s3237_s0, %s2435_s11  ;;  %v690_v4 = vsel %vm412_vm0, %v2861_v6, 0  ;;  %s3206_s14 = scalar_lea.vmem %s3244_s7, %s2435_s11 }
  0x10   : > { %348 = vst.msk [vmem:[#allocation2 + $0x20] sm:$0xff] %vm342_vm1, %v2750_v5  ;;  %350 = vst.msk [vmem:[#allocation2 + $0x30] sm:$0xff] %vm342_vm1, %v2750_v5  ;;  %v280_v9 = vld [vmem:[%s2874_s16] sm:$0xff]  ;;  %v281_v10 = vld [vmem:[%s2874_s16 + $0x8] sm:$0xff] }
  0x11   : > { %349 = vst.msk [vmem:[#allocation2 + $0x28] sm:$0x3] %vm344_vm2, %v2750_v5  ;;  %351 = vst.msk [vmem:[#allocation2 + $0x38] sm:$0x3] %vm344_vm2, %v2750_v5  ;;  %v282_v11 = vld [vmem:[%s2874_s16 + $0x10] sm:$0xff]  ;;  %v295_v12 = vmul.f32 %v2341_v7, %v280_v9  ;;  %v296_v13 = vmul.f32 %v2341_v7, %v281_v10  ;;  %v283_v15 = vld [vmem:[%s2874_s16 + $0x18] sm:$0xff] }
  0x12   : > { %352 = vst.msk [vmem:[#allocation2 + $0x40] sm:$0xff] %vm342_vm1, %v2750_v5  ;;  %354 = vst.msk [vmem:[#allocation2 + $0x50] sm:$0xff] %vm342_vm1, %v2750_v5  ;;  %v297_v14 = vmul.f32 %v2341_v7, %v282_v11  ;;  %v284_v16 = vld [vmem:[%s2874_s16 + $0x20] sm:$0xff]  ;;  %v285_v17 = vld [vmem:[%s2874_s16 + $0x28] sm:$0xff]  ;;  %v298_v18 = vmul.f32 %v2341_v7, %v283_v15 }
  0x13   : > { %353 = vst.msk [vmem:[#allocation2 + $0x48] sm:$0x3] %vm344_vm2, %v2750_v5  ;;  %355 = vst.msk [vmem:[#allocation2 + $0x58] sm:$0x3] %vm344_vm2, %v2750_v5  ;;  %v299_v19 = vmul.f32 %v2341_v7, %v284_v16  ;;  %v286_v20 = vld [vmem:[%s2874_s16 + $0x30] sm:$0xff]  ;;  %v300_v21 = vmul.f32 %v2341_v7, %v285_v17  ;;  %v287_v22 = vld [vmem:[%s2874_s16 + $0x38] sm:$0xff]  ;;  %v310_v23 = vadd.f32 %v2342_v8, %v295_v12 }
  0x14   : > { %356 = vst.msk [vmem:[#allocation2 + $0x60] sm:$0xff] %vm342_vm1, %v2750_v5  ;;  %358 = vst.msk [vmem:[#allocation2 + $0x70] sm:$0xff] %vm342_vm1, %v2750_v5  ;;  %v311_v24 = vadd.f32 %v2342_v8, %v296_v13  ;;  %v312_v25 = vadd.f32 %v2342_v8, %v297_v14  ;;  %v301_v26 = vmul.f32 %v2341_v7, %v286_v20 }
  0x15   : > { %357 = vst.msk [vmem:[#allocation2 + $0x68] sm:$0x3] %vm344_vm2, %v2750_v5  ;;  %359 = vst.msk [vmem:[#allocation2 + $0x78] sm:$0x3] %vm344_vm2, %v2750_v5  ;;  %v313_v27 = vadd.f32 %v2342_v8, %v298_v18  ;;  %v314_v28 = vadd.f32 %v2342_v8, %v299_v19  ;;  %v315_v29 = vadd.f32 %v2342_v8, %v300_v21  ;;  %vm318_vm3 = vcmp.ge.f32.partialorder %v310_v23, 0.0  ;;  %v373_v49 = vld [vmem:[#allocation2] sm:$0xff] }
  0x16   : > { %360 = vst.msk [vmem:[#allocation2 + $0x80] sm:$0xff] %vm342_vm1, %v2750_v5  ;;  %362 = vst.msk [vmem:[#allocation2 + $0x90] sm:$0xff] %vm342_vm1, %v2750_v5  ;;  %v302_v30 = vmul.f32 %v2341_v7, %v287_v22  ;;  %v326_v31 = vmul.f32 0.1, %v310_v23  ;;  %vm319_vm4 = vcmp.ge.f32.partialorder %v311_v24, 0.0  ;;  %vm320_vm5 = vcmp.ge.f32.partialorder %v312_v25, 0.0 }
  0x17   : > { %361 = vst.msk [vmem:[#allocation2 + $0x88] sm:$0x3] %vm344_vm2, %v2750_v5  ;;  %363 = vst.msk [vmem:[#allocation2 + $0x98] sm:$0x3] %vm344_vm2, %v2750_v5  ;;  %v327_v32 = vmul.f32 0.1, %v311_v24  ;;  %v316_v37 = vadd.f32 %v2342_v8, %v301_v26 }
  0x18   : > { %1330 = vst.msk [vmem:[#allocation3] sm:$0xff] %vm342_vm1, %v2750_v5  ;;  %1332 = vst.msk [vmem:[#allocation3 + $0x10] sm:$0xff] %vm342_vm1, %v2750_v5  ;;  %v328_v33 = vmul.f32 0.1, %v312_v25  ;;  %vm321_vm6 = vcmp.ge.f32.partialorder %v313_v27, 0.0  ;;  %vm322_vm7 = vcmp.ge.f32.partialorder %v314_v28, 0.0  ;;  %v334_v34 = vsel %vm318_vm3, %v310_v23, %v326_v31 }
  0x19   : > { %1331 = vst.msk [vmem:[#allocation3 + $0x8] sm:$0x3] %vm344_vm2, %v2750_v5  ;;  %1333 = vst.msk [vmem:[#allocation3 + $0x18] sm:$0x3] %vm344_vm2, %v2750_v5  ;;  %v329_v35 = vmul.f32 0.1, %v313_v27  ;;  %v335_v38 = vsel %vm319_vm4, %v311_v24, %v327_v32  ;;  %v317_v45 = vadd.f32 %v2342_v8, %v302_v30 }
  0x1a   : > { %1334 = vst.msk [vmem:[#allocation3 + $0x20] sm:$0xff] %vm342_vm1, %v2750_v5  ;;  %1336 = vst.msk [vmem:[#allocation3 + $0x30] sm:$0xff] %vm342_vm1, %v2750_v5  ;;  %v330_v36 = vmul.f32 0.1, %v314_v28  ;;  %v336_v39 = vsel %vm320_vm5, %v312_v25, %v328_v33  ;;  %vm323_vm8 = vcmp.ge.f32.partialorder %v315_v29, 0.0  ;;  %vm324_vm9 = vcmp.ge.f32.partialorder %v316_v37, 0.0 }
  0x1b   : > { %1335 = vst.msk [vmem:[#allocation3 + $0x28] sm:$0x3] %vm344_vm2, %v2750_v5  ;;  %1337 = vst.msk [vmem:[#allocation3 + $0x38] sm:$0x3] %vm344_vm2, %v2750_v5  ;;  %v331_v40 = vmul.f32 0.1, %v315_v29  ;;  %v337_v41 = vsel %vm321_vm6, %v313_v27, %v329_v35 }
  0x1c   : > { %1338 = vst.msk [vmem:[#allocation3 + $0x40] sm:$0xff] %vm342_vm1, %v2750_v5  ;;  %1340 = vst.msk [vmem:[#allocation3 + $0x50] sm:$0xff] %vm342_vm1, %v2750_v5  ;;  %v338_v42 = vsel %vm322_vm7, %v314_v28, %v330_v36  ;;  %v332_v43 = vmul.f32 0.1, %v316_v37  ;;  %vm325_vm10 = vcmp.ge.f32.partialorder %v317_v45, 0.0  ;;  %v386_v48 = vld [vmem:[#allocation2 + $0x1] sm:$0xff] }
  0x1d   : > { %1339 = vst.msk [vmem:[#allocation3 + $0x48] sm:$0x3] %vm344_vm2, %v2750_v5  ;;  %1341 = vst.msk [vmem:[#allocation3 + $0x58] sm:$0x3] %vm344_vm2, %v2750_v5  ;;  %v339_v44 = vsel %vm323_vm8, %v315_v29, %v331_v40  ;;  %v333_v47 = vmul.f32 0.1, %v317_v45 }
  0x1e   : > { %1342 = vst.msk [vmem:[#allocation3 + $0x60] sm:$0xff] %vm342_vm1, %v2750_v5  ;;  %1344 = vst.msk [vmem:[#allocation3 + $0x70] sm:$0xff] %vm342_vm1, %v2750_v5  ;;  %v340_v46 = vsel %vm324_vm9, %v316_v37, %v332_v43  ;;  %v2367_v7 = vld [vmem:[%s3240_s3 + $0x14] sm:$0xf]  ;;  %v561_v10 = vld [vmem:[#allocation2 + $0x2] sm:$0xff] }
  0x1f   : > { %1343 = vst.msk [vmem:[#allocation3 + $0x68] sm:$0x3] %vm344_vm2, %v2750_v5  ;;  %1345 = vst.msk [vmem:[#allocation3 + $0x78] sm:$0x3] %vm344_vm2, %v2750_v5  ;;  %v341_v50 = vsel %vm325_vm10, %v317_v45, %v333_v47  ;;  %v894_v26 = vsel %vm412_vm0, %v2367_v7, 0 }
  0x20   : > { %1346 = vst.msk [vmem:[#allocation3 + $0x80] sm:$0xff] %vm342_vm1, %v2750_v5  ;;  %1348 = vst.msk [vmem:[#allocation3 + $0x90] sm:$0xff] %vm342_vm1, %v2750_v5  ;;  %v2372_v27 = vld [vmem:[%s3240_s3 + $0x18] sm:$0xf]  ;;  %v2377_v30 = vld [vmem:[%s3240_s3 + $0x1c] sm:$0xf] }
  0x21   : > { %1347 = vst.msk [vmem:[#allocation3 + $0x88] sm:$0x3] %vm344_vm2, %v2750_v5  ;;  %1349 = vst.msk [vmem:[#allocation3 + $0x98] sm:$0x3] %vm344_vm2, %v2750_v5  ;;  %v2362_v5 = vld [vmem:[%s3240_s3 + $0x10] sm:$0xf] }
  0x22   : > { %365 = vst.msk [vmem:[#allocation2 + $0x11] sm:$0xff] %vm342_vm1, %v334_v34  ;;  %366 = vst.msk [vmem:[#allocation2 + $0x21] sm:$0xff] %vm342_vm1, %v335_v38  ;;  %v792_v23 = vsel %vm412_vm0, %v2362_v5, 0  ;;  %v997_v38 = vsel %vm412_vm0, %v2372_v27, 0 }
  0x23   : > { %367 = vst.msk [vmem:[#allocation2 + $0x31] sm:$0xff] %vm342_vm1, %v336_v39  ;;  %368 = vst.msk [vmem:[#allocation2 + $0x41] sm:$0xff] %vm342_vm1, %v337_v41  ;;  %v1099_v41 = vsel %vm412_vm0, %v2377_v30, 0 }
  0x24   : > { %369 = vst.msk [vmem:[#allocation2 + $0x51] sm:$0xff] %vm342_vm1, %v338_v42  ;;  %370 = vst.msk [vmem:[#allocation2 + $0x61] sm:$0xff] %vm342_vm1, %v339_v44  ;;  %v2382_v42 = vld [vmem:[%s3240_s3 + $0x20] sm:$0xf] }
  0x25   : > { %371 = vst.msk [vmem:[#allocation2 + $0x71] sm:$0xff] %vm342_vm1, %v340_v46  ;;  %372 = vst.msk [vmem:[#allocation2 + $0x81] sm:$0xff] %vm342_vm1, %v341_v50  ;;  %v1201_v47 = vsel %vm412_vm0, %v2382_v42, 0 }
  0x29   : > { %v2894_v51 = vld [vmem:[#allocation2 + $0x11] sm:$0xff]  ;;  %v2898_v55 = vld [vmem:[#allocation2 + $0x21] sm:$0xff] }
  0x2a   : > { %v374_v52 = vld [vmem:[#allocation2 + $0x10] sm:$0xff]  ;;  %v394_v53 = vpack.c.bf16 %v2894_v51, %v386_v48  ;;  %v375_v57 = vld [vmem:[#allocation2 + $0x20] sm:$0xff]  ;;  %v773_v34 = vpack.c.bf16 %v2898_v55, %v2894_v51 }
  0x2b   : > { %v381_v54 = vpack.c.bf16 %v374_v52, %v373_v49  ;;  %v2900_v56 = vld [vmem:[#allocation2 + $0x31] sm:$0xff]  ;;  %v2908_v61 = vld [vmem:[#allocation2 + $0x41] sm:$0xff]  ;;  %v671_v16 = vpack.c.bf16 %v375_v57, %v374_v52 }
  0x2c   : > { %v2904_v58 = vpack.c.bf16 %v2900_v56, %v2898_v55  ;;  %v376_v59 = vld [vmem:[#allocation2 + $0x30] sm:$0xff]  ;;  %2529 = vmatprep.mubr.msk.bf16.mxu0 %vm342_vm1, %v394_v53  ;;  %v377_v1 = vld [vmem:[#allocation2 + $0x40] sm:$0xff]  ;;  %v774_v36 = vpack.c.bf16 %v2908_v61, %v2900_v56 }
  0x2d   : > { %v2910_v62 = vld [vmem:[#allocation2 + $0x51] sm:$0xff]  ;;  %2539 = vmatprep.mubr.msk.bf16.mxu1 %vm342_vm1, %v381_v54  ;;  %v2914_v63 = vpack.c.bf16 %v376_v59, %v375_v57  ;;  %v392_v8 = vld [vmem:[#allocation2 + $0x61] sm:$0xff]  ;;  %v672_v22 = vpack.c.bf16 %v377_v1, %v376_v59  ;;  %v3028_v59 = vld [vmem:[%s3243_s6 + $0xc] sm:$0xf] }
  0x2e   : > { %v2918_v0 = vpack.c.bf16 %v2910_v62, %v2908_v61  ;;  %v378_v2 = vld [vmem:[#allocation2 + $0x50] sm:$0xff]  ;;  %2530 = vmatmul.mubr.msk.bf16.vlgmr.msra.gmra.mxu0 %vm342_vm1, %v2904_v58  ;;  %v379_v6 = vld [vmem:[#allocation2 + $0x60] sm:$0xff]  ;;  %v775_v39 = vpack.c.bf16 %v392_v8, %v2910_v62  ;;  %3248 = vst [vmem:[#allocation5_spill] sm:$0xff] %v3028_v59 }
  0x2f   : > { %v2922_v3 = vpack.c.bf16 %v378_v2, %v377_v1  ;;  %2540 = vmatmul.mubr.msk.bf16.vlgmr.msra.gmra.mxu1 %vm342_vm1, %v2914_v63  ;;  %2548 = vmatpush3.bf16.msra.mxu0 %v588_v60  ;;  %v2934_v9 = vld [vmem:[#allocation2 + $0x71] sm:$0xff]  ;;  %v563_v17 = vld [vmem:[#allocation2 + $0x22] sm:$0xff]  ;;  %v673_v25 = vpack.c.bf16 %v379_v6, %v378_v2 }
  0x30   : > { %2533 = vmatprep.mubr.msk.bf16.mxu0 %vm342_vm1, %v2918_v0  ;;  %v380_v11 = vld [vmem:[#allocation2 + $0x70] sm:$0xff]  ;;  %2558 = vmatpush3.bf16.msra.mxu1 %v690_v4  ;;  %v2942_v13 = vpack.c.bf16 %v2934_v9, %v392_v8  ;;  %v565_v19 = vld [vmem:[#allocation2 + $0x42] sm:$0xff] }
  0x31   : > { %2543 = vmatprep.mubr.msk.bf16.mxu1 %vm342_vm1, %v2922_v3  ;;  %v562_v12 = vld [vmem:[#allocation2 + $0x12] sm:$0xff]  ;;  %2711 = vmatprep.subr.msk.bf16.mxu0 %vm412_vm0, %v2362_v5  ;;  %v2945_v14 = vpack.c.bf16 %v380_v11, %v379_v6  ;;  %v567_v28 = vld [vmem:[#allocation2 + $0x62] sm:$0xff] }
  0x32   : > { %2712 = vmatprep.subr.msk.bf16.mxu1 %vm412_vm0, %v2367_v7  ;;  %v569_v15 = vpack.c.bf16 %v562_v12, %v561_v10  ;;  %v564_v18 = vld [vmem:[#allocation2 + $0x32] sm:$0xff]  ;;  %v670_v31 = vld [vmem:[#allocation2 + $0x80] sm:$0xff]  ;;  %v875_v35 = vpack.c.bf16 %v563_v17, %v562_v12 }
  0x33   : > { %v566_v20 = vld [vmem:[#allocation2 + $0x52] sm:$0xff]  ;;  %v570_v21 = vpack.c.bf16 %v564_v18, %v563_v17  ;;  %v674_v33 = vpack.c.bf16 %v670_v31, %v380_v11  ;;  %v876_v37 = vpack.c.bf16 %v565_v19, %v564_v18  ;;  %v772_v43 = vld [vmem:[#allocation2 + $0x81] sm:$0xff] }
  0x34   : > { %v571_v24 = vpack.c.bf16 %v566_v20, %v565_v19  ;;  %v568_v29 = vld [vmem:[#allocation2 + $0x72] sm:$0xff]  ;;  %v877_v40 = vpack.c.bf16 %v567_v28, %v566_v20  ;;  %v874_v44 = vld [vmem:[#allocation2 + $0x82] sm:$0xff]  ;;  %v776_v45 = vpack.c.bf16 %v772_v43, %v2934_v9 }
  0x35   : > { %v572_v32 = vpack.c.bf16 %v568_v29, %v567_v28  ;;  %v878_v46 = vpack.c.bf16 %v874_v44, %v568_v29  ;;  %v977_v48 = vld [vmem:[#allocation2 + $0x90] sm:$0xff]  ;;  %v2389_v54 = vld [vmem:[%s3243_s6 + $0x4] sm:$0xf]  ;;  %v1371_v56 = vld [vmem:[%s3243_s6] sm:$0xf] }
  0x36   : > { %2534 = vmatmul.mubr.msk.bf16.gmra.mxu0 %vm342_vm1, %v2942_v13  ;;  %v1079_v49 = vld [vmem:[#allocation2 + $0x91] sm:$0xff]  ;;  %v981_v50 = vpack.c.bf16 %v977_v48, %v670_v31  ;;  %v1399_v55 = vsel %vm412_vm0, %v2389_v54, 0  ;;  %v1479_v57 = vsel %vm412_vm0, %v1371_v56, 0 }
  0x37   : > { %2544 = vmatmul.mubr.msk.bf16.gmra.mxu1 %vm342_vm1, %v2945_v14  ;;  %2549 = vmatprep.mubr.msk.bf16.mxu0 %vm342_vm1, %v569_v15  ;;  %v1083_v51 = vpack.c.bf16 %v1079_v49, %v772_v43  ;;  %v1181_v52 = vld [vmem:[#allocation2 + $0x92] sm:$0xff] }
  0x38   : > { %2559 = vmatprep.mubr.msk.bf16.mxu1 %vm342_vm1, %v671_v16  ;;  %v1185_v53 = vpack.c.bf16 %v1181_v52, %v874_v44 }
  0x3e   : > { %2550 = vmatmul.mubr.msk.bf16.vlgmr.msra.gmra.mxu0 %vm342_vm1, %v570_v21 }
  0x3f   : > { %2568 = vmatpush3.bf16.msra.mxu0 %v792_v23  ;;  %2560 = vmatmul.mubr.msk.bf16.vlgmr.msra.gmra.mxu1 %vm342_vm1, %v672_v22 }
  0x40   : > { %2553 = vmatprep.mubr.msk.bf16.mxu0 %vm342_vm1, %v571_v24  ;;  %2563 = vmatprep.mubr.msk.bf16.mxu1 %vm342_vm1, %v673_v25 }
  0x41   : > { %2578 = vmatpush3.bf16.msra.mxu1 %v894_v26  ;;  %2713 = vmatprep.subr.msk.bf16.mxu0 %vm412_vm0, %v2372_v27 }
  0x42   : > { %2714 = vmatprep.subr.msk.bf16.mxu1 %vm412_vm0, %v2377_v30 }
  0x46   : > { %2554 = vmatmul.mubr.msk.bf16.gmra.mxu0 %vm342_vm1, %v572_v32 }
  0x47   : > { %2564 = vmatmul.mubr.msk.bf16.gmra.mxu1 %vm342_vm1, %v674_v33  ;;  %2569 = vmatprep.mubr.msk.bf16.mxu0 %vm342_vm1, %v773_v34 }
  0x48   : > { %2579 = vmatprep.mubr.msk.bf16.mxu1 %vm342_vm1, %v875_v35 }
  0x4e   : > { %2570 = vmatmul.mubr.msk.bf16.vlgmr.msra.gmra.mxu0 %vm342_vm1, %v774_v36 }
  0x4f   : > { %2588 = vmatpush3.bf16.msra.mxu0 %v997_v38  ;;  %2580 = vmatmul.mubr.msk.bf16.vlgmr.msra.gmra.mxu1 %vm342_vm1, %v876_v37 }
  0x50   : > { %2573 = vmatprep.mubr.msk.bf16.mxu0 %vm342_vm1, %v775_v39  ;;  %2583 = vmatprep.mubr.msk.bf16.mxu1 %vm342_vm1, %v877_v40 }
  0x51   : > { %2598 = vmatpush3.bf16.msra.mxu1 %v1099_v41  ;;  %2715 = vmatprep.subr.msk.bf16.mxu0 %vm412_vm0, %v2382_v42 }
  0x52   : > { %2716 = vmatprep.subr.msk.bf16.mxu1 %vm412_vm0, %v2389_v54 }
  0x56   : > { %2574 = vmatmul.mubr.msk.bf16.gmra.mxu0 %vm342_vm1, %v776_v45 }
  0x57   : > { %2584 = vmatmul.mubr.msk.bf16.gmra.mxu1 %vm342_vm1, %v878_v46  ;;  %2589 = vmatprep.mubr.msk.bf16.mxu0 %vm342_vm1, %v2914_v63 }
  0x58   : > { %2599 = vmatprep.mubr.msk.bf16.mxu1 %vm342_vm1, %v2904_v58  ;;  %v3021_v58 = vld [vmem:[%s3243_s6 + $0x8] sm:$0xf] }
  0x59   : > { %3247 = vst [vmem:[#allocation4_spill] sm:$0xff] %v3021_v58 }
  0x5e   : > { %2590 = vmatmul.mubr.msk.bf16.vlgmr.msra.gmra.mxu0 %vm342_vm1, %v2922_v3 }
  0x5f   : > { %2608 = vmatpush3.bf16.msra.mxu0 %v1201_v47  ;;  %2600 = vmatmul.mubr.msk.bf16.vlgmr.msra.gmra.mxu1 %vm342_vm1, %v2918_v0 }
  0x60   : > { %2593 = vmatprep.mubr.msk.bf16.mxu0 %vm342_vm1, %v2945_v14  ;;  %2603 = vmatprep.mubr.msk.bf16.mxu1 %vm342_vm1, %v2942_v13 }
  0x61   : > { %2618 = vmatpush3.bf16.msra.mxu1 %v1399_v55  ;;  %2717 = vmatprep.subr.msk.bf16.mxu0 %vm412_vm0, %v1371_v56 }
  0x62   : > { %2718 = vmatprep.subr.msk.bf16.mxu1 %vm412_vm0, %v3021_v58 }
  0x66   : > { %2594 = vmatmul.mubr.msk.bf16.gmra.mxu0 %vm342_vm1, %v981_v50 }
  0x67   : > { %2604 = vmatmul.mubr.msk.bf16.gmra.mxu1 %vm342_vm1, %v1083_v51  ;;  %2609 = vmatprep.mubr.msk.bf16.mxu0 %vm342_vm1, %v570_v21 }
  0x6e   : > { %2610 = vmatmul.mubr.msk.bf16.vlgmr.msra.gmra.mxu0 %vm342_vm1, %v571_v24 }
  0x6f   : > { %2613 = vmatprep.mubr.msk.bf16.mxu0 %vm342_vm1, %v572_v32  ;;  %2628 = vmatpush3.bf16.msra.mxu0 %v1479_v57 }
  0x70   : > { %2719 = vmatprep.subr.msk.bf16.mxu0 %vm412_vm0, %v3028_v59 }
  0x76   : > { %2614 = vmatmul.mubr.msk.bf16.gmra.mxu0 %vm342_vm1, %v1185_v53 }
  0xee   : > { %v2531_v60 = vpop.f32.mrf.mxu0 }
  0xef   : > { %v2541_v61 = vpop.f32.mrf.mxu1 }
  0xf0   : > { %v450_v62 = vpop.f32.mrf.mxu0  ;;  %v539_v41 = vadd.f32 %v2541_v61, %v2531_v60 }
  0xf1   : > { %v530_v63 = vpop.f32.mrf.mxu1 }
  0xf2   : > { %v2532_v0 = vpop.f32.mrf.mxu0  ;;  %v531_v44 = vadd.f32 %v530_v63, %v450_v62 }
  0xf3   : > { %v2542_v1 = vpop.f32.mrf.mxu1 }
  0xf4   : > { %v453_v2 = vpop.f32.mrf.mxu0  ;;  %v542_v48 = vadd.f32 %v2542_v1, %v2532_v0 }
  0xf5   : > { %v533_v3 = vpop.f32.mrf.mxu1 }
  0xf6   : > { %v2535_v4 = vpop.f32.mrf.mxu0  ;;  %v534_v55 = vadd.f32 %v533_v3, %v453_v2 }
  0xf7   : > { %v2545_v5 = vpop.f32.mrf.mxu1 }
  0xf8   : > { %v466_v7 = vpop.f32.mrf.mxu0  ;;  %v555_v60 = vadd.f32 %v2545_v5, %v2535_v4 }
  0xf9   : > { %v546_v8 = vpop.f32.mrf.mxu1 }
  0xfa   : > { %v2536_v9 = vpop.f32.mrf.mxu0  ;;  %v547_v61 = vadd.f32 %v546_v8, %v466_v7 }
  0xfb   : > { %v2546_v10 = vpop.f32.mrf.mxu1 }
  0xfc   : > { %v469_v6 = vpop.f32.mrf.mxu0 }
  0xfd   : > { %v549_v11 = vpop.f32.mrf.mxu1 }
  0xfe   : > { %v2551_v12 = vpop.f32.mrf.mxu0 }
  0xff   : > { %v2561_v13 = vpop.f32.mrf.mxu1  ;;  %v657_v45 = vadd.f32 %v2551_v12, %v539_v41  ;;  %v558_v41 = vadd.f32 %v2546_v10, %v2536_v9 }
 0x100   : > { %v624_v14 = vpop.f32.mrf.mxu0 }
 0x101   : > { %v726_v15 = vpop.f32.mrf.mxu1  ;;  %v655_v49 = vadd.f32 %v624_v14, %v531_v44  ;;  %v759_v52 = vadd.f32 %v2561_v13, %v657_v45  ;;  %v550_v13 = vadd.f32 %v549_v11, %v469_v6 }
 0x102   : > { %v2552_v16 = vpop.f32.mrf.mxu0 }
 0x103   : > { %v2562_v17 = vpop.f32.mrf.mxu1  ;;  %v658_v53 = vadd.f32 %v2552_v16, %v542_v48  ;;  %v757_v57 = vadd.f32 %v726_v15, %v655_v49 }
 0x104   : > { %v627_v18 = vpop.f32.mrf.mxu0 }
 0x105   : > { %v729_v19 = vpop.f32.mrf.mxu1  ;;  %v656_v58 = vadd.f32 %v627_v18, %v534_v55  ;;  %v760_v63 = vadd.f32 %v2562_v17, %v658_v53 }
 0x106   : > { %v2555_v20 = vpop.f32.mrf.mxu0 }
 0x107   : > { %v2565_v21 = vpop.f32.mrf.mxu1  ;;  %v758_v16 = vadd.f32 %v729_v19, %v656_v58 }
 0x108   : > { %v640_v22 = vpop.f32.mrf.mxu0 }
 0x109   : > { %v742_v23 = vpop.f32.mrf.mxu1  ;;  %v659_v0 = vadd.f32 %v640_v22, %v547_v61 }
 0x10a   : > { %v2556_v24 = vpop.f32.mrf.mxu0 }
 0x10b   : > { %v2566_v25 = vpop.f32.mrf.mxu1  ;;  %v662_v45 = vadd.f32 %v2556_v24, %v558_v41  ;;  %v761_v5 = vadd.f32 %v742_v23, %v659_v0 }
 0x10c   : > { %v643_v26 = vpop.f32.mrf.mxu0 }
 0x10d   : > { %v3032_v27 = vpop.f32.mrf.mxu1  ;;  %v660_v7 = vadd.f32 %v643_v26, %v550_v13  ;;  %v764_v9 = vadd.f32 %v2566_v25, %v662_v45 }
 0x10e   : > { %v2571_v28 = vpop.f32.mrf.mxu0 }
 0x10f   : > { %v2581_v29 = vpop.f32.mrf.mxu1  ;;  %v861_v59 = vadd.f32 %v2571_v28, %v759_v52  ;;  %v762_v58 = vadd.f32 %v3032_v27, %v660_v7  ;;  %v3050_v27 = vld [vmem:[%s3242_s5] ss:$0 sm:$0xff] }
 0x110   : > { %v828_v30 = vpop.f32.mrf.mxu0 }
 0x111   : > { %v930_v31 = vpop.f32.mrf.mxu1  ;;  %v859_v12 = vadd.f32 %v828_v30, %v757_v57  ;;  %v963_v14 = vadd.f32 %v2581_v29, %v861_v59 }
 0x112   : > { %v2572_v32 = vpop.f32.mrf.mxu0 }
 0x113   : > { %v2582_v33 = vpop.f32.mrf.mxu1  ;;  %v862_v44 = vadd.f32 %v2572_v32, %v760_v63  ;;  %v961_v15 = vadd.f32 %v930_v31, %v859_v12 }
 0x114   : > { %v831_v34 = vpop.f32.mrf.mxu0 }
 0x115   : > { %v933_v35 = vpop.f32.mrf.mxu1  ;;  %v860_v8 = vadd.f32 %v831_v34, %v758_v16  ;;  %v964_v17 = vadd.f32 %v2582_v33, %v862_v44 }
 0x116   : > { %v2575_v36 = vpop.f32.mrf.mxu0 }
 0x117   : > { %v3034_v37 = vpop.f32.mrf.mxu1  ;;  %v962_v11 = vadd.f32 %v933_v35, %v860_v8 }
 0x118   : > { %v844_v38 = vpop.f32.mrf.mxu0 }
 0x119   : > { %v946_v39 = vpop.f32.mrf.mxu1 }
 0x11a   : > { %v2576_v40 = vpop.f32.mrf.mxu0 }
 0x11b   : > { %v3036_v42 = vpop.f32.mrf.mxu1  ;;  %v866_v19 = vadd.f32 %v2576_v40, %v764_v9 }
 0x11c   : > { %3249 = vst [vmem:[#allocation6_spill] sm:$0xff] %v3036_v42  ;;  %v847_v43 = vpop.f32.mrf.mxu0 }
 0x11d   : > { %v3038_v46 = vpop.f32.mrf.mxu1  ;;  %v864_v32 = vadd.f32 %v847_v43, %v762_v58 }
 0x11e   : > { %3250 = vst [vmem:[#allocation7_spill] sm:$0xff] %v3038_v46  ;;  %v2591_v47 = vpop.f32.mrf.mxu0  ;;  %v661_v46 = vadd.f32 %v2555_v20, %v555_v60  ;;  %v863_v20 = vadd.f32 %v844_v38, %v761_v5 }
 0x11f   : > { %v2601_v50 = vpop.f32.mrf.mxu1  ;;  %v1066_v28 = vadd.f32 %v2591_v47, %v963_v14 }
 0x120   : > { %v1033_v51 = vpop.f32.mrf.mxu0  ;;  %v763_v4 = vadd.f32 %v2565_v21, %v661_v46  ;;  %v3044_v21 = vld [vmem:[%s3241_s4] ss:$0 sm:$0xff]  ;;  %v965_v31 = vadd.f32 %v946_v39, %v863_v20 }
 0x121   : > { %v1135_v54 = vpop.f32.mrf.mxu1  ;;  %v1064_v30 = vadd.f32 %v1033_v51, %v961_v15  ;;  %v1168_v29 = vadd.f32 %v2601_v50, %v1066_v28 }
 0x122   : > { %v2592_v56 = vpop.f32.mrf.mxu0  ;;  %v865_v10 = vadd.f32 %v2575_v36, %v763_v4 }
 0x123   : > { %v2602_v62 = vpop.f32.mrf.mxu1  ;;  %v1067_v6 = vadd.f32 %v2592_v56, %v964_v17  ;;  %v1166_v23 = vadd.f32 %v1135_v54, %v1064_v30  ;;  %v3251_v46 = vld [vmem:[#allocation6_spill] sm:$0xff] }
 0x124   : > { %v1036_v42 = vpop.f32.mrf.mxu0  ;;  %v967_v25 = vadd.f32 %v3034_v37, %v865_v10  ;;  %v968_v47 = vadd.f32 %v3251_v46, %v866_v19 }
 0x125   : > { %v1138_v2 = vpop.f32.mrf.mxu1  ;;  %v1065_v33 = vadd.f32 %v1036_v42, %v962_v11  ;;  %v1169_v36 = vadd.f32 %v2602_v62, %v1067_v6  ;;  %v3252_v43 = vld [vmem:[#allocation7_spill] sm:$0xff] }
 0x126   : > { %v2595_v1 = vpop.f32.mrf.mxu0  ;;  %v966_v51 = vadd.f32 %v3252_v43, %v864_v32  ;;  %v3254_v43 = vld [vmem:[#allocation5_spill] sm:$0xff] }
 0x127   : > { %v2605_v22 = vpop.f32.mrf.mxu1  ;;  %v1070_v48 = vadd.f32 %v2595_v1, %v967_v25  ;;  %v1167_v52 = vadd.f32 %v1138_v2, %v1065_v33 }
 0x128   : > { %v1049_v3 = vpop.f32.mrf.mxu0 }
 0x129   : > { %v1151_v34 = vpop.f32.mrf.mxu1  ;;  %v1068_v49 = vadd.f32 %v1049_v3, %v965_v31  ;;  %v1172_v61 = vadd.f32 %v2605_v22, %v1070_v48 }
 0x12a   : > { %v2596_v18 = vpop.f32.mrf.mxu0 }
 0x12b   : > { %v1071_v53 = vadd.f32 %v2596_v18, %v968_v47  ;;  %v2606_v54 = vpop.f32.mrf.mxu1  ;;  %v1170_v62 = vadd.f32 %v1151_v34, %v1068_v49 }
 0x12c   : > { %v1052_v59 = vpop.f32.mrf.mxu0 }
 0x12d   : > { %v1069_v63 = vadd.f32 %v1052_v59, %v966_v51  ;;  %v1173_v44 = vadd.f32 %v2606_v54, %v1071_v53  ;;  %v1154_v13 = vpop.f32.mrf.mxu1  ;;  %v1675_v51 = vsel %vm412_vm0, %v3254_v43, 0  ;;  %v2408_v53 = vld [vmem:[%s3243_s6 + $0x10] sm:$0xf]  ;;  %v2413_v54 = vld [vmem:[%s3243_s6 + $0x14] sm:$0xf] }
 0x12e   : > { %v2611_v24 = vpop.f32.mrf.mxu0 }
 0x12f   : > { %v1270_v26 = vadd.f32 %v2611_v24, %v1168_v29  ;;  %v1171_v8 = vadd.f32 %v1154_v13, %v1069_v63  ;;  %v1546_v63 = vld [vmem:[#allocation3 + $0x2] sm:$0xff] }
 0x130   : > { %v1237_v35 = vpop.f32.mrf.mxu0 }
 0x131   : > { %v1285_v38 = vmul.f32 %v3044_v21, %v1270_v26  ;;  %v1268_v40 = vadd.f32 %v1237_v35, %v1166_v23  ;;  %v1372_v23 = vld [vmem:[#allocation3 + $0x1] sm:$0xff] }
 0x132   : > { %v2612_v50 = vpop.f32.mrf.mxu0  ;;  %v1359_v26 = vld [vmem:[#allocation3] sm:$0xff] }
 0x133   : > { %v1300_v37 = vadd.f32 %v3050_v27, %v1285_v38  ;;  %v1283_v39 = vmul.f32 %v3044_v21, %v1268_v40  ;;  %v1271_v42 = vadd.f32 %v2612_v50, %v1169_v36 }
 0x134   : > { %v1240_v55 = vpop.f32.mrf.mxu0 }
 0x135   : > { %vm1308_vm11 = vcmp.ge.f32.partialorder %v1300_v37, 0.0  ;;  %v1316_v56 = vmul.f32 0.1, %v1300_v37  ;;  %v1298_v57 = vadd.f32 %v3050_v27, %v1283_v39  ;;  %v1286_v60 = vmul.f32 %v3044_v21, %v1271_v42  ;;  %v3253_v39 = vld [vmem:[#allocation4_spill] sm:$0xff] }
 0x136   : > { %v1269_v12 = vadd.f32 %v1240_v55, %v1167_v52  ;;  %v2615_v41 = vpop.f32.mrf.mxu0  ;;  %v1573_v42 = vsel %vm412_vm0, %v3253_v39, 0 }
 0x137   : > { %v1324_v0 = vsel %vm1308_vm11, %v1300_v37, %v1316_v56  ;;  %vm1306_vm12 = vcmp.ge.f32.partialorder %v1298_v57, 0.0  ;;  %v1314_v1 = vmul.f32 0.1, %v1298_v57  ;;  %v1301_v14 = vadd.f32 %v3050_v27, %v1286_v60 }
 0x138   : > { %1353 = vst.msk [vmem:[#allocation3 + $0x31] sm:$0xff] %vm342_vm1, %v1324_v0  ;;  %v1284_v16 = vmul.f32 %v3044_v21, %v1269_v12  ;;  %v1274_v45 = vadd.f32 %v2615_v41, %v1172_v61  ;;  %v1253_v2 = vpop.f32.mrf.mxu0 }
 0x139   : > { %v1322_v3 = vsel %vm1306_vm12, %v1298_v57, %v1314_v1  ;;  %vm1309_vm13 = vcmp.ge.f32.partialorder %v1301_v14, 0.0  ;;  %v1317_v15 = vmul.f32 0.1, %v1301_v14  ;;  %v1272_v28 = vadd.f32 %v1253_v2, %v1170_v62 }
 0x13a   : > { %1351 = vst.msk [vmem:[#allocation3 + $0x11] sm:$0xff] %vm342_vm1, %v1322_v3  ;;  %v1299_v4 = vadd.f32 %v3050_v27, %v1284_v16  ;;  %v1289_v5 = vmul.f32 %v3044_v21, %v1274_v45  ;;  %v2616_v7 = vpop.f32.mrf.mxu0 }
 0x13b   : > { %v1325_v18 = vsel %vm1309_vm13, %v1301_v14, %v1317_v15  ;;  %v1287_v17 = vmul.f32 %v3044_v21, %v1272_v28  ;;  %v1275_v30 = vadd.f32 %v2616_v7, %v1173_v44 }
 0x13c   : > { %1354 = vst.msk [vmem:[#allocation3 + $0x41] sm:$0xff] %vm342_vm1, %v1325_v18  ;;  %vm1307_vm14 = vcmp.ge.f32.partialorder %v1299_v4, 0.0  ;;  %v1315_v9 = vmul.f32 0.1, %v1299_v4  ;;  %v1304_v10 = vadd.f32 %v3050_v27, %v1289_v5  ;;  %v1256_v20 = vpop.f32.mrf.mxu0 }
 0x13d   : > { %v1302_v22 = vadd.f32 %v3050_v27, %v1287_v17  ;;  %v1290_v59 = vmul.f32 %v3044_v21, %v1275_v30  ;;  %v1273_v29 = vadd.f32 %v1256_v20, %v1171_v8  ;;  %v1879_v8 = vsel %vm412_vm0, %v2413_v54, 0  ;;  %v2418_v17 = vld [vmem:[%s3243_s6 + $0x18] sm:$0xf]  ;;  %v2423_v30 = vld [vmem:[%s3243_s6 + $0x1c] sm:$0xf] }
 0x13e   : > { %v1323_v6 = vsel %vm1307_vm14, %v1299_v4, %v1315_v9  ;;  %vm1312_vm15 = vcmp.ge.f32.partialorder %v1304_v10, 0.0  ;;  %v1320_v58 = vmul.f32 0.1, %v1304_v10  ;;  %v1777_v4 = vsel %vm412_vm0, %v2408_v53, 0 }
 0x13f   : > { %1352 = vst.msk [vmem:[#allocation3 + $0x21] sm:$0xff] %vm342_vm1, %v1323_v6  ;;  %vm1310_vm2 = vcmp.ge.f32.partialorder %v1302_v22, 0.0  ;;  %v1318_v11 = vmul.f32 0.1, %v1302_v22  ;;  %v1305_v19 = vadd.f32 %v3050_v27, %v1290_v59  ;;  %v1288_v24 = vmul.f32 %v3044_v21, %v1273_v29  ;;  %v3082_v47 = vld [vmem:[#allocation3 + $0x31] sm:$0xff] }
 0x140   : > { %v1328_v25 = vsel %vm1312_vm15, %v1304_v10, %v1320_v58  ;;  %v1362_v49 = vld [vmem:[#allocation3 + $0x30] sm:$0xff] }
 0x141   : > { %1357 = vst.msk [vmem:[#allocation3 + $0x71] sm:$0xff] %vm342_vm1, %v1328_v25  ;;  %v1326_v31 = vsel %vm1310_vm2, %v1302_v22, %v1318_v11  ;;  %vm1313_vm3 = vcmp.ge.f32.partialorder %v1305_v19, 0.0  ;;  %v1321_v32 = vmul.f32 0.1, %v1305_v19  ;;  %v1303_v33 = vadd.f32 %v3050_v27, %v1288_v24  ;;  %v3075_v34 = vld [vmem:[#allocation3 + $0x11] sm:$0xff] }
 0x142   : > { %v1360_v35 = vld [vmem:[#allocation3 + $0x10] sm:$0xff]  ;;  %1355 = vst.msk [vmem:[#allocation3 + $0x51] sm:$0xff] %vm342_vm1, %v1326_v31  ;;  %v1380_v36 = vpack.c.bf16 %v3075_v34, %v1372_v23  ;;  %v2084_v23 = vsel %vm412_vm0, %v2423_v30, 0  ;;  %v2428_v25 = vld [vmem:[%s3243_s6 + $0x20] sm:$0xf] }
 0x143   : > { %v1367_v38 = vpack.c.bf16 %v1360_v35, %v1359_v26  ;;  %v1329_v40 = vsel %vm1313_vm3, %v1305_v19, %v1321_v32  ;;  %vm1311_vm4 = vcmp.ge.f32.partialorder %v1303_v33, 0.0  ;;  %v1319_v21 = vmul.f32 0.1, %v1303_v33  ;;  %v3097_v52 = vld [vmem:[#allocation3 + $0x41] sm:$0xff]  ;;  %v1547_v12 = vld [vmem:[#allocation3 + $0x12] sm:$0xff] }
 0x144   : > { %1358 = vst.msk [vmem:[#allocation3 + $0x81] sm:$0xff] %vm342_vm1, %v1329_v40  ;;  %2619 = vmatprep.mubr.msk.bf16.mxu1 %vm342_vm1, %v1380_v36  ;;  %v1363_v56 = vld [vmem:[#allocation3 + $0x40] sm:$0xff]  ;;  %v1554_v13 = vpack.c.bf16 %v1547_v12, %v1546_v63  ;;  %v1549_v3 = vld [vmem:[#allocation3 + $0x32] sm:$0xff]  ;;  %v1759_v58 = vpack.c.bf16 %v3097_v52, %v3082_v47  ;;  %v1982_v19 = vsel %vm412_vm0, %v2418_v17, 0 }
 0x145   : > { %2629 = vmatprep.mubr.msk.bf16.mxu0 %vm342_vm1, %v1367_v38  ;;  %v1327_v46 = vsel %vm1311_vm4, %v1303_v33, %v1319_v21  ;;  %v1657_v28 = vpack.c.bf16 %v1363_v56, %v1362_v49  ;;  %v1550_v5 = vld [vmem:[#allocation3 + $0x42] sm:$0xff]  ;;  %v1962_v36 = vld [vmem:[#allocation3 + $0x90] sm:$0xff] }
 0x146   : > { %1356 = vst.msk [vmem:[#allocation3 + $0x61] sm:$0xff] %vm342_vm1, %v1327_v46  ;;  %v3085_v27 = vld [vmem:[#allocation3 + $0x21] sm:$0xff]  ;;  %v1861_v11 = vpack.c.bf16 %v1550_v5, %v1549_v3  ;;  %v2064_v38 = vld [vmem:[#allocation3 + $0x91] sm:$0xff] }
 0x147   : > { %v1361_v48 = vld [vmem:[#allocation3 + $0x20] sm:$0xff]  ;;  %v3089_v50 = vpack.c.bf16 %v3082_v47, %v3085_v27  ;;  %v1758_v29 = vpack.c.bf16 %v3085_v27, %v3075_v34  ;;  %v2166_v46 = vld [vmem:[#allocation3 + $0x92] sm:$0xff] }
 0x148   : > { %v3091_v37 = vpack.c.bf16 %v1362_v49, %v1361_v48  ;;  %v3123_v62 = vld [vmem:[#allocation3 + $0x71] sm:$0xff]  ;;  %v1656_v16 = vpack.c.bf16 %v1361_v48, %v1360_v35  ;;  %v1548_v45 = vld [vmem:[#allocation3 + $0x22] sm:$0xff]  ;;  %v2186_v35 = vsel %vm412_vm0, %v2428_v25, 0 }
 0x149   : > { %2620 = vmatmul.mubr.msk.bf16.vlgmr.msra.gmra.mxu1 %vm342_vm1, %v3089_v50  ;;  %v3109_v55 = vld [vmem:[#allocation3 + $0x51] sm:$0xff]  ;;  %v1555_v15 = vpack.c.bf16 %v1549_v3, %v1548_v45  ;;  %v1860_v6 = vpack.c.bf16 %v1548_v45, %v1547_v12 }
 0x14a   : > { %2630 = vmatmul.mubr.msk.bf16.vlgmr.msra.gmra.mxu0 %vm342_vm1, %v3091_v37  ;;  %v1364_v57 = vld [vmem:[#allocation3 + $0x50] sm:$0xff]  ;;  %2638 = vmatpush3.bf16.msra.mxu1 %v1573_v42  ;;  %v3113_v60 = vpack.c.bf16 %v3109_v55, %v3097_v52 }
 0x14b   : > { %v3115_v61 = vpack.c.bf16 %v1364_v57, %v1363_v56  ;;  %2648 = vmatpush3.bf16.msra.mxu0 %v1675_v51  ;;  %2720 = vmatprep.subr.msk.bf16.mxu1 %vm412_vm0, %v2408_v53  ;;  %v1366_v1 = vld [vmem:[#allocation3 + $0x70] sm:$0xff]  ;;  %v1655_v10 = vld [vmem:[#allocation3 + $0x80] sm:$0xff] }
 0x14c   : > { %2721 = vmatprep.subr.msk.bf16.mxu0 %vm412_vm0, %v2413_v54  ;;  %2623 = vmatprep.mubr.msk.bf16.mxu1 %vm342_vm1, %v3113_v60  ;;  %v1551_v2 = vld [vmem:[#allocation3 + $0x52] sm:$0xff]  ;;  %v1659_v59 = vpack.c.bf16 %v1655_v10, %v1366_v1  ;;  %v1757_v31 = vld [vmem:[#allocation3 + $0x81] sm:$0xff]  ;;  %v1966_v40 = vpack.c.bf16 %v1962_v36, %v1655_v10 }
 0x14d   : > { %2633 = vmatprep.mubr.msk.bf16.mxu0 %vm342_vm1, %v3115_v61  ;;  %v1378_v41 = vld [vmem:[#allocation3 + $0x61] sm:$0xff]  ;;  %v1556_v7 = vpack.c.bf16 %v1551_v2, %v1550_v5  ;;  %v1553_v20 = vld [vmem:[#allocation3 + $0x72] sm:$0xff]  ;;  %v1761_v33 = vpack.c.bf16 %v1757_v31, %v3123_v62  ;;  %v2068_v21 = vpack.c.bf16 %v2064_v38, %v1757_v31 }
 0x14e   : > { %v1365_v0 = vld [vmem:[#allocation3 + $0x60] sm:$0xff]  ;;  %v3126_v14 = vpack.c.bf16 %v3123_v62, %v1378_v41  ;;  %v1760_v24 = vpack.c.bf16 %v1378_v41, %v3109_v55 }
 0x14f   : > { %v3128_v44 = vpack.c.bf16 %v1366_v1, %v1365_v0  ;;  %v1658_v18 = vpack.c.bf16 %v1365_v0, %v1364_v57  ;;  %v1552_v9 = vld [vmem:[#allocation3 + $0x62] sm:$0xff] }
 0x150   : > { %v1557_v22 = vpack.c.bf16 %v1553_v20, %v1552_v9  ;;  %v1862_v26 = vpack.c.bf16 %v1552_v9, %v1551_v2  ;;  %v1859_v32 = vld [vmem:[#allocation3 + $0x82] sm:$0xff] }
 0x151   : > { %2624 = vmatmul.mubr.msk.bf16.gmra.mxu1 %vm342_vm1, %v3126_v14  ;;  %v1863_v34 = vpack.c.bf16 %v1859_v32, %v1553_v20  ;;  %v2170_v47 = vpack.c.bf16 %v2166_v46, %v1859_v32 }
 0x152   : > { %2634 = vmatmul.mubr.msk.bf16.gmra.mxu0 %vm342_vm1, %v3128_v44  ;;  %2639 = vmatprep.mubr.msk.bf16.mxu1 %vm342_vm1, %v1554_v13 }
 0x153   : > { %2649 = vmatprep.mubr.msk.bf16.mxu0 %vm342_vm1, %v1656_v16 }
 0x159   : > { %2640 = vmatmul.mubr.msk.bf16.vlgmr.msra.gmra.mxu1 %vm342_vm1, %v1555_v15 }
 0x15a   : > { %2650 = vmatmul.mubr.msk.bf16.vlgmr.msra.gmra.mxu0 %vm342_vm1, %v1657_v28  ;;  %2658 = vmatpush3.bf16.msra.mxu1 %v1777_v4 }
 0x15b   : > { %2643 = vmatprep.mubr.msk.bf16.mxu1 %vm342_vm1, %v1556_v7  ;;  %2653 = vmatprep.mubr.msk.bf16.mxu0 %vm342_vm1, %v1658_v18 }
 0x15c   : > { %2668 = vmatpush3.bf16.msra.mxu0 %v1879_v8  ;;  %2722 = vmatprep.subr.msk.bf16.mxu1 %vm412_vm0, %v2418_v17 }
 0x15d   : > { %2723 = vmatprep.subr.msk.bf16.mxu0 %vm412_vm0, %v2423_v30 }
 0x161   : > { %2644 = vmatmul.mubr.msk.bf16.gmra.mxu1 %vm342_vm1, %v1557_v22 }
 0x162   : > { %2654 = vmatmul.mubr.msk.bf16.gmra.mxu0 %vm342_vm1, %v1659_v59  ;;  %2659 = vmatprep.mubr.msk.bf16.mxu1 %vm342_vm1, %v1758_v29 }
 0x163   : > { %2669 = vmatprep.mubr.msk.bf16.mxu0 %vm342_vm1, %v1860_v6 }
 0x169   : > { %2660 = vmatmul.mubr.msk.bf16.vlgmr.msra.gmra.mxu1 %vm342_vm1, %v1759_v58 }
 0x16a   : > { %2670 = vmatmul.mubr.msk.bf16.vlgmr.msra.gmra.mxu0 %vm342_vm1, %v1861_v11  ;;  %2678 = vmatpush3.bf16.msra.mxu1 %v1982_v19 }
 0x16b   : > { %2663 = vmatprep.mubr.msk.bf16.mxu1 %vm342_vm1, %v1760_v24  ;;  %2673 = vmatprep.mubr.msk.bf16.mxu0 %vm342_vm1, %v1862_v26 }
 0x16c   : > { %2688 = vmatpush3.bf16.msra.mxu0 %v2084_v23  ;;  %2724 = vmatprep.subr.msk.bf16.mxu1 %vm412_vm0, %v2428_v25 }
 0x171   : > { %2664 = vmatmul.mubr.msk.bf16.gmra.mxu1 %vm342_vm1, %v1761_v33 }
 0x172   : > { %2674 = vmatmul.mubr.msk.bf16.gmra.mxu0 %vm342_vm1, %v1863_v34  ;;  %2679 = vmatprep.mubr.msk.bf16.mxu1 %vm342_vm1, %v3091_v37 }
 0x173   : > { %2689 = vmatprep.mubr.msk.bf16.mxu0 %vm342_vm1, %v3089_v50 }
 0x179   : > { %2680 = vmatmul.mubr.msk.bf16.vlgmr.msra.gmra.mxu1 %vm342_vm1, %v3115_v61 }
 0x17a   : > { %2690 = vmatmul.mubr.msk.bf16.vlgmr.msra.gmra.mxu0 %vm342_vm1, %v3113_v60  ;;  %2698 = vmatpush3.bf16.msra.mxu1 %v2186_v35 }
 0x17b   : > { %2683 = vmatprep.mubr.msk.bf16.mxu1 %vm342_vm1, %v3128_v44  ;;  %2693 = vmatprep.mubr.msk.bf16.mxu0 %vm342_vm1, %v3126_v14 }
 0x181   : > { %2684 = vmatmul.mubr.msk.bf16.gmra.mxu1 %vm342_vm1, %v1966_v40 }
 0x182   : > { %2694 = vmatmul.mubr.msk.bf16.gmra.mxu0 %vm342_vm1, %v2068_v21  ;;  %2699 = vmatprep.mubr.msk.bf16.mxu1 %vm342_vm1, %v1555_v15 }
 0x189   : > { %2700 = vmatmul.mubr.msk.bf16.vlgmr.msra.gmra.mxu1 %vm342_vm1, %v1556_v7 }
 0x18a   : > { %2703 = vmatprep.mubr.msk.bf16.mxu1 %vm342_vm1, %v1557_v22 }
 0x191   : > { %2704 = vmatmul.mubr.msk.bf16.gmra.mxu1 %vm342_vm1, %v2170_v47 }
 0x209   : > { %v2621_v27 = vpop.f32.mrf.mxu1 }
 0x20a   : > { %v2631_v48 = vpop.f32.mrf.mxu0 }
 0x20b   : > { %v1435_v49 = vpop.f32.mrf.mxu1  ;;  %v1524_v58 = vadd.f32 %v2631_v48, %v2621_v27 }
 0x20c   : > { %v1515_v50 = vpop.f32.mrf.mxu0 }
 0x20d   : > { %v2622_v37 = vpop.f32.mrf.mxu1  ;;  %v1516_v24 = vadd.f32 %v1515_v50, %v1435_v49 }
 0x20e   : > { %v2632_v39 = vpop.f32.mrf.mxu0 }
 0x20f   : > { %v1438_v42 = vpop.f32.mrf.mxu1  ;;  %v1527_v31 = vadd.f32 %v2632_v39, %v2622_v37 }
 0x210   : > { %v1518_v43 = vpop.f32.mrf.mxu0 }
 0x211   : > { %v2625_v51 = vpop.f32.mrf.mxu1  ;;  %v1519_v34 = vadd.f32 %v1518_v43, %v1438_v42 }
 0x212   : > { %v2635_v52 = vpop.f32.mrf.mxu0 }
 0x213   : > { %v1451_v53 = vpop.f32.mrf.mxu1  ;;  %v1540_v21 = vadd.f32 %v2635_v52, %v2625_v51 }
 0x214   : > { %v1531_v54 = vpop.f32.mrf.mxu0 }
 0x215   : > { %v2626_v55 = vpop.f32.mrf.mxu1  ;;  %v1532_v27 = vadd.f32 %v1531_v54, %v1451_v53 }
 0x216   : > { %v2636_v56 = vpop.f32.mrf.mxu0 }
 0x217   : > { %v3191_v57 = vpop.f32.mrf.mxu1  ;;  %v1543_v50 = vadd.f32 %v2636_v56, %v2626_v55 }
 0x218   : > { %v1534_v60 = vpop.f32.mrf.mxu0 }
 0x219   : > { %v2641_v61 = vpop.f32.mrf.mxu1  ;;  %v1535_v43 = vadd.f32 %v1534_v60, %v3191_v57 }
 0x21a   : > { %v2651_v62 = vpop.f32.mrf.mxu0  ;;  %v1642_v23 = vadd.f32 %v2641_v61, %v1524_v58 }
 0x21b   : > { %v1609_v63 = vpop.f32.mrf.mxu1 }
 0x21c   : > { %v1711_v12 = vpop.f32.mrf.mxu0  ;;  %v1640_v32 = vadd.f32 %v1609_v63, %v1516_v24  ;;  %v1744_v35 = vadd.f32 %v2651_v62, %v1642_v23 }
 0x21d   : > { %v2642_v41 = vpop.f32.mrf.mxu1 }
 0x21e   : > { %v2652_v0 = vpop.f32.mrf.mxu0  ;;  %v1643_v36 = vadd.f32 %v2642_v41, %v1527_v31  ;;  %v1742_v46 = vadd.f32 %v1711_v12, %v1640_v32  ;;  %v2735_v31 = vld [vmem:[%s2874_s16] sm:$0xff] }
 0x21f   : > { %v1612_v1 = vpop.f32.mrf.mxu1 }
 0x220   : > { %v1714_v14 = vpop.f32.mrf.mxu0  ;;  %v1641_v47 = vadd.f32 %v1612_v1, %v1519_v34 }
 0x221   : > { %v2645_v44 = vpop.f32.mrf.mxu1 }
 0x222   : > { %v2655_v13 = vpop.f32.mrf.mxu0  ;;  %v1743_v39 = vadd.f32 %v1714_v14, %v1641_v47 }
 0x223   : > { %v1625_v16 = vpop.f32.mrf.mxu1 }
 0x224   : > { %v1727_v45 = vpop.f32.mrf.mxu0  ;;  %v1644_v61 = vadd.f32 %v1625_v16, %v1532_v27 }
 0x225   : > { %v2646_v2 = vpop.f32.mrf.mxu1 }
 0x226   : > { %v2656_v3 = vpop.f32.mrf.mxu0  ;;  %v1647_v62 = vadd.f32 %v2646_v2, %v1543_v50  ;;  %v1746_v53 = vadd.f32 %v1727_v45, %v1644_v61  ;;  %v2737_v61 = vld [vmem:[%s2874_s16 + $0x8] sm:$0xff] }
 0x227   : > { %v1628_v15 = vpop.f32.mrf.mxu1 }
 0x228   : > { %v3193_v28 = vpop.f32.mrf.mxu0  ;;  %v1645_v54 = vadd.f32 %v1628_v15, %v1535_v43  ;;  %v1749_v16 = vadd.f32 %v2656_v3, %v1647_v62 }
 0x229   : > { %3255 = vst [vmem:[#allocation6_spill] sm:$0xff] %v3193_v28  ;;  %v2661_v4 = vpop.f32.mrf.mxu1  ;;  %v1745_v28 = vadd.f32 %v2652_v0, %v1643_v36 }
 0x22a   : > { %v2671_v5 = vpop.f32.mrf.mxu0 }
 0x22b   : > { %v1813_v7 = vpop.f32.mrf.mxu1 }
 0x22c   : > { %v1915_v8 = vpop.f32.mrf.mxu0  ;;  %v1844_v49 = vadd.f32 %v1813_v7, %v1742_v46 }
 0x22d   : > { %v2662_v18 = vpop.f32.mrf.mxu1 }
 0x22e   : > { %v2672_v17 = vpop.f32.mrf.mxu0  ;;  %v1847_v42 = vadd.f32 %v2662_v18, %v1745_v28  ;;  %v1946_v52 = vadd.f32 %v1915_v8, %v1844_v49 }
 0x22f   : > { %v1816_v30 = vpop.f32.mrf.mxu1 }
 0x230   : > { %v1918_v9 = vpop.f32.mrf.mxu0  ;;  %v1845_v12 = vadd.f32 %v1816_v30, %v1743_v39  ;;  %v3258_v60 = vld [vmem:[#allocation6_spill] sm:$0xff] }
 0x231   : > { %v2665_v10 = vpop.f32.mrf.mxu1 }
 0x232   : > { %v2675_v20 = vpop.f32.mrf.mxu0  ;;  %v1947_v28 = vadd.f32 %v1918_v9, %v1845_v12  ;;  %v2739_v12 = vld [vmem:[%s2874_s16 + $0x20] sm:$0xff] }
 0x233   : > { %v1829_v22 = vpop.f32.mrf.mxu1 }
 0x234   : > { %v1931_v59 = vpop.f32.mrf.mxu0  ;;  %v1848_v14 = vadd.f32 %v1829_v22, %v1746_v53 }
 0x235   : > { %v2666_v29 = vpop.f32.mrf.mxu1 }
 0x236   : > { %v3195_v6 = vpop.f32.mrf.mxu0  ;;  %v1851_v2 = vadd.f32 %v2666_v29, %v1749_v16  ;;  %v2734_v29 = vld [vmem:[%s2874_s16 + $0x10] sm:$0xff] }
 0x237   : > { %3256 = vst [vmem:[#allocation7_spill] sm:$0xff] %v3195_v6  ;;  %v1832_v11 = vpop.f32.mrf.mxu1  ;;  %v1846_v6 = vadd.f32 %v2661_v4, %v1744_v35  ;;  %v1949_v4 = vadd.f32 %v2672_v17, %v1847_v42  ;;  %v1950_v17 = vadd.f32 %v1931_v59, %v1848_v14  ;;  %v2738_v42 = vld [vmem:[%s2874_s16 + $0x30] sm:$0xff] }
 0x238   : > { %v3197_v19 = vpop.f32.mrf.mxu0 }
 0x239   : > { %3257 = vst [vmem:[#allocation4_spill] sm:$0xff] %v3197_v19  ;;  %v2681_v26 = vpop.f32.mrf.mxu1  ;;  %v1646_v19 = vadd.f32 %v2645_v44, %v1540_v21  ;;  %v1948_v63 = vadd.f32 %v2671_v5, %v1846_v6  ;;  %v2736_v21 = vld [vmem:[%s2874_s16 + $0x18] sm:$0xff] }
 0x23a   : > { %v2691_v25 = vpop.f32.mrf.mxu0 }
 0x23b   : > { %v2018_v33 = vpop.f32.mrf.mxu1  ;;  %v1748_v51 = vadd.f32 %v2655_v13, %v1646_v19  ;;  %v2051_v1 = vadd.f32 %v2681_v26, %v1948_v63  ;;  %v1747_v13 = vadd.f32 %v3258_v60, %v1645_v54 }
 0x23c   : > { %v2120_v38 = vpop.f32.mrf.mxu0  ;;  %v2049_v56 = vadd.f32 %v2018_v33, %v1946_v52 }
 0x23d   : > { %v2682_v40 = vpop.f32.mrf.mxu1  ;;  %v1850_v55 = vadd.f32 %v2665_v10, %v1748_v51  ;;  %v2153_v7 = vadd.f32 %v2691_v25, %v2051_v1  ;;  %v1849_v10 = vadd.f32 %v1832_v11, %v1747_v13 }
 0x23e   : > { %v2692_v58 = vpop.f32.mrf.mxu0  ;;  %v2052_v57 = vadd.f32 %v2682_v40, %v1949_v4  ;;  %v2151_v15 = vadd.f32 %v2120_v38, %v2049_v56  ;;  %v3259_v24 = vld [vmem:[#allocation7_spill] sm:$0xff] }
 0x23f   : > { %v2021_v48 = vpop.f32.mrf.mxu1  ;;  %v1952_v45 = vadd.f32 %v2675_v20, %v1850_v55  ;;  %v1953_v23 = vadd.f32 %v3259_v24, %v1851_v2  ;;  %v2741_v55 = vld [vmem:[%s2874_s16 + $0x28] sm:$0xff] }
 0x240   : > { %v2123_v0 = vpop.f32.mrf.mxu0  ;;  %v2050_v30 = vadd.f32 %v2021_v48, %v1947_v28  ;;  %v2154_v9 = vadd.f32 %v2692_v58, %v2052_v57  ;;  %v3260_v34 = vld [vmem:[#allocation4_spill] sm:$0xff] }
 0x241   : > { %v2685_v37 = vpop.f32.mrf.mxu1  ;;  %v1951_v35 = vadd.f32 %v3260_v34, %v1849_v10 }
 0x242   : > { %v2695_v8 = vpop.f32.mrf.mxu0  ;;  %v2055_v22 = vadd.f32 %v2685_v37, %v1952_v45  ;;  %v2152_v11 = vadd.f32 %v2123_v0, %v2050_v30  ;;  %v2740_v0 = vld [vmem:[%s2874_s16 + $0x38] sm:$0xff] }
 0x243   : > { %v2034_v41 = vpop.f32.mrf.mxu1 }
 0x244   : > { %v2136_v26 = vpop.f32.mrf.mxu0  ;;  %v2053_v25 = vadd.f32 %v2034_v41, %v1950_v17  ;;  %v2157_v38 = vadd.f32 %v2695_v8, %v2055_v22 }
 0x245   : > { %v2686_v44 = vpop.f32.mrf.mxu1 }
 0x246   : > { %v2056_v40 = vadd.f32 %v2686_v44, %v1953_v23  ;;  %v2696_v27 = vpop.f32.mrf.mxu0  ;;  %v2155_v49 = vadd.f32 %v2136_v26, %v2053_v25 }
 0x247   : > { %v2037_v5 = vpop.f32.mrf.mxu1 }
 0x248   : > { %v2054_v50 = vadd.f32 %v2037_v5, %v1951_v35  ;;  %v2158_v63 = vadd.f32 %v2696_v27, %v2056_v40  ;;  %v2139_v41 = vpop.f32.mrf.mxu0 }
 0x249   : > { %v2701_v18 = vpop.f32.mrf.mxu1 }
 0x24a   : > { %v2255_v6 = vadd.f32 %v2701_v18, %v2153_v7  ;;  %v2156_v52 = vadd.f32 %v2139_v41, %v2054_v50 }
 0x24b   : > { %v2222_v3 = vpop.f32.mrf.mxu1 }
 0x24c   : > { %v2263_v19 = vadd.f32 %v2734_v29, %v2255_v6  ;;  %v2253_v20 = vadd.f32 %v2222_v3, %v2151_v15 }
 0x24d   : > { %v2702_v59 = vpop.f32.mrf.mxu1 }
 0x24e   : > { %2271 = vst.msk [vmem:[%s3206_s14 + $0x10] sm:$0xff] %vm342_vm1, %v2263_v19  ;;  %v2261_v32 = vadd.f32 %v2735_v31, %v2253_v20  ;;  %v2256_v33 = vadd.f32 %v2702_v59, %v2154_v9 }
 0x24f   : > { %v2225_v36 = vpop.f32.mrf.mxu1 }
 0x250   : > { %2269 = vst.msk [vmem:[%s3206_s14] sm:$0xff] %vm342_vm1, %v2261_v32  ;;  %v2264_v46 = vadd.f32 %v2736_v21, %v2256_v33  ;;  %v2254_v47 = vadd.f32 %v2225_v36, %v2152_v11 }
 0x251   : > { %v2705_v48 = vpop.f32.mrf.mxu1 }
 0x252   : > { %2272 = vst.msk [vmem:[%s3206_s14 + $0x18] sm:$0xff] %vm342_vm1, %v2264_v46  ;;  %v2262_v58 = vadd.f32 %v2737_v61, %v2254_v47  ;;  %v2259_v37 = vadd.f32 %v2705_v48, %v2157_v38 }
 0x253   : > { %v2238_v39 = vpop.f32.mrf.mxu1 }
 0x254   : > { %2270 = vst.msk [vmem:[%s3206_s14 + $0x8] sm:$0xff] %vm342_vm1, %v2262_v58  ;;  %v2267_v43 = vadd.f32 %v2738_v42, %v2259_v37  ;;  %v2257_v62 = vadd.f32 %v2238_v39, %v2155_v49 }
 0x255   : > { %v2706_v51 = vpop.f32.mrf.mxu1 }
 0x256   : > { %2275 = vst.msk [vmem:[%s3206_s14 + $0x30] sm:$0xff] %vm342_vm1, %v2267_v43  ;;  %v2265_v1 = vadd.f32 %v2739_v12, %v2257_v62  ;;  %v2260_v53 = vadd.f32 %v2706_v51, %v2158_v63 }
 0x257   : > { %v2241_v54 = vpop.f32.mrf.mxu1 }
 0x258   : > { %2273 = vst.msk [vmem:[%s3206_s14 + $0x20] sm:$0xff] %vm342_vm1, %v2265_v1  ;;  %v2268_v44 = vadd.f32 %v2740_v0, %v2260_v53  ;;  %v2258_v4 = vadd.f32 %v2241_v54, %v2156_v52 }
 0x25a   : > { %2276 = vst.msk [vmem:[%s3206_s14 + $0x38] sm:$0xff] %vm342_vm1, %v2268_v44  ;;  %v2266_v56 = vadd.f32 %v2741_v55, %v2258_v4 }
 0x25c   : > { %2274 = vst.msk [vmem:[%s3206_s14 + $0x28] sm:$0xff] %vm342_vm1, %v2266_v56 }
 0x25d PF: > { %s17_s24 = sadd.s32 1, %s2748_s24  }
 0x25e   : > { %p14_p4 = scmp.ge.s32.totalorder %s17_s24, 4  }
 0x260   :  { %16 = sbr.rel (!%p14_p4) target bundleno = 1 (0x1), region = 98 }

// kernel: network_block_forward.2
= control target key start
LH: loop header
LB: loop body
LE: loop exit
PB: predicated region body
PF: predicated region fallthrough
CT: control target
= control target key end

     0   :  { %s3251_s27 = smov 0   ;;  %s3980_s0 = inlined_call_operand.vmem [shape: f32[2,16,16,4], index: 0, kind: input, shape index: {}]   ;;  %s3981_s1 = inlined_call_operand.vmem [shape: f32[1,4], index: 1, kind: input, shape index: {}]   ;;  %s3982_s2 = inlined_call_operand.vmem [shape: f32[1,4], index: 2, kind: input, shape index: {}]   ;;  %s3983_s3 = inlined_call_operand.vmem [shape: bf16[9,4,8], index: 3, kind: input, shape index: {}]   ;;  %s3984_s4 = inlined_call_operand.vmem [shape: f32[1,8], index: 4, kind: input, shape index: {}]   ;;  %s3985_s5 = inlined_call_operand.vmem [shape: f32[1,8], index: 5, kind: input, shape index: {}]   ;;  %s3986_s6 = inlined_call_operand.vmem [shape: bf16[9,8,8], index: 6, kind: input, shape index: {}]   ;;  %s3987_s7 = inlined_call_operand.vmem [shape: bf16[4,8], index: 7, kind: input, shape index: {}]   ;;  %s3988_s8 = inlined_call_operand.vmem [shape: f32[2,8,8,8], index: 8, kind: output, shape index: {}]  }
   0x1 LB: > { %s2772_s28 = sadd.s32 4294967295, %s3203_s27   ;;  %p2776_p0 = scmp.ge.s32.totalorder %s3203_s27, 1  ;;  %s3203_s27 = sphi %s3251_s27, %s18_s27  }
   0x2   : > { %p262_p1 = scmp.lt.s32.totalorder %s3203_s27, 3 }
   0x4   : > { %p263_p2 = pnand %p2776_p0, %p262_p1 }
   0x6   : > { %266 = sbr.rel (%p263_p2) target bundleno = 608 (0x260), region = 52 }
   0xb   : > { %v2783_v0 = vld [vmem:[%s3983_s3 + $0x2] sm:$0x3]  ;;  %vm656_vm0 = vcmask 1041408   ;;  %p296_p3 = scmp.lt.s32.totalorder %s2772_s28, 1  ;;  %vm513_vm1 = vcmask 31744   ;;  %vm516_vm2 = vcmask 25600  }
   0xc   : > { %3169 = vmatprep.subr.msk.bf16.mxu1 %vm656_vm0, %v2783_v0  ;;  %3168 = vmatprep.subr.msk.bf16.mxu0 %vm656_vm0, %v2783_v0  ;;  %v658_v1 = vsel %vm656_vm0, %v2783_v0, 0  ;;  %v3205_v2 = vmov 0.0   ;;  %v621_v3 = vld [vmem:[%s3983_s3] sm:$0x3]  ;;  %v3375_v4 = vld [vmem:[%s3983_s3 + $0x4] sm:$0x3] }
   0xd   : > { %3167 = vmatpush3.bf16.msra.mxu1 %v658_v1  ;;  %2977 = vmatpush3.bf16.msra.mxu0 %v658_v1  ;;  %s3999_s28 = smov (!%p296_p3, %s2772_s28), 1  ;;  %514 = vst.msk [vmem:[#allocation2] sm:$0xff] %vm513_vm1, %v3205_v2  ;;  %515 = vst.msk [vmem:[#allocation2 + $0x8] sm:$0xff] %vm513_vm1, %v3205_v2  ;;  %v3384_v5 = vld [vmem:[%s3981_s1] ss:$0 sm:$0xff]  ;;  %v3411_v21 = vsel %vm656_vm0, %v621_v3, 0 }
   0xe   : > { %521 = vst.msk [vmem:[#allocation2 + $0x30] sm:$0xff] %vm513_vm1, %v3205_v2  ;;  %522 = vst.msk [vmem:[#allocation2 + $0x38] sm:$0xff] %vm513_vm1, %v3205_v2  ;;  %3170 = vmatprep.subr.msk.bf16.mxu1 %vm656_vm0, %v621_v3  ;;  %3171 = vmatprep.subr.msk.bf16.mxu0 %vm656_vm0, %v3375_v4  ;;  %s2879_s13 = sshll.u32 %s3999_s28, 8  ;;  %v3394_v6 = vld [vmem:[%s3982_s2] ss:$0 sm:$0xff]  ;;  %s2880_s17 = sshll.u32 %s3999_s28, 6 }
   0xf   : > { %523 = vst.msk [vmem:[#allocation2 + $0x40] sm:$0x3] %vm516_vm2, %v3205_v2  ;;  %517 = vst.msk [vmem:[#allocation2 + $0x10] sm:$0x3] %vm516_vm2, %v3205_v2  ;;  %s3389_s18 = scalar_lea.vmem %s3980_s0, %s2879_s13  ;;  %s3957_s20 = scalar_lea.vmem %s3988_s8, %s2880_s17 }
  0x10   : > { %518 = vst.msk [vmem:[#allocation2 + $0x18] sm:$0xff] %vm513_vm1, %v3205_v2  ;;  %519 = vst.msk [vmem:[#allocation2 + $0x20] sm:$0xff] %vm513_vm1, %v3205_v2  ;;  %v309_v7 = vld [vmem:[%s3389_s18 + $0x10] sm:$0xff]  ;;  %v310_v8 = vld [vmem:[%s3389_s18 + $0x18] sm:$0xff] }
  0x11   : > { %520 = vst.msk [vmem:[#allocation2 + $0x28] sm:$0x3] %vm516_vm2, %v3205_v2  ;;  %526 = vst.msk [vmem:[#allocation2 + $0x58] sm:$0x3] %vm516_vm2, %v3205_v2  ;;  %v321_v9 = vld [vmem:[%s3389_s18 + $0x70] sm:$0xff]  ;;  %v348_v10 = vmul.f32 %v3384_v5, %v309_v7  ;;  %v349_v11 = vmul.f32 %v3384_v5, %v310_v8  ;;  %v322_v12 = vld [vmem:[%s3389_s18 + $0x78] sm:$0xff] }
  0x12   : > { %524 = vst.msk [vmem:[#allocation2 + $0x48] sm:$0xff] %vm513_vm1, %v3205_v2  ;;  %525 = vst.msk [vmem:[#allocation2 + $0x50] sm:$0xff] %vm513_vm1, %v3205_v2  ;;  %v325_v13 = vld [vmem:[%s3389_s18 + $0x90] sm:$0xff]  ;;  %v326_v14 = vld [vmem:[%s3389_s18 + $0x98] sm:$0xff]  ;;  %v360_v15 = vmul.f32 %v3384_v5, %v321_v9  ;;  %v361_v16 = vmul.f32 %v3384_v5, %v322_v12  ;;  %v3455_v12 = vsel %vm656_vm0, %v3375_v4, 0 }
  0x13   : > { %527 = vst.msk [vmem:[#allocation2 + $0x60] sm:$0xff] %vm513_vm1, %v3205_v2  ;;  %528 = vst.msk [vmem:[#allocation2 + $0x68] sm:$0xff] %vm513_vm1, %v3205_v2  ;;  %v364_v17 = vmul.f32 %v3384_v5, %v325_v13  ;;  %v365_v18 = vmul.f32 %v3384_v5, %v326_v14  ;;  %v313_v19 = vld [vmem:[%s3389_s18 + $0x30] sm:$0xff]  ;;  %v314_v20 = vld [vmem:[%s3389_s18 + $0x38] sm:$0xff]  ;;  %v387_v22 = vadd.f32 %v3394_v6, %v348_v10 }
  0x14   : > { %529 = vst.msk [vmem:[#allocation2 + $0x70] sm:$0x3] %vm516_vm2, %v3205_v2  ;;  %532 = vst.msk [vmem:[#allocation2 + $0x88] sm:$0x3] %vm516_vm2, %v3205_v2  ;;  %v388_v23 = vadd.f32 %v3394_v6, %v349_v11  ;;  %v399_v24 = vadd.f32 %v3394_v6, %v360_v15  ;;  %v352_v25 = vmul.f32 %v3384_v5, %v313_v19  ;;  %v317_v29 = vld [vmem:[%s3389_s18 + $0x50] sm:$0xff]  ;;  %v318_v30 = vld [vmem:[%s3389_s18 + $0x58] sm:$0xff] }
  0x15   : > { %530 = vst.msk [vmem:[#allocation2 + $0x78] sm:$0xff] %vm513_vm1, %v3205_v2  ;;  %531 = vst.msk [vmem:[#allocation2 + $0x80] sm:$0xff] %vm513_vm1, %v3205_v2  ;;  %v400_v26 = vadd.f32 %v3394_v6, %v361_v16  ;;  %v403_v27 = vadd.f32 %v3394_v6, %v364_v17  ;;  %v404_v28 = vadd.f32 %v3394_v6, %v365_v18  ;;  %vm419_vm3 = vcmp.ge.f32.partialorder %v387_v22, 0.0  ;;  %v329_v46 = vld [vmem:[%s3389_s18 + $0xb0] sm:$0xff]  ;;  %v330_v47 = vld [vmem:[%s3389_s18 + $0xb8] sm:$0xff] }
  0x16   : > { %533 = vst.msk [vmem:[#allocation2 + $0x90] sm:$0xff] %vm513_vm1, %v3205_v2  ;;  %534 = vst.msk [vmem:[#allocation2 + $0x98] sm:$0xff] %vm513_vm1, %v3205_v2  ;;  %v353_v31 = vmul.f32 %v3384_v5, %v314_v20  ;;  %vm420_vm4 = vcmp.ge.f32.partialorder %v388_v23, 0.0  ;;  %v451_v32 = vmul.f32 0.1, %v387_v22  ;;  %vm431_vm5 = vcmp.ge.f32.partialorder %v399_v24, 0.0 }
  0x17   : > { %535 = vst.msk [vmem:[#allocation2 + $0xa0] sm:$0x3] %vm516_vm2, %v3205_v2  ;;  %538 = vst.msk [vmem:[#allocation2 + $0xb8] sm:$0x3] %vm516_vm2, %v3205_v2  ;;  %v452_v33 = vmul.f32 0.1, %v388_v23  ;;  %v356_v40 = vmul.f32 %v3384_v5, %v317_v29  ;;  %v357_v41 = vmul.f32 %v3384_v5, %v318_v30  ;;  %v391_v44 = vadd.f32 %v3394_v6, %v352_v25 }
  0x18   : > { %536 = vst.msk [vmem:[#allocation2 + $0xa8] sm:$0xff] %vm513_vm1, %v3205_v2  ;;  %537 = vst.msk [vmem:[#allocation2 + $0xb0] sm:$0xff] %vm513_vm1, %v3205_v2  ;;  %vm432_vm6 = vcmp.ge.f32.partialorder %v400_v26, 0.0  ;;  %vm435_vm7 = vcmp.ge.f32.partialorder %v403_v27, 0.0  ;;  %vm436_vm8 = vcmp.ge.f32.partialorder %v404_v28, 0.0  ;;  %v483_v34 = vsel %vm419_vm3, %v387_v22, %v451_v32  ;;  %v333_v52 = vld [vmem:[%s3389_s18 + $0xd0] sm:$0xff] }
  0x19   : > { %539 = vst.msk [vmem:[#allocation2 + $0xc0] sm:$0xff] %vm513_vm1, %v3205_v2  ;;  %540 = vst.msk [vmem:[#allocation2 + $0xc8] sm:$0xff] %vm513_vm1, %v3205_v2  ;;  %v484_v35 = vsel %vm420_vm4, %v388_v23, %v452_v33  ;;  %v463_v36 = vmul.f32 0.1, %v399_v24  ;;  %v464_v37 = vmul.f32 0.1, %v400_v26  ;;  %v392_v45 = vadd.f32 %v3394_v6, %v353_v31 }
  0x1a   : > { %541 = vst.msk [vmem:[#allocation2 + $0xd0] sm:$0x3] %vm516_vm2, %v3205_v2  ;;  %544 = vst.msk [vmem:[#allocation2 + $0xe8] sm:$0x3] %vm516_vm2, %v3205_v2  ;;  %v467_v38 = vmul.f32 0.1, %v403_v27  ;;  %v395_v50 = vadd.f32 %v3394_v6, %v356_v40  ;;  %v396_v51 = vadd.f32 %v3394_v6, %v357_v41  ;;  %v368_v62 = vmul.f32 %v3384_v5, %v329_v46 }
  0x1b   : > { %542 = vst.msk [vmem:[#allocation2 + $0xd8] sm:$0xff] %vm513_vm1, %v3205_v2  ;;  %543 = vst.msk [vmem:[#allocation2 + $0xe0] sm:$0xff] %vm513_vm1, %v3205_v2  ;;  %v468_v39 = vmul.f32 0.1, %v404_v28  ;;  %v495_v42 = vsel %vm431_vm5, %v399_v24, %v463_v36  ;;  %v496_v43 = vsel %vm432_vm6, %v400_v26, %v464_v37  ;;  %v334_v53 = vld [vmem:[%s3389_s18 + $0xd8] sm:$0xff]  ;;  %v307_v54 = vld [vmem:[%s3389_s18] sm:$0xff]  ;;  %v369_v63 = vmul.f32 %v3384_v5, %v330_v47 }
  0x1c   : > { %545 = vst.msk [vmem:[#allocation2 + $0xf0] sm:$0xff] %vm513_vm1, %v3205_v2  ;;  %546 = vst.msk [vmem:[#allocation2 + $0xf8] sm:$0xff] %vm513_vm1, %v3205_v2  ;;  %v499_v48 = vsel %vm435_vm7, %v403_v27, %v467_v38  ;;  %vm423_vm9 = vcmp.ge.f32.partialorder %v391_v44, 0.0  ;;  %vm424_vm10 = vcmp.ge.f32.partialorder %v392_v45, 0.0  ;;  %v455_v55 = vmul.f32 0.1, %v391_v44 }
  0x1d   : > { %547 = vst.msk [vmem:[#allocation2 + $0x100] sm:$0x3] %vm516_vm2, %v3205_v2  ;;  %550 = vst.msk [vmem:[#allocation2 + $0x118] sm:$0x3] %vm516_vm2, %v3205_v2  ;;  %v500_v49 = vsel %vm436_vm8, %v404_v28, %v468_v39  ;;  %v456_v56 = vmul.f32 0.1, %v392_v45  ;;  %v372_v7 = vmul.f32 %v3384_v5, %v333_v52  ;;  %v373_v8 = vmul.f32 %v3384_v5, %v334_v53 }
  0x1e   : > { %548 = vst.msk [vmem:[#allocation2 + $0x108] sm:$0xff] %vm513_vm1, %v3205_v2  ;;  %549 = vst.msk [vmem:[#allocation2 + $0x110] sm:$0xff] %vm513_vm1, %v3205_v2  ;;  %vm427_vm11 = vcmp.ge.f32.partialorder %v395_v50, 0.0  ;;  %vm428_vm12 = vcmp.ge.f32.partialorder %v396_v51, 0.0  ;;  %v459_v57 = vmul.f32 0.1, %v395_v50  ;;  %v487_v60 = vsel %vm423_vm9, %v391_v44, %v455_v55 }
  0x1f   : > { %551 = vst.msk [vmem:[#allocation2 + $0x120] sm:$0xff] %vm513_vm1, %v3205_v2  ;;  %552 = vst.msk [vmem:[#allocation2 + $0x128] sm:$0xff] %vm513_vm1, %v3205_v2  ;;  %v460_v58 = vmul.f32 0.1, %v396_v51  ;;  %v623_v59 = vld [vmem:[#allocation2 + $0x1] ss:$2 sm:$0xff]  ;;  %v488_v61 = vsel %vm424_vm10, %v392_v45, %v456_v56  ;;  %v407_v10 = vadd.f32 %v3394_v6, %v368_v62  ;;  %v408_v11 = vadd.f32 %v3394_v6, %v369_v63 }
  0x20   : > { %553 = vst.msk [vmem:[#allocation2 + $0x130] sm:$0x3] %vm516_vm2, %v3205_v2  ;;  %556 = vst.msk [vmem:[#allocation2 + $0x148] sm:$0x3] %vm516_vm2, %v3205_v2  ;;  %v308_v0 = vld [vmem:[%s3389_s18 + $0x8] sm:$0xff]  ;;  %v491_v1 = vsel %vm427_vm11, %v395_v50, %v459_v57  ;;  %v311_v13 = vld [vmem:[%s3389_s18 + $0x20] sm:$0xff]  ;;  %v346_v14 = vmul.f32 %v3384_v5, %v307_v54  ;;  %v411_v16 = vadd.f32 %v3394_v6, %v372_v7 }
  0x21   : > { %554 = vst.msk [vmem:[#allocation2 + $0x138] sm:$0xff] %vm513_vm1, %v3205_v2  ;;  %555 = vst.msk [vmem:[#allocation2 + $0x140] sm:$0xff] %vm513_vm1, %v3205_v2  ;;  %v492_v3 = vsel %vm428_vm12, %v396_v51, %v460_v58  ;;  %v412_v17 = vadd.f32 %v3394_v6, %v373_v8  ;;  %v3461_v18 = vld [vmem:[#allocation2] ss:$2 sm:$0xff]  ;;  %v347_v23 = vmul.f32 %v3384_v5, %v308_v0  ;;  %vm439_vm13 = vcmp.ge.f32.partialorder %v407_v10, 0.0 }
  0x22   : > { %557 = vst.msk [vmem:[#allocation2 + $0x150] sm:$0xff] %vm513_vm1, %v3205_v2  ;;  %558 = vst.msk [vmem:[#allocation2 + $0x158] sm:$0xff] %vm513_vm1, %v3205_v2  ;;  %v3465_v20 = vld [vmem:[#allocation2 + $0x2] ss:$2 sm:$0xff]  ;;  %vm440_vm14 = vcmp.ge.f32.partialorder %v408_v11, 0.0  ;;  %vm443_vm15 = vcmp.ge.f32.partialorder %v411_v16, 0.0  ;;  %v350_v29 = vmul.f32 %v3384_v5, %v311_v13  ;;  %v385_v41 = vadd.f32 %v3394_v6, %v346_v14 }
  0x23   : > { %559 = vst.msk [vmem:[#allocation2 + $0x160] sm:$0x3] %vm516_vm2, %v3205_v2  ;;  %562 = vst.msk [vmem:[#allocation2 + $0x178] sm:$0x3] %vm516_vm2, %v3205_v2  ;;  %v312_v4 = vld [vmem:[%s3389_s18 + $0x28] sm:$0xff]  ;;  %v315_v26 = vld [vmem:[%s3389_s18 + $0x40] sm:$0xff] }
  0x24   : > { %560 = vst.msk [vmem:[#allocation2 + $0x168] sm:$0xff] %vm513_vm1, %v3205_v2  ;;  %561 = vst.msk [vmem:[#allocation2 + $0x170] sm:$0xff] %vm513_vm1, %v3205_v2  ;;  %v471_v25 = vmul.f32 0.1, %v407_v10  ;;  %v472_v28 = vmul.f32 0.1, %v408_v11  ;;  %v351_v40 = vmul.f32 %v3384_v5, %v312_v4  ;;  %v389_v51 = vadd.f32 %v3394_v6, %v350_v29 }
  0x25   : > { %563 = vst.msk [vmem:[#allocation2 + $0x180] sm:$0xff] %vm513_vm1, %v3205_v2  ;;  %564 = vst.msk [vmem:[#allocation2 + $0x188] sm:$0xff] %vm513_vm1, %v3205_v2  ;;  %v316_v30 = vld [vmem:[%s3389_s18 + $0x48] sm:$0xff]  ;;  %v475_v32 = vmul.f32 0.1, %v411_v16  ;;  %v319_v53 = vld [vmem:[%s3389_s18 + $0x60] sm:$0xff]  ;;  %v354_v55 = vmul.f32 %v3384_v5, %v315_v26 }
  0x26   : > { %565 = vst.msk [vmem:[#allocation2 + $0x190] sm:$0x3] %vm516_vm2, %v3205_v2  ;;  %vm444_vm2 = vcmp.ge.f32.partialorder %v412_v17, 0.0  ;;  %v476_v33 = vmul.f32 0.1, %v412_v17  ;;  %v504_v36 = vsel %vm440_vm14, %v408_v11, %v472_v28  ;;  %v390_v52 = vadd.f32 %v3394_v6, %v351_v40  ;;  %v320_v54 = vld [vmem:[%s3389_s18 + $0x68] sm:$0xff] }
  0x27   : > { %572 = vst.msk [vmem:[#allocation2 + $0x31] sm:$0xff] %vm513_vm1, %v483_v34  ;;  %573 = vst.msk [vmem:[#allocation2 + $0x39] sm:$0xff] %vm513_vm1, %v484_v35  ;;  %v503_v34 = vsel %vm439_vm13, %v407_v10, %v471_v25  ;;  %v507_v44 = vsel %vm443_vm15, %v411_v16, %v475_v32  ;;  %vm417_vm3 = vcmp.ge.f32.partialorder %v385_v41, 0.0  ;;  %vm421_vm5 = vcmp.ge.f32.partialorder %v389_v51, 0.0  ;;  %v324_v63 = vld [vmem:[%s3389_s18 + $0x88] sm:$0xff]  ;;  %v327_v0 = vld [vmem:[%s3389_s18 + $0xa0] sm:$0xff] }
  0x28   : > { %584 = vst.msk [vmem:[#allocation2 + $0xc1] sm:$0xff] %vm513_vm1, %v495_v42  ;;  %585 = vst.msk [vmem:[#allocation2 + $0xc9] sm:$0xff] %vm513_vm1, %v496_v43  ;;  %v386_v42 = vadd.f32 %v3394_v6, %v347_v23  ;;  %v508_v45 = vsel %vm444_vm2, %v412_v17, %v476_v33  ;;  %vm422_vm6 = vcmp.ge.f32.partialorder %v390_v52, 0.0  ;;  %v449_v62 = vmul.f32 0.1, %v385_v41  ;;  %v328_v16 = vld [vmem:[%s3389_s18 + $0xa8] sm:$0xff] }
  0x29   : > { %588 = vst.msk [vmem:[#allocation2 + $0xf1] sm:$0xff] %vm513_vm1, %v499_v48  ;;  %589 = vst.msk [vmem:[#allocation2 + $0xf9] sm:$0xff] %vm513_vm1, %v500_v49  ;;  %v2802_v48 = vld [vmem:[%s3983_s3 + $0x8] sm:$0x3]  ;;  %v454_v7 = vmul.f32 0.1, %v390_v52  ;;  %v358_v8 = vmul.f32 %v3384_v5, %v319_v53  ;;  %v359_v14 = vmul.f32 %v3384_v5, %v320_v54  ;;  %v366_v32 = vmul.f32 %v3384_v5, %v327_v0 }
  0x2a   : > { %576 = vst.msk [vmem:[#allocation2 + $0x61] sm:$0xff] %vm513_vm1, %v487_v60  ;;  %577 = vst.msk [vmem:[#allocation2 + $0x69] sm:$0xff] %vm513_vm1, %v488_v61  ;;  %v355_v60 = vmul.f32 %v3384_v5, %v316_v30  ;;  %v323_v61 = vld [vmem:[%s3389_s18 + $0x80] sm:$0xff]  ;;  %vm418_vm4 = vcmp.ge.f32.partialorder %v386_v42, 0.0  ;;  %v1059_v11 = vsel %vm656_vm0, %v2802_v48, 0  ;;  %v481_v13 = vsel %vm417_vm3, %v385_v41, %v449_v62  ;;  %v332_v23 = vld [vmem:[%s3389_s18 + $0xc8] sm:$0xff] }
  0x2b   : > { %580 = vst.msk [vmem:[#allocation2 + $0x91] sm:$0xff] %vm513_vm1, %v491_v1  ;;  %581 = vst.msk [vmem:[#allocation2 + $0x99] sm:$0xff] %vm513_vm1, %v492_v3  ;;  %v450_v1 = vmul.f32 0.1, %v386_v42  ;;  %v453_v3 = vmul.f32 0.1, %v389_v51  ;;  %v397_v26 = vadd.f32 %v3394_v6, %v358_v8  ;;  %v362_v28 = vmul.f32 %v3384_v5, %v323_v61 }
  0x2c   : > { %592 = vst.msk [vmem:[#allocation2 + $0x121] sm:$0xff] %vm513_vm1, %v503_v34  ;;  %593 = vst.msk [vmem:[#allocation2 + $0x129] sm:$0xff] %vm513_vm1, %v504_v36  ;;  %v331_v4 = vld [vmem:[%s3389_s18 + $0xc0] sm:$0xff]  ;;  %v367_v33 = vmul.f32 %v3384_v5, %v328_v16  ;;  %v3563_v54 = vld [vmem:[%s3983_s3 + $0xc] sm:$0x3] }
  0x2d   : > { %596 = vst.msk [vmem:[#allocation2 + $0x151] sm:$0xff] %vm513_vm1, %v507_v44  ;;  %597 = vst.msk [vmem:[#allocation2 + $0x159] sm:$0xff] %vm513_vm1, %v508_v45  ;;  %v482_v17 = vsel %vm418_vm4, %v386_v42, %v450_v1  ;;  %v2797_v36 = vld [vmem:[%s3983_s3 + $0x6] sm:$0x3]  ;;  %v370_v41 = vmul.f32 %v3384_v5, %v331_v4  ;;  %v371_v42 = vmul.f32 %v3384_v5, %v332_v23  ;;  %vm429_vm9 = vcmp.ge.f32.partialorder %v397_v26, 0.0  ;;  %v336_v44 = vld [vmem:[%s3389_s18 + $0xe8] sm:$0xff] }
  0x2e   : > { %v625_v9 = vld [vmem:[#allocation2 + $0x31] ss:$2 sm:$0xff]  ;;  %v3463_v19 = vld [vmem:[#allocation2 + $0x30] ss:$2 sm:$0xff]  ;;  %570 = vst.msk [vmem:[#allocation2 + $0x19] sm:$0xff] %vm513_vm1, %v481_v13  ;;  %571 = vst.msk [vmem:[#allocation2 + $0x21] sm:$0xff] %vm513_vm1, %v482_v17  ;;  %v406_v61 = vadd.f32 %v3394_v6, %v367_v33 }
  0x2f   : > { %v638_v15 = vpack.c.bf16 %v625_v9, %v623_v59  ;;  %v3467_v22 = vld [vmem:[#allocation2 + $0x32] ss:$2 sm:$0xff]  ;;  %v631_v24 = vld [vmem:[#allocation2 + $0xc1] ss:$2 sm:$0xff]  ;;  %v3480_v38 = vld [vmem:[#allocation2 + $0xc2] ss:$2 sm:$0xff]  ;;  %v617_v46 = vpack.c.bf16 %v3463_v19, %v3461_v18 }
  0x30   : > { %v633_v27 = vld [vmem:[#allocation2 + $0xf1] ss:$2 sm:$0xff]  ;;  %v3475_v35 = vld [vmem:[#allocation2 + $0xc0] ss:$2 sm:$0xff]  ;;  %v3478_v37 = vld [vmem:[#allocation2 + $0xf0] ss:$2 sm:$0xff]  ;;  %v821_v47 = vpack.c.bf16 %v3467_v22, %v3465_v20  ;;  %v486_v20 = vsel %vm422_vm6, %v390_v52, %v454_v7  ;;  %v394_v22 = vadd.f32 %v3394_v6, %v355_v60 }
  0x31   : > { %2978 = vmatprep.mubr.msk.bf16.mxu0 %vm513_vm1, %v638_v15  ;;  %v640_v31 = vpack.c.bf16 %v633_v27, %v631_v24  ;;  %v3482_v39 = vld [vmem:[#allocation2 + $0xf2] ss:$2 sm:$0xff]  ;;  %v627_v43 = vld [vmem:[#allocation2 + $0x61] ss:$2 sm:$0xff]  ;;  %v619_v50 = vpack.c.bf16 %v3478_v37, %v3475_v35  ;;  %v810_v9 = vld [vmem:[#allocation2 + $0x62] ss:$2 sm:$0xff]  ;;  %v393_v15 = vadd.f32 %v3394_v6, %v354_v55  ;;  %v398_v27 = vadd.f32 %v3394_v6, %v359_v14 }
  0x32   : > { %v629_v49 = vld [vmem:[#allocation2 + $0x91] ss:$2 sm:$0xff]  ;;  %v3507_v57 = vld [vmem:[#allocation2 + $0x60] ss:$2 sm:$0xff]  ;;  %v3509_v58 = vld [vmem:[#allocation2 + $0x90] ss:$2 sm:$0xff]  ;;  %v823_v59 = vpack.c.bf16 %v3482_v39, %v3480_v38 }
  0x33   : > { %2982 = vmatprep.mubr.msk.bf16.mxu1 %vm513_vm1, %v640_v31  ;;  %v639_v56 = vpack.c.bf16 %v629_v49, %v627_v43  ;;  %v812_v10 = vld [vmem:[#allocation2 + $0x92] ss:$2 sm:$0xff]  ;;  %v635_v24 = vld [vmem:[#allocation2 + $0x121] ss:$2 sm:$0xff]  ;;  %v618_v25 = vpack.c.bf16 %v3509_v58, %v3507_v57  ;;  %575 = vst.msk [vmem:[#allocation2 + $0x51] sm:$0xff] %vm513_vm1, %v486_v20  ;;  %v363_v31 = vmul.f32 %v3384_v5, %v324_v63  ;;  %vm425_vm7 = vcmp.ge.f32.partialorder %v393_v15, 0.0 }
  0x34   : > { %v637_v29 = vld [vmem:[#allocation2 + $0x151] ss:$2 sm:$0xff]  ;;  %v822_v30 = vpack.c.bf16 %v812_v10, %v810_v9  ;;  %v335_v40 = vld [vmem:[%s3389_s18 + $0xe0] sm:$0xff]  ;;  %vm426_vm8 = vcmp.ge.f32.partialorder %v394_v22, 0.0  ;;  %vm430_vm10 = vcmp.ge.f32.partialorder %v398_v27, 0.0  ;;  %v401_v49 = vadd.f32 %v3394_v6, %v362_v28 }
  0x35   : > { %2979 = vmatmul.mubr.msk.bf16.vlgmr.msra.gmra.mxu0 %vm513_vm1, %v639_v56  ;;  %v641_v34 = vpack.c.bf16 %v637_v29, %v635_v24  ;;  %v457_v43 = vmul.f32 0.1, %v393_v15  ;;  %v458_v45 = vmul.f32 0.1, %v394_v22  ;;  %v820_v52 = vld [vmem:[#allocation2 + $0x152] ss:$2 sm:$0xff]  ;;  %v402_v55 = vadd.f32 %v3394_v6, %v363_v31 }
  0x36   : > { %2997 = vmatpush3.bf16.msra.mxu0 %v3455_v12  ;;  %2998 = vmatprep.mubr.msk.bf16.mxu0 %vm513_vm1, %v821_v47  ;;  %v485_v12 = vsel %vm421_vm5, %v389_v51, %v453_v3  ;;  %v461_v47 = vmul.f32 0.1, %v397_v26  ;;  %v818_v51 = vld [vmem:[#allocation2 + $0x122] ss:$2 sm:$0xff]  ;;  %v405_v56 = vadd.f32 %v3394_v6, %v366_v32  ;;  %v1025_v60 = vld [vmem:[#allocation2 + $0x19] ss:$2 sm:$0xff]  ;;  %v374_v62 = vmul.f32 %v3384_v5, %v335_v40 }
  0x37   : > { %3173 = vmatprep.subr.msk.bf16.mxu0 %vm656_vm0, %v2802_v48  ;;  %574 = vst.msk [vmem:[#allocation2 + $0x49] sm:$0xff] %vm513_vm1, %v485_v12  ;;  %2983 = vmatmul.mubr.msk.bf16.vlgmr.msra.gmra.mxu1 %vm513_vm1, %v641_v34  ;;  %v462_v48 = vmul.f32 0.1, %v398_v27  ;;  %v489_v53 = vsel %vm425_vm7, %v393_v15, %v457_v43  ;;  %v490_v18 = vsel %vm426_vm8, %v394_v22, %v458_v45  ;;  %vm433_vm11 = vcmp.ge.f32.partialorder %v401_v49, 0.0  ;;  %v3591_v13 = vld [vmem:[%s3983_s3 + $0xa] sm:$0x3] }
  0x38   : > { %2987 = vmatpush3.bf16.msra.mxu1 %v3411_v21  ;;  %2988 = vmatprep.mubr.msk.bf16.mxu1 %vm513_vm1, %v617_v46  ;;  %v949_v21 = vsel %vm656_vm0, %v2797_v36, 0  ;;  %v493_v19 = vsel %vm429_vm9, %v397_v26, %v461_v47  ;;  %578 = vst.msk [vmem:[#allocation2 + $0x79] sm:$0xff] %vm513_vm1, %v489_v53  ;;  %579 = vst.msk [vmem:[#allocation2 + $0x81] sm:$0xff] %vm513_vm1, %v490_v18  ;;  %v375_v63 = vmul.f32 %v3384_v5, %v336_v44  ;;  %v616_v12 = vld [vmem:[#allocation2 + $0x150] ss:$2 sm:$0xff]  ;;  %vm1628_vm7 = vcmask 64512  }
  0x39   : > { %3172 = vmatprep.subr.msk.bf16.mxu1 %vm656_vm0, %v2797_v36  ;;  %v494_v46 = vsel %vm430_vm10, %v398_v27, %v462_v48  ;;  %582 = vst.msk [vmem:[#allocation2 + $0xa9] sm:$0xff] %vm513_vm1, %v493_v19  ;;  %v824_v0 = vpack.c.bf16 %v820_v52, %v818_v51  ;;  %vm434_vm12 = vcmp.ge.f32.partialorder %v402_v55, 0.0  ;;  %vm437_vm13 = vcmp.ge.f32.partialorder %v405_v56, 0.0  ;;  %v337_v4 = vld [vmem:[%s3389_s18 + $0xf0] sm:$0xff]  ;;  %v915_v23 = vld [vmem:[#allocation2 + $0x18] ss:$2 sm:$0xff] }
  0x3a   : > { %583 = vst.msk [vmem:[#allocation2 + $0xb1] sm:$0xff] %vm513_vm1, %v494_v46  ;;  %v465_v38 = vmul.f32 0.1, %v401_v49  ;;  %vm438_vm14 = vcmp.ge.f32.partialorder %v406_v61, 0.0  ;;  %v469_v3 = vmul.f32 0.1, %v405_v56  ;;  %v409_v9 = vadd.f32 %v3394_v6, %v370_v41 }
  0x3b   : > { %v470_v7 = vmul.f32 0.1, %v406_v61  ;;  %v410_v10 = vadd.f32 %v3394_v6, %v371_v42  ;;  %v413_v16 = vadd.f32 %v3394_v6, %v374_v62  ;;  %v414_v17 = vadd.f32 %v3394_v6, %v375_v63  ;;  %v338_v26 = vld [vmem:[%s3389_s18 + $0xf8] sm:$0xff]  ;;  %v2822_v42 = vld [vmem:[%s3983_s3 + $0x10] sm:$0x3]  ;;  %1636 = vst.msk [vmem:[#allocation3 + $0x30] sm:$0xff] %vm1628_vm7, %v3205_v2 }
  0x3c   : > { %v497_v8 = vsel %vm433_vm11, %v401_v49, %v465_v38  ;;  %v501_v15 = vsel %vm437_vm13, %v405_v56, %v469_v3  ;;  %vm441_vm15 = vcmp.ge.f32.partialorder %v409_v9, 0.0  ;;  %v473_v22 = vmul.f32 0.1, %v409_v9  ;;  %v2817_v62 = vld [vmem:[%s3983_s3 + $0xe] sm:$0x3]  ;;  %1629 = vst.msk [vmem:[#allocation3] sm:$0xff] %vm1628_vm7, %v3205_v2 }
  0x3d   : > { %2999 = vmatmul.mubr.msk.bf16.vlgmr.msra.gmra.mxu0 %vm513_vm1, %v822_v30  ;;  %586 = vst.msk [vmem:[#allocation2 + $0xd9] sm:$0xff] %vm513_vm1, %v497_v8  ;;  %v502_v20 = vsel %vm438_vm14, %v406_v61, %v470_v7  ;;  %590 = vst.msk [vmem:[#allocation2 + $0x109] sm:$0xff] %vm513_vm1, %v501_v15  ;;  %vm442_vm2 = vcmp.ge.f32.partialorder %v410_v10, 0.0  ;;  %vm445_vm3 = vcmp.ge.f32.partialorder %v413_v16, 0.0  ;;  %v474_v57 = vmul.f32 0.1, %v410_v10 }
  0x3e   : > { %3017 = vmatpush3.bf16.msra.mxu0 %v1059_v11  ;;  %3002 = vmatprep.mubr.msk.bf16.mxu0 %vm513_vm1, %v823_v59  ;;  %v1027_v1 = vld [vmem:[#allocation2 + $0x49] ss:$2 sm:$0xff]  ;;  %v466_v59 = vmul.f32 0.1, %v402_v55  ;;  %v614_v11 = vld [vmem:[#allocation2 + $0x120] ss:$2 sm:$0xff]  ;;  %v376_v30 = vmul.f32 %v3384_v5, %v337_v4  ;;  %v377_v33 = vmul.f32 %v3384_v5, %v338_v26 }
  0x3f   : > { %3175 = vmatprep.subr.msk.bf16.mxu0 %vm656_vm0, %v3563_v54  ;;  %v1040_v39 = vpack.c.bf16 %v1027_v1, %v1025_v60  ;;  %2989 = vmatmul.mubr.msk.bf16.vlgmr.msra.gmra.mxu1 %vm513_vm1, %v618_v25  ;;  %591 = vst.msk [vmem:[#allocation2 + $0x111] sm:$0xff] %vm513_vm1, %v502_v20  ;;  %v477_v58 = vmul.f32 0.1, %v413_v16  ;;  %v917_v24 = vld [vmem:[#allocation2 + $0x48] ss:$2 sm:$0xff]  ;;  %vm446_vm4 = vcmp.ge.f32.partialorder %v414_v17, 0.0  ;;  %v505_v25 = vsel %vm441_vm15, %v409_v9, %v473_v22 }
  0x40   : > { %v498_v14 = vsel %vm434_vm12, %v402_v55, %v466_v59  ;;  %3007 = vmatpush3.bf16.msra.mxu1 %v949_v21  ;;  %2992 = vmatprep.mubr.msk.bf16.mxu1 %vm513_vm1, %v619_v50  ;;  %v1029_v35 = vld [vmem:[#allocation2 + $0x79] ss:$2 sm:$0xff]  ;;  %v478_v50 = vmul.f32 0.1, %v414_v17  ;;  %v506_v27 = vsel %vm442_vm2, %v410_v10, %v474_v57  ;;  %594 = vst.msk [vmem:[#allocation2 + $0x139] sm:$0xff] %vm513_vm1, %v505_v25  ;;  %v1279_v40 = vsel %vm656_vm0, %v3563_v54, 0 }
  0x41   : > { %587 = vst.msk [vmem:[#allocation2 + $0xe1] sm:$0xff] %vm513_vm1, %v498_v14  ;;  %3174 = vmatprep.subr.msk.bf16.mxu1 %vm656_vm0, %v3591_v13  ;;  %v1031_v37 = vld [vmem:[#allocation2 + $0xa9] ss:$2 sm:$0xff]  ;;  %v509_v28 = vsel %vm445_vm3, %v413_v16, %v477_v58  ;;  %v620_v29 = vpack.c.bf16 %v616_v12, %v614_v11  ;;  %595 = vst.msk [vmem:[#allocation2 + $0x141] sm:$0xff] %vm513_vm1, %v506_v27  ;;  %v930_v31 = vpack.c.bf16 %v917_v24, %v915_v23  ;;  %v919_v44 = vld [vmem:[#allocation2 + $0x78] ss:$2 sm:$0xff] }
  0x42   : > { %598 = vst.msk [vmem:[#allocation2 + $0x169] sm:$0xff] %vm513_vm1, %v509_v28  ;;  %v510_v32 = vsel %vm446_vm4, %v414_v17, %v478_v50  ;;  %v1041_v34 = vpack.c.bf16 %v1031_v37, %v1029_v35  ;;  %v415_v36 = vadd.f32 %v3394_v6, %v376_v30  ;;  %v416_v43 = vadd.f32 %v3394_v6, %v377_v33  ;;  %v921_v45 = vld [vmem:[#allocation2 + $0xa8] ss:$2 sm:$0xff]  ;;  %v1355_v37 = vld [vmem:[#allocation2 + $0x31] ss:$2 sm:$0xff] }
  0x43   : > { %599 = vst.msk [vmem:[#allocation2 + $0x171] sm:$0xff] %vm513_vm1, %v510_v32  ;;  %v931_v53 = vpack.c.bf16 %v921_v45, %v919_v44  ;;  %v1245_v54 = vld [vmem:[#allocation2 + $0x30] ss:$2 sm:$0xff]  ;;  %v1247_v55 = vld [vmem:[#allocation2 + $0x60] ss:$2 sm:$0xff]  ;;  %v1169_v46 = vsel %vm656_vm0, %v3591_v13, 0 }
  0x44   : > { %vm447_vm5 = vcmp.ge.f32.partialorder %v415_v36, 0.0  ;;  %vm448_vm6 = vcmp.ge.f32.partialorder %v416_v43, 0.0  ;;  %v479_v51 = vmul.f32 0.1, %v415_v36  ;;  %v480_v52 = vmul.f32 0.1, %v416_v43 }
  0x45   : > { %3003 = vmatmul.mubr.msk.bf16.gmra.mxu0 %vm513_vm1, %v824_v0  ;;  %v1260_v61 = vpack.c.bf16 %v1247_v55, %v1245_v54  ;;  %v1135_v1 = vld [vmem:[#allocation2 + $0x1a] ss:$2 sm:$0xff]  ;;  %v1137_v38 = vld [vmem:[#allocation2 + $0x4a] ss:$2 sm:$0xff]  ;;  %v1499_v13 = vsel %vm656_vm0, %v2822_v42, 0  ;;  %v1389_v23 = vsel %vm656_vm0, %v2817_v62, 0 }
  0x46   : > { %3018 = vmatprep.mubr.msk.bf16.mxu0 %vm513_vm1, %v1040_v39  ;;  %v1035_v5 = vld [vmem:[#allocation2 + $0x109] ss:$2 sm:$0xff]  ;;  %v925_v48 = vld [vmem:[#allocation2 + $0x108] ss:$2 sm:$0xff]  ;;  %v511_v56 = vsel %vm447_vm5, %v415_v36, %v479_v51  ;;  %v512_v21 = vsel %vm448_vm6, %v416_v43, %v480_v52  ;;  %v1150_v9 = vpack.c.bf16 %v1137_v38, %v1135_v1  ;;  %vm1630_vm8 = vcmask 58368   ;;  %1632 = vst.msk [vmem:[#allocation3 + $0x10] sm:$0xff] %vm1628_vm7, %v3205_v2 }
  0x47   : > { %2993 = vmatmul.mubr.msk.bf16.gmra.mxu1 %vm513_vm1, %v620_v29  ;;  %600 = vst.msk [vmem:[#allocation2 + $0x181] sm:$0xff] %vm513_vm1, %v511_v56  ;;  %601 = vst.msk [vmem:[#allocation2 + $0x189] sm:$0xff] %vm513_vm1, %v512_v21  ;;  %v1249_v39 = vld [vmem:[#allocation2 + $0x90] ss:$2 sm:$0xff]  ;;  %v1251_v59 = vld [vmem:[#allocation2 + $0xc0] ss:$2 sm:$0xff] }
  0x48   : > { %v1033_v41 = vld [vmem:[#allocation2 + $0xd9] ss:$2 sm:$0xff]  ;;  %3008 = vmatprep.mubr.msk.bf16.mxu1 %vm513_vm1, %v930_v31  ;;  %v923_v47 = vld [vmem:[#allocation2 + $0xd8] ss:$2 sm:$0xff]  ;;  %v1261_v10 = vpack.c.bf16 %v1251_v59, %v1249_v39  ;;  %1637 = vst.msk [vmem:[#allocation3 + $0x38] sm:$0x3] %vm1630_vm8, %v3205_v2 }
  0x49   : > { %v1042_v49 = vpack.c.bf16 %v1035_v5, %v1033_v41  ;;  %v1037_v6 = vld [vmem:[#allocation2 + $0x139] ss:$2 sm:$0xff]  ;;  %v932_v18 = vpack.c.bf16 %v925_v48, %v923_v47  ;;  %v927_v63 = vld [vmem:[#allocation2 + $0x138] ss:$2 sm:$0xff]  ;;  %1631 = vst.msk [vmem:[#allocation3 + $0x8] sm:$0x3] %vm1630_vm8, %v3205_v2 }
  0x4a   : > { %v1039_v19 = vld [vmem:[#allocation2 + $0x169] ss:$2 sm:$0xff]  ;;  %v929_v0 = vld [vmem:[#allocation2 + $0x168] ss:$2 sm:$0xff]  ;;  %1633 = vst.msk [vmem:[#allocation3 + $0x18] sm:$0x3] %vm1630_vm8, %v3205_v2 }
  0x4b   : > { %v1043_v60 = vpack.c.bf16 %v1039_v19, %v1037_v6  ;;  %v933_v3 = vpack.c.bf16 %v929_v0, %v927_v63  ;;  %v1253_v7 = vld [vmem:[#allocation2 + $0xf0] ss:$2 sm:$0xff]  ;;  %v1255_v8 = vld [vmem:[#allocation2 + $0x120] ss:$2 sm:$0xff]  ;;  %v1357_v50 = vld [vmem:[#allocation2 + $0x61] ss:$2 sm:$0xff] }
  0x4c   : > { %v1262_v11 = vpack.c.bf16 %v1255_v8, %v1253_v7  ;;  %v1139_v14 = vld [vmem:[#allocation2 + $0x7a] ss:$2 sm:$0xff]  ;;  %v1141_v15 = vld [vmem:[#allocation2 + $0xaa] ss:$2 sm:$0xff]  ;;  %v1370_v32 = vpack.c.bf16 %v1357_v50, %v1355_v37  ;;  %v1359_v36 = vld [vmem:[#allocation2 + $0x91] ss:$2 sm:$0xff] }
  0x4d   : > { %3019 = vmatmul.mubr.msk.bf16.vlgmr.msra.gmra.mxu0 %vm513_vm1, %v1041_v34  ;;  %v1143_v16 = vld [vmem:[#allocation2 + $0xda] ss:$2 sm:$0xff]  ;;  %v1145_v17 = vld [vmem:[#allocation2 + $0x10a] ss:$2 sm:$0xff]  ;;  %v1151_v22 = vpack.c.bf16 %v1141_v15, %v1139_v14  ;;  %v1363_v41 = vld [vmem:[#allocation2 + $0xf1] ss:$2 sm:$0xff] }
  0x4e   : > { %3037 = vmatpush3.bf16.msra.mxu0 %v1279_v40  ;;  %3022 = vmatprep.mubr.msk.bf16.mxu0 %vm513_vm1, %v1042_v49  ;;  %v1257_v12 = vld [vmem:[#allocation2 + $0x150] ss:$2 sm:$0xff]  ;;  %v1259_v20 = vld [vmem:[#allocation2 + $0x180] ss:$2 sm:$0xff]  ;;  %v1152_v4 = vpack.c.bf16 %v1145_v17, %v1143_v16  ;;  %v1361_v40 = vld [vmem:[#allocation2 + $0xc1] ss:$2 sm:$0xff] }
  0x4f   : > { %3177 = vmatprep.subr.msk.bf16.mxu0 %vm656_vm0, %v2822_v42  ;;  %3009 = vmatmul.mubr.msk.bf16.vlgmr.msra.gmra.mxu1 %vm513_vm1, %v931_v53  ;;  %v1465_v57 = vld [vmem:[#allocation2 + $0x32] ss:$2 sm:$0xff]  ;;  %v1467_v58 = vld [vmem:[#allocation2 + $0x62] ss:$2 sm:$0xff]  ;;  %v1263_v24 = vpack.c.bf16 %v1259_v20, %v1257_v12  ;;  %v1365_v42 = vld [vmem:[#allocation2 + $0x121] ss:$2 sm:$0xff]  ;;  %v1371_v45 = vpack.c.bf16 %v1361_v40, %v1359_v36 }
  0x50   : > { %3027 = vmatpush3.bf16.msra.mxu1 %v1169_v46  ;;  %3012 = vmatprep.mubr.msk.bf16.mxu1 %vm513_vm1, %v932_v18  ;;  %v1480_v25 = vpack.c.bf16 %v1467_v58, %v1465_v57  ;;  %v1147_v26 = vld [vmem:[#allocation2 + $0x13a] ss:$2 sm:$0xff]  ;;  %v1149_v35 = vld [vmem:[#allocation2 + $0x16a] ss:$2 sm:$0xff]  ;;  %v1372_v5 = vpack.c.bf16 %v1365_v42, %v1363_v41  ;;  %v1367_v48 = vld [vmem:[#allocation2 + $0x151] ss:$2 sm:$0xff] }
  0x51   : > { %3176 = vmatprep.subr.msk.bf16.mxu1 %vm656_vm0, %v2817_v62  ;;  %v1469_v27 = vld [vmem:[#allocation2 + $0x92] ss:$2 sm:$0xff]  ;;  %v1471_v28 = vld [vmem:[#allocation2 + $0xc2] ss:$2 sm:$0xff]  ;;  %v1153_v29 = vpack.c.bf16 %v1149_v35, %v1147_v26  ;;  %v1369_v49 = vld [vmem:[#allocation2 + $0x181] ss:$2 sm:$0xff] }
  0x52   : > { %v1473_v30 = vld [vmem:[#allocation2 + $0xf2] ss:$2 sm:$0xff]  ;;  %v1475_v31 = vld [vmem:[#allocation2 + $0x122] ss:$2 sm:$0xff]  ;;  %v1481_v33 = vpack.c.bf16 %v1471_v28, %v1469_v27  ;;  %v1373_v51 = vpack.c.bf16 %v1369_v49, %v1367_v48  ;;  %1634 = vst.msk [vmem:[#allocation3 + $0x20] sm:$0xff] %vm1628_vm7, %v3205_v2  ;;  %1638 = vst.msk [vmem:[#allocation3 + $0x40] sm:$0xff] %vm1628_vm7, %v3205_v2 }
  0x53   : > { %v1482_v34 = vpack.c.bf16 %v1475_v31, %v1473_v30  ;;  %v1477_v43 = vld [vmem:[#allocation2 + $0x152] ss:$2 sm:$0xff]  ;;  %v1479_v44 = vld [vmem:[#allocation2 + $0x182] ss:$2 sm:$0xff]  ;;  %1635 = vst.msk [vmem:[#allocation3 + $0x28] sm:$0x3] %vm1630_vm8, %v3205_v2 }
  0x54   : > { %v1483_v47 = vpack.c.bf16 %v1479_v44, %v1477_v43  ;;  %1639 = vst.msk [vmem:[#allocation3 + $0x48] sm:$0x3] %vm1630_vm8, %v3205_v2  ;;  %1641 = vst.msk [vmem:[#allocation3 + $0x58] sm:$0x3] %vm1630_vm8, %v3205_v2  ;;  %v2829_v52 = vld [vmem:[%s3986_s6 + $0x4] sm:$0xf] }
  0x55   : > { %3023 = vmatmul.mubr.msk.bf16.gmra.mxu0 %vm513_vm1, %v1043_v60  ;;  %1640 = vst.msk [vmem:[#allocation3 + $0x50] sm:$0xff] %vm1628_vm7, %v3205_v2  ;;  %1642 = vst.msk [vmem:[#allocation3 + $0x60] sm:$0xff] %vm1628_vm7, %v3205_v2  ;;  %vm1698_vm9 = vcmask 1043456   ;;  %v1671_v53 = vld [vmem:[%s3986_s6] sm:$0xf] }
  0x56   : > { %3038 = vmatprep.mubr.msk.bf16.mxu0 %vm513_vm1, %v1260_v61  ;;  %1643 = vst.msk [vmem:[#allocation3 + $0x68] sm:$0x3] %vm1630_vm8, %v3205_v2  ;;  %1645 = vst.msk [vmem:[#allocation3 + $0x78] sm:$0x3] %vm1630_vm8, %v3205_v2  ;;  %v1700_v6 = vsel %vm1698_vm9, %v2829_v52, 0  ;;  %v1780_v54 = vsel %vm1698_vm9, %v1671_v53, 0 }
  0x57   : > { %3013 = vmatmul.mubr.msk.bf16.gmra.mxu1 %vm513_vm1, %v933_v3  ;;  %1644 = vst.msk [vmem:[#allocation3 + $0x70] sm:$0xff] %vm1628_vm7, %v3205_v2  ;;  %1646 = vst.msk [vmem:[#allocation3 + $0x80] sm:$0xff] %vm1628_vm7, %v3205_v2  ;;  %v3724_v55 = vld [vmem:[%s3986_s6 + $0xc] sm:$0xf] }
  0x58   : > { %3028 = vmatprep.mubr.msk.bf16.mxu1 %vm513_vm1, %v1150_v9  ;;  %1647 = vst.msk [vmem:[#allocation3 + $0x88] sm:$0x3] %vm1630_vm8, %v3205_v2  ;;  %1649 = vst.msk [vmem:[#allocation3 + $0x98] sm:$0x3] %vm1630_vm8, %v3205_v2 }
  0x59   : > { %1648 = vst.msk [vmem:[#allocation3 + $0x90] sm:$0xff] %vm1628_vm7, %v3205_v2  ;;  %v3717_v2 = vld [vmem:[%s3986_s6 + $0x8] sm:$0xf]  ;;  %3990 = vst [vmem:[#allocation4_spill] sm:$0xff] %v3724_v55 }
  0x5d   : > { %3039 = vmatmul.mubr.msk.bf16.vlgmr.msra.gmra.mxu0 %vm513_vm1, %v1261_v10 }
  0x5e   : > { %3057 = vmatpush3.bf16.msra.mxu0 %v1499_v13  ;;  %3042 = vmatprep.mubr.msk.bf16.mxu0 %vm513_vm1, %v1262_v11 }
  0x5f   : > { %3029 = vmatmul.mubr.msk.bf16.vlgmr.msra.gmra.mxu1 %vm513_vm1, %v1151_v22  ;;  %3179 = vmatprep.subr.msk.bf16.mxu0 %vm1698_vm9, %v1671_v53 }
  0x60   : > { %3047 = vmatpush3.bf16.msra.mxu1 %v1389_v23  ;;  %3032 = vmatprep.mubr.msk.bf16.mxu1 %vm513_vm1, %v1152_v4 }
  0x61   : > { %3178 = vmatprep.subr.msk.bf16.mxu1 %vm1698_vm9, %v2829_v52 }
  0x65   : > { %3043 = vmatmul.mubr.msk.bf16.gmra.mxu0 %vm513_vm1, %v1263_v24 }
  0x66   : > { %3058 = vmatprep.mubr.msk.bf16.mxu0 %vm513_vm1, %v1480_v25 }
  0x67   : > { %3033 = vmatmul.mubr.msk.bf16.gmra.mxu1 %vm513_vm1, %v1153_v29 }
  0x68   : > { %3048 = vmatprep.mubr.msk.bf16.mxu1 %vm513_vm1, %v1370_v32 }
  0x6d   : > { %3059 = vmatmul.mubr.msk.bf16.vlgmr.msra.gmra.mxu0 %vm513_vm1, %v1481_v33 }
  0x6e   : > { %3062 = vmatprep.mubr.msk.bf16.mxu0 %vm513_vm1, %v1482_v34  ;;  %3077 = vmatpush3.bf16.msra.mxu0 %v1780_v54 }
  0x6f   : > { %3049 = vmatmul.mubr.msk.bf16.vlgmr.msra.gmra.mxu1 %vm513_vm1, %v1371_v45  ;;  %3181 = vmatprep.subr.msk.bf16.mxu0 %vm1698_vm9, %v3724_v55 }
  0x70   : > { %3052 = vmatprep.mubr.msk.bf16.mxu1 %vm513_vm1, %v1372_v5  ;;  %3067 = vmatpush3.bf16.msra.mxu1 %v1700_v6 }
  0x71   : > { %3180 = vmatprep.subr.msk.bf16.mxu1 %vm1698_vm9, %v3717_v2 }
  0x75   : > { %3063 = vmatmul.mubr.msk.bf16.gmra.mxu0 %vm513_vm1, %v1483_v47 }
  0x77   : > { %3053 = vmatmul.mubr.msk.bf16.gmra.mxu1 %vm513_vm1, %v1373_v51 }
  0xf5   : > { %v2980_v56 = vpop.f32.mrf.mxu0 }
  0xf7   : > { %v694_v21 = vpop.f32.mrf.mxu0  ;;  %v2984_v46 = vpop.f32.mrf.mxu1 }
  0xf9   : > { %v2981_v18 = vpop.f32.mrf.mxu0  ;;  %v710_v60 = vpop.f32.mrf.mxu1 }
  0xfb   : > { %v697_v19 = vpop.f32.mrf.mxu0  ;;  %v2985_v62 = vpop.f32.mrf.mxu1 }
  0xfd   : > { %v3000_v61 = vpop.f32.mrf.mxu0  ;;  %v3728_v0 = vpop.f32.mrf.mxu1 }
  0xff   : > { %v876_v63 = vpop.f32.mrf.mxu0  ;;  %v2990_v38 = vpop.f32.mrf.mxu1 }
 0x100   : > { %v783_v32 = vadd.f32 %v2990_v38, %v2980_v56 }
 0x101   : > { %v3001_v1 = vpop.f32.mrf.mxu0  ;;  %v774_v59 = vpop.f32.mrf.mxu1 }
 0x102   : > { %v775_v36 = vadd.f32 %v774_v59, %v694_v21  ;;  %v909_v42 = vadd.f32 %v3000_v61, %v783_v32 }
 0x103   : > { %v879_v39 = vpop.f32.mrf.mxu0  ;;  %v2991_v7 = vpop.f32.mrf.mxu1 }
 0x104   : > { %v786_v43 = vadd.f32 %v2991_v7, %v2981_v18  ;;  %v907_v5 = vadd.f32 %v876_v63, %v775_v36 }
 0x105   : > { %v3004_v3 = vpop.f32.mrf.mxu0  ;;  %v777_v9 = vpop.f32.mrf.mxu1 }
 0x106   : > { %v778_v47 = vadd.f32 %v777_v9, %v697_v19  ;;  %v910_v52 = vadd.f32 %v3001_v1, %v786_v43 }
 0x107   : > { %v3730_v8 = vpop.f32.mrf.mxu0  ;;  %v2994_v11 = vpop.f32.mrf.mxu1 }
 0x108   : > { %v799_v53 = vadd.f32 %v2994_v11, %v2984_v46  ;;  %v908_v21 = vadd.f32 %v879_v39, %v778_v47 }
 0x109   : > { %v3005_v10 = vpop.f32.mrf.mxu0  ;;  %v790_v14 = vpop.f32.mrf.mxu1 }
 0x10a   : > { %v791_v61 = vadd.f32 %v790_v14, %v710_v60  ;;  %v913_v9 = vadd.f32 %v3004_v3, %v799_v53 }
 0x10b   : > { %v3732_v13 = vpop.f32.mrf.mxu0  ;;  %v2995_v16 = vpop.f32.mrf.mxu1 }
 0x10c   : > { %v802_v18 = vadd.f32 %v2995_v16, %v2985_v62  ;;  %v911_v11 = vadd.f32 %v3730_v8, %v791_v61  ;;  %v3759_v8 = vld [vmem:[%s3984_s4] ss:$0 sm:$0xff] }
 0x10d   : > { %v3020_v15 = vpop.f32.mrf.mxu0  ;;  %v793_v12 = vpop.f32.mrf.mxu1 }
 0x10f   : > { %v1095_v17 = vpop.f32.mrf.mxu0  ;;  %v3010_v22 = vpop.f32.mrf.mxu1 }
 0x110   : > { %v1018_v48 = vadd.f32 %v3010_v22, %v909_v42  ;;  %v794_v22 = vadd.f32 %v793_v12, %v3728_v0  ;;  %v914_v42 = vadd.f32 %v3005_v10, %v802_v18 }
 0x111   : > { %v3021_v20 = vpop.f32.mrf.mxu0  ;;  %v985_v58 = vpop.f32.mrf.mxu1 }
 0x112   : > { %v1016_v6 = vadd.f32 %v985_v58, %v907_v5  ;;  %v1128_v38 = vadd.f32 %v3020_v15, %v1018_v48  ;;  %v912_v16 = vadd.f32 %v3732_v13, %v794_v22 }
 0x113   : > { %v1098_v57 = vpop.f32.mrf.mxu0  ;;  %v3011_v23 = vpop.f32.mrf.mxu1 }
 0x114   : > { %v1019_v59 = vadd.f32 %v3011_v23, %v910_v52  ;;  %v1126_v55 = vadd.f32 %v1095_v17, %v1016_v6 }
 0x115   : > { %v3734_v4 = vpop.f32.mrf.mxu0  ;;  %v988_v25 = vpop.f32.mrf.mxu1 }
 0x116   : > { %v1017_v63 = vadd.f32 %v988_v25, %v908_v21  ;;  %v1129_v58 = vadd.f32 %v3021_v20, %v1019_v59 }
 0x117   : > { %v3736_v24 = vpop.f32.mrf.mxu0  ;;  %v3014_v35 = vpop.f32.mrf.mxu1 }
 0x118   : > { %v1022_v39 = vadd.f32 %v3014_v35, %v913_v9  ;;  %v1127_v60 = vadd.f32 %v1098_v57, %v1017_v63 }
 0x119   : > { %v3738_v26 = vpop.f32.mrf.mxu0  ;;  %v1001_v50 = vpop.f32.mrf.mxu1 }
 0x11a   : > { %v1020_v17 = vadd.f32 %v1001_v50, %v911_v11 }
 0x11b   : > { %v3740_v37 = vpop.f32.mrf.mxu0  ;;  %v3015_v28 = vpop.f32.mrf.mxu1 }
 0x11c   : > { %v1023_v25 = vadd.f32 %v3015_v28, %v914_v42  ;;  %v1130_v13 = vadd.f32 %v3736_v24, %v1020_v17 }
 0x11d   : > { %v3040_v27 = vpop.f32.mrf.mxu0  ;;  %v1004_v30 = vpop.f32.mrf.mxu1 }
 0x11e   : > { %v1021_v20 = vadd.f32 %v1004_v30, %v912_v16  ;;  %v1133_v50 = vadd.f32 %v3738_v26, %v1023_v25 }
 0x11f   : > { %v1315_v29 = vpop.f32.mrf.mxu0  ;;  %v3030_v33 = vpop.f32.mrf.mxu1 }
 0x120   : > { %v1238_v19 = vadd.f32 %v3030_v33, %v1128_v38  ;;  %v1131_v47 = vadd.f32 %v3740_v37, %v1021_v20 }
 0x121   : > { %v3041_v31 = vpop.f32.mrf.mxu0  ;;  %v1205_v40 = vpop.f32.mrf.mxu1 }
 0x122   : > { %v1236_v46 = vadd.f32 %v1205_v40, %v1126_v55  ;;  %v1348_v62 = vadd.f32 %v3040_v27, %v1238_v19  ;;  %v1132_v55 = vadd.f32 %v3734_v4, %v1022_v39 }
 0x123   : > { %v3742_v34 = vpop.f32.mrf.mxu0  ;;  %v3031_v44 = vpop.f32.mrf.mxu1 }
 0x124   : > { %v1239_v14 = vadd.f32 %v3031_v44, %v1129_v58  ;;  %v1346_v0 = vadd.f32 %v1315_v29, %v1236_v46  ;;  %v3766_v29 = vld [vmem:[%s3985_s5] ss:$0 sm:$0xff] }
 0x125   : > { %v3744_v41 = vpop.f32.mrf.mxu0  ;;  %v1208_v49 = vpop.f32.mrf.mxu1 }
 0x126   : > { %v1237_v12 = vadd.f32 %v1208_v49, %v1127_v60  ;;  %v1349_v57 = vadd.f32 %v3041_v31, %v1239_v14 }
 0x127   : > { %v3746_v45 = vpop.f32.mrf.mxu0  ;;  %v3034_v54 = vpop.f32.mrf.mxu1 }
 0x128   : > { %v1242_v28 = vadd.f32 %v3034_v54, %v1132_v55  ;;  %v1347_v40 = vadd.f32 %v3742_v34, %v1237_v12 }
 0x129   : > { %v3748_v51 = vpop.f32.mrf.mxu0  ;;  %v1221_v7 = vpop.f32.mrf.mxu1 }
 0x12a   : > { %v1240_v48 = vadd.f32 %v1221_v7, %v1130_v13  ;;  %v1352_v54 = vadd.f32 %v3744_v41, %v1242_v28 }
 0x12b   : > { %v3750_v56 = vpop.f32.mrf.mxu0  ;;  %v3035_v36 = vpop.f32.mrf.mxu1 }
 0x12c   : > { %v1243_v24 = vadd.f32 %v3035_v36, %v1133_v50  ;;  %v1350_v18 = vadd.f32 %v3746_v45, %v1240_v48 }
 0x12d   : > { %v3060_v32 = vpop.f32.mrf.mxu0  ;;  %v1224_v15 = vpop.f32.mrf.mxu1 }
 0x12e   : > { %v1241_v21 = vadd.f32 %v1224_v15, %v1131_v47  ;;  %v1353_v7 = vadd.f32 %v3748_v51, %v1243_v24 }
 0x12f   : > { %v1535_v1 = vpop.f32.mrf.mxu0  ;;  %v3050_v3 = vpop.f32.mrf.mxu1 }
 0x130   : > { %v1458_v43 = vadd.f32 %v3050_v3, %v1348_v62  ;;  %v1351_v36 = vadd.f32 %v3750_v56, %v1241_v21 }
 0x131   : > { %v3061_v23 = vpop.f32.mrf.mxu0  ;;  %v1425_v10 = vpop.f32.mrf.mxu1 }
 0x132   : > { %v1568_v35 = vadd.f32 %v3060_v32, %v1458_v43  ;;  %v1456_v27 = vadd.f32 %v1425_v10, %v1346_v0 }
 0x133   : > { %v1538_v33 = vpop.f32.mrf.mxu0  ;;  %v3051_v4 = vpop.f32.mrf.mxu1 }
 0x134   : > { %v1583_v44 = vmul.f32 %v3759_v8, %v1568_v35  ;;  %v1566_v5 = vadd.f32 %v1535_v1, %v1456_v27  ;;  %v1459_v31 = vadd.f32 %v3051_v4, %v1349_v57  ;;  %v1672_v35 = vld [vmem:[#allocation3 + $0x1] sm:$0xff] }
 0x135   : > { %v3064_v30 = vpop.f32.mrf.mxu0  ;;  %v1428_v49 = vpop.f32.mrf.mxu1  ;;  %v1659_v27 = vld [vmem:[#allocation3] sm:$0xff] }
 0x136   : > { %v1598_v26 = vadd.f32 %v3766_v29, %v1583_v44  ;;  %v1581_v52 = vmul.f32 %v3759_v8, %v1566_v5  ;;  %v1569_v6 = vadd.f32 %v3061_v23, %v1459_v31  ;;  %v1457_v53 = vadd.f32 %v1428_v49, %v1347_v40 }
 0x137   : > { %v3054_v38 = vpop.f32.mrf.mxu1  ;;  %v1551_v34 = vpop.f32.mrf.mxu0 }
 0x138   : > { %vm1606_vm10 = vcmp.ge.f32.partialorder %v1598_v26, 0.0  ;;  %v1614_v59 = vmul.f32 0.1, %v1598_v26  ;;  %v1596_v61 = vadd.f32 %v3766_v29, %v1581_v52  ;;  %v1584_v37 = vmul.f32 %v3759_v8, %v1569_v6 }
 0x139   : > { %v1567_v32 = vadd.f32 %v1538_v33, %v1457_v53  ;;  %v1462_v63 = vadd.f32 %v3054_v38, %v1352_v54  ;;  %v1441_v19 = vpop.f32.mrf.mxu1  ;;  %v3065_v45 = vpop.f32.mrf.mxu0  ;;  %v1874_v53 = vsel %vm1698_vm9, %v3717_v2, 0  ;;  %v3991_v54 = vld [vmem:[#allocation4_spill] sm:$0xff] }
 0x13a   : > { %v1622_v9 = vsel %vm1606_vm10, %v1598_v26, %v1614_v59  ;;  %vm1604_vm11 = vcmp.ge.f32.partialorder %v1596_v61, 0.0  ;;  %v1612_v22 = vmul.f32 0.1, %v1596_v61  ;;  %v1599_v41 = vadd.f32 %v3766_v29, %v1584_v37  ;;  %v2848_v38 = vld [vmem:[%s3986_s6 + $0x10] sm:$0xf] }
 0x13b   : > { %1653 = vst.msk [vmem:[#allocation3 + $0x31] sm:$0xff] %vm1628_vm7, %v1622_v9  ;;  %v1582_v1 = vmul.f32 %v3759_v8, %v1567_v32  ;;  %v1572_v58 = vadd.f32 %v3064_v30, %v1462_v63  ;;  %v1460_v46 = vadd.f32 %v1441_v19, %v1350_v18  ;;  %v3055_v11 = vpop.f32.mrf.mxu1  ;;  %v1554_v33 = vpop.f32.mrf.mxu0  ;;  %v1976_v21 = vsel %vm1698_vm9, %v3991_v54, 0  ;;  %v1847_v63 = vld [vmem:[#allocation3 + $0x2] sm:$0xff] }
 0x13c   : > { %v1620_v42 = vsel %vm1604_vm11, %v1596_v61, %v1612_v22  ;;  %vm1607_vm12 = vcmp.ge.f32.partialorder %v1599_v41, 0.0  ;;  %v1615_v51 = vmul.f32 0.1, %v1599_v41  ;;  %v1463_v39 = vadd.f32 %v3055_v11, %v1353_v7 }
 0x13d   : > { %1651 = vst.msk [vmem:[#allocation3 + $0x11] sm:$0xff] %vm1628_vm7, %v1620_v42  ;;  %v1597_v15 = vadd.f32 %v3766_v29, %v1582_v1  ;;  %v1587_v23 = vmul.f32 %v3759_v8, %v1572_v58  ;;  %v1570_v60 = vadd.f32 %v1551_v34, %v1460_v46  ;;  %v1444_v56 = vpop.f32.mrf.mxu1  ;;  %v2853_v34 = vld [vmem:[%s3986_s6 + $0x14] sm:$0xf] }
 0x13e   : > { %v1623_v62 = vsel %vm1607_vm12, %v1599_v41, %v1615_v51  ;;  %v1573_v14 = vadd.f32 %v3065_v45, %v1463_v39  ;;  %v1461_v16 = vadd.f32 %v1444_v56, %v1351_v36  ;;  %v2180_v56 = vsel %vm1698_vm9, %v2853_v34, 0 }
 0x13f   : > { %1654 = vst.msk [vmem:[#allocation3 + $0x41] sm:$0xff] %vm1628_vm7, %v1623_v62  ;;  %vm1605_vm13 = vcmp.ge.f32.partialorder %v1597_v15, 0.0  ;;  %v1613_v17 = vmul.f32 0.1, %v1597_v15  ;;  %v1602_v25 = vadd.f32 %v3766_v29, %v1587_v23  ;;  %v1585_v3 = vmul.f32 %v3759_v8, %v1570_v60 }
 0x140   : > { %v1588_v0 = vmul.f32 %v3759_v8, %v1573_v14  ;;  %v1571_v12 = vadd.f32 %v1554_v33, %v1461_v16  ;;  %v2858_v14 = vld [vmem:[%s3986_s6 + $0x18] sm:$0xf]  ;;  %v2863_v16 = vld [vmem:[%s3986_s6 + $0x1c] sm:$0xf] }
 0x141   : > { %v1621_v43 = vsel %vm1605_vm13, %v1597_v15, %v1613_v17  ;;  %vm1610_vm14 = vcmp.ge.f32.partialorder %v1602_v25, 0.0  ;;  %v1618_v55 = vmul.f32 0.1, %v1602_v25  ;;  %v1600_v20 = vadd.f32 %v3766_v29, %v1585_v3 }
 0x142   : > { %1652 = vst.msk [vmem:[#allocation3 + $0x21] sm:$0xff] %vm1628_vm7, %v1621_v43  ;;  %v1603_v10 = vadd.f32 %v3766_v29, %v1588_v0  ;;  %v1586_v57 = vmul.f32 %v3759_v8, %v1571_v12  ;;  %v1662_v26 = vld [vmem:[#allocation3 + $0x30] sm:$0xff]  ;;  %v2078_v15 = vsel %vm1698_vm9, %v2848_v38, 0 }
 0x143   : > { %v1626_v13 = vsel %vm1610_vm14, %v1602_v25, %v1618_v55  ;;  %vm1608_vm15 = vcmp.ge.f32.partialorder %v1600_v20, 0.0  ;;  %v1616_v50 = vmul.f32 0.1, %v1600_v20  ;;  %v1850_v42 = vld [vmem:[#allocation3 + $0x32] sm:$0xff] }
 0x144   : > { %1657 = vst.msk [vmem:[#allocation3 + $0x71] sm:$0xff] %vm1628_vm7, %v1626_v13  ;;  %vm1611_vm2 = vcmp.ge.f32.partialorder %v1603_v10, 0.0  ;;  %v1619_v28 = vmul.f32 0.1, %v1603_v10  ;;  %v1601_v4 = vadd.f32 %v3766_v29, %v1586_v57  ;;  %v3795_v30 = vld [vmem:[#allocation3 + $0x11] sm:$0xff] }
 0x145   : > { %v1660_v40 = vld [vmem:[#allocation3 + $0x10] sm:$0xff]  ;;  %v1624_v44 = vsel %vm1608_vm15, %v1600_v20, %v1616_v50  ;;  %v1680_v5 = vpack.c.bf16 %v3795_v30, %v1672_v35  ;;  %v2385_v35 = vsel %vm1698_vm9, %v2863_v16, 0 }
 0x146   : > { %v1667_v31 = vpack.c.bf16 %v1660_v40, %v1659_v27  ;;  %1655 = vst.msk [vmem:[#allocation3 + $0x51] sm:$0xff] %vm1628_vm7, %v1624_v44  ;;  %v1627_v8 = vsel %vm1611_vm2, %v1603_v10, %v1619_v28  ;;  %vm1609_vm3 = vcmp.ge.f32.partialorder %v1601_v4, 0.0  ;;  %v1617_v47 = vmul.f32 0.1, %v1601_v4  ;;  %v3802_v29 = vld [vmem:[#allocation3 + $0x31] sm:$0xff]  ;;  %v3827_v59 = vld [vmem:[#allocation3 + $0x41] sm:$0xff] }
 0x147   : > { %1658 = vst.msk [vmem:[#allocation3 + $0x81] sm:$0xff] %vm1628_vm7, %v1627_v8  ;;  %3068 = vmatprep.mubr.msk.bf16.mxu1 %vm1628_vm7, %v1680_v5  ;;  %v1663_v61 = vld [vmem:[#allocation3 + $0x40] sm:$0xff]  ;;  %v1848_v19 = vld [vmem:[#allocation3 + $0x12] sm:$0xff]  ;;  %v2060_v55 = vpack.c.bf16 %v3827_v59, %v3802_v29  ;;  %v2283_v10 = vsel %vm1698_vm9, %v2858_v14, 0  ;;  %v2574_v50 = vld [vmem:[%s3987_s7] sm:$0x3] }
 0x148   : > { %3078 = vmatprep.mubr.msk.bf16.mxu0 %vm1628_vm7, %v1667_v31  ;;  %v1625_v48 = vsel %vm1609_vm3, %v1601_v4, %v1617_v47  ;;  %v1855_v58 = vpack.c.bf16 %v1848_v19, %v1847_v63  ;;  %v1958_v39 = vpack.c.bf16 %v1663_v61, %v1662_v26  ;;  %v1851_v23 = vld [vmem:[#allocation3 + $0x42] sm:$0xff]  ;;  %v2868_v13 = vld [vmem:[%s3986_s6 + $0x20] sm:$0xf]  ;;  %v2588_v5 = vsel %vm656_vm0, %v2574_v50, 0 }
 0x149   : > { %1656 = vst.msk [vmem:[#allocation3 + $0x61] sm:$0xff] %vm1628_vm7, %v1625_v48  ;;  %v3805_v24 = vld [vmem:[#allocation3 + $0x21] sm:$0xff]  ;;  %v2162_v20 = vpack.c.bf16 %v1851_v23, %v1850_v42  ;;  %v2487_v44 = vsel %vm1698_vm9, %v2868_v13, 0  ;;  %v2562_v31 = vld [vmem:[#allocation2 + $0x19] ss:$2 sm:$0xff] }
 0x14a   : > { %v1661_v49 = vld [vmem:[#allocation3 + $0x20] sm:$0xff]  ;;  %v3809_v52 = vpack.c.bf16 %v3802_v29, %v3805_v24  ;;  %v2059_v12 = vpack.c.bf16 %v3805_v24, %v3795_v30  ;;  %v2263_v47 = vld [vmem:[#allocation3 + $0x90] sm:$0xff] }
 0x14b   : > { %v3811_v6 = vpack.c.bf16 %v1662_v26, %v1661_v49  ;;  %v3839_v32 = vld [vmem:[#allocation3 + $0x71] sm:$0xff]  ;;  %v1957_v46 = vpack.c.bf16 %v1661_v49, %v1660_v40  ;;  %v1849_v11 = vld [vmem:[#allocation3 + $0x22] sm:$0xff] }
 0x14c   : > { %3069 = vmatmul.mubr.msk.bf16.vlgmr.msra.gmra.mxu1 %vm1628_vm7, %v3809_v52  ;;  %v1666_v41 = vld [vmem:[#allocation3 + $0x70] sm:$0xff]  ;;  %v3856_v51 = vpack.c.bf16 %v1850_v42, %v1849_v11  ;;  %v2161_v43 = vpack.c.bf16 %v1849_v11, %v1848_v19  ;;  %v2563_v8 = vld [vmem:[#allocation2 + $0x49] ss:$2 sm:$0xff] }
 0x14d   : > { %3079 = vmatmul.mubr.msk.bf16.vlgmr.msra.gmra.mxu0 %vm1628_vm7, %v3811_v6  ;;  %3087 = vmatpush3.bf16.msra.mxu1 %v1874_v53  ;;  %v3829_v2 = vld [vmem:[#allocation3 + $0x51] sm:$0xff]  ;;  %v2570_v29 = vpack.c.bf16 %v2563_v8, %v2562_v31  ;;  %v2567_v53 = vld [vmem:[#allocation2 + $0x109] ss:$2 sm:$0xff] }
 0x14e   : > { %3097 = vmatpush3.bf16.msra.mxu0 %v1976_v21  ;;  %v1664_v37 = vld [vmem:[#allocation3 + $0x50] sm:$0xff]  ;;  %v3833_v18 = vpack.c.bf16 %v3829_v2, %v3827_v59  ;;  %3182 = vmatprep.subr.msk.bf16.mxu1 %vm1698_vm9, %v2848_v38  ;;  %v1956_v25 = vld [vmem:[#allocation3 + $0x80] sm:$0xff] }
 0x14f   : > { %v3835_v7 = vpack.c.bf16 %v1664_v37, %v1663_v61  ;;  %3183 = vmatprep.subr.msk.bf16.mxu0 %vm1698_vm9, %v2853_v34  ;;  %v1852_v45 = vld [vmem:[#allocation3 + $0x52] sm:$0xff]  ;;  %v1960_v0 = vpack.c.bf16 %v1956_v25, %v1666_v41  ;;  %v2058_v28 = vld [vmem:[#allocation3 + $0x81] sm:$0xff]  ;;  %v2267_v24 = vpack.c.bf16 %v2263_v47, %v1956_v25 }
 0x150   : > { %3072 = vmatprep.mubr.msk.bf16.mxu1 %vm1628_vm7, %v3833_v18  ;;  %v1678_v9 = vld [vmem:[#allocation3 + $0x61] sm:$0xff]  ;;  %v3859_v60 = vpack.c.bf16 %v1852_v45, %v1851_v23  ;;  %v1854_v3 = vld [vmem:[#allocation3 + $0x72] sm:$0xff]  ;;  %v2062_v30 = vpack.c.bf16 %v2058_v28, %v3839_v32 }
 0x151   : > { %3082 = vmatprep.mubr.msk.bf16.mxu0 %vm1628_vm7, %v3835_v7  ;;  %v1665_v22 = vld [vmem:[#allocation3 + $0x60] sm:$0xff]  ;;  %v3846_v36 = vpack.c.bf16 %v3839_v32, %v1678_v9  ;;  %v2061_v57 = vpack.c.bf16 %v1678_v9, %v3829_v2  ;;  %v2365_v48 = vld [vmem:[#allocation3 + $0x91] sm:$0xff] }
 0x152   : > { %v3848_v1 = vpack.c.bf16 %v1666_v41, %v1665_v22  ;;  %v1959_v62 = vpack.c.bf16 %v1665_v22, %v1664_v37  ;;  %v1853_v17 = vld [vmem:[#allocation3 + $0x62] sm:$0xff]  ;;  %v2369_v49 = vpack.c.bf16 %v2365_v48, %v2058_v28  ;;  %v2467_v59 = vld [vmem:[#allocation3 + $0x92] sm:$0xff] }
 0x153   : > { %v1858_v33 = vpack.c.bf16 %v1854_v3, %v1853_v17  ;;  %v2163_v27 = vpack.c.bf16 %v1853_v17, %v1852_v45  ;;  %v2160_v4 = vld [vmem:[#allocation3 + $0x82] sm:$0xff] }
 0x154   : > { %3073 = vmatmul.mubr.msk.bf16.gmra.mxu1 %vm1628_vm7, %v3846_v36  ;;  %v2164_v40 = vpack.c.bf16 %v2160_v4, %v1854_v3  ;;  %v2564_v26 = vld [vmem:[#allocation2 + $0x79] ss:$2 sm:$0xff]  ;;  %v2569_v34 = vld [vmem:[#allocation2 + $0x169] ss:$2 sm:$0xff]  ;;  %v2471_v61 = vpack.c.bf16 %v2467_v59, %v2160_v4 }
 0x155   : > { %3083 = vmatmul.mubr.msk.bf16.gmra.mxu0 %vm1628_vm7, %v3848_v1  ;;  %3088 = vmatprep.mubr.msk.bf16.mxu1 %vm1628_vm7, %v1855_v58  ;;  %v2568_v38 = vld [vmem:[#allocation2 + $0x139] ss:$2 sm:$0xff] }
 0x156   : > { %3098 = vmatprep.mubr.msk.bf16.mxu0 %vm1628_vm7, %v1957_v46  ;;  %v2573_v2 = vpack.c.bf16 %v2569_v34, %v2568_v38 }
 0x15c   : > { %3089 = vmatmul.mubr.msk.bf16.vlgmr.msra.gmra.mxu1 %vm1628_vm7, %v3856_v51 }
 0x15d   : > { %3099 = vmatmul.mubr.msk.bf16.vlgmr.msra.gmra.mxu0 %vm1628_vm7, %v1958_v39  ;;  %3107 = vmatpush3.bf16.msra.mxu1 %v2078_v15 }
 0x15e   : > { %3092 = vmatprep.mubr.msk.bf16.mxu1 %vm1628_vm7, %v3859_v60  ;;  %3102 = vmatprep.mubr.msk.bf16.mxu0 %vm1628_vm7, %v1959_v62 }
 0x15f   : > { %3117 = vmatpush3.bf16.msra.mxu0 %v2180_v56  ;;  %3184 = vmatprep.subr.msk.bf16.mxu1 %vm1698_vm9, %v2858_v14 }
 0x160   : > { %3185 = vmatprep.subr.msk.bf16.mxu0 %vm1698_vm9, %v2863_v16 }
 0x164   : > { %3093 = vmatmul.mubr.msk.bf16.gmra.mxu1 %vm1628_vm7, %v1858_v33 }
 0x165   : > { %3103 = vmatmul.mubr.msk.bf16.gmra.mxu0 %vm1628_vm7, %v1960_v0  ;;  %3108 = vmatprep.mubr.msk.bf16.mxu1 %vm1628_vm7, %v2059_v12 }
 0x166   : > { %3118 = vmatprep.mubr.msk.bf16.mxu0 %vm1628_vm7, %v2161_v43 }
 0x16c   : > { %3109 = vmatmul.mubr.msk.bf16.vlgmr.msra.gmra.mxu1 %vm1628_vm7, %v2060_v55 }
 0x16d   : > { %3119 = vmatmul.mubr.msk.bf16.vlgmr.msra.gmra.mxu0 %vm1628_vm7, %v2162_v20  ;;  %3127 = vmatpush3.bf16.msra.mxu1 %v2283_v10 }
 0x16e   : > { %3112 = vmatprep.mubr.msk.bf16.mxu1 %vm1628_vm7, %v2061_v57  ;;  %3122 = vmatprep.mubr.msk.bf16.mxu0 %vm1628_vm7, %v2163_v27 }
 0x16f   : > { %3137 = vmatpush3.bf16.msra.mxu0 %v2385_v35  ;;  %3186 = vmatprep.subr.msk.bf16.mxu1 %vm1698_vm9, %v2868_v13 }
 0x170   : > { %3187 = vmatprep.subr.msk.bf16.mxu0 %vm656_vm0, %v2574_v50 }
 0x174   : > { %3113 = vmatmul.mubr.msk.bf16.gmra.mxu1 %vm1628_vm7, %v2062_v30 }
 0x175   : > { %3123 = vmatmul.mubr.msk.bf16.gmra.mxu0 %vm1628_vm7, %v2164_v40  ;;  %3128 = vmatprep.mubr.msk.bf16.mxu1 %vm1628_vm7, %v3811_v6  ;;  %v2566_v6 = vld [vmem:[#allocation2 + $0xd9] ss:$2 sm:$0xff] }
 0x176   : > { %3138 = vmatprep.mubr.msk.bf16.mxu0 %vm1628_vm7, %v3809_v52  ;;  %v2565_v52 = vld [vmem:[#allocation2 + $0xa9] ss:$2 sm:$0xff]  ;;  %v2572_v21 = vpack.c.bf16 %v2567_v53, %v2566_v6 }
 0x177   : > { %v2571_v54 = vpack.c.bf16 %v2565_v52, %v2564_v26 }
 0x17c   : > { %3129 = vmatmul.mubr.msk.bf16.vlgmr.msra.gmra.mxu1 %vm1628_vm7, %v3835_v7 }
 0x17d   : > { %3139 = vmatmul.mubr.msk.bf16.vlgmr.msra.gmra.mxu0 %vm1628_vm7, %v3833_v18  ;;  %3147 = vmatpush3.bf16.msra.mxu1 %v2487_v44 }
 0x17e   : > { %3132 = vmatprep.mubr.msk.bf16.mxu1 %vm1628_vm7, %v3848_v1  ;;  %3142 = vmatprep.mubr.msk.bf16.mxu0 %vm1628_vm7, %v3846_v36 }
 0x17f   : > { %3157 = vmatpush3.bf16.msra.mxu0 %v2588_v5 }
 0x184   : > { %3133 = vmatmul.mubr.msk.bf16.gmra.mxu1 %vm1628_vm7, %v2267_v24 }
 0x185   : > { %3143 = vmatmul.mubr.msk.bf16.gmra.mxu0 %vm1628_vm7, %v2369_v49  ;;  %3148 = vmatprep.mubr.msk.bf16.mxu1 %vm1628_vm7, %v3856_v51 }
 0x186   : > { %3158 = vmatprep.mubr.msk.bf16.mxu0 %vm513_vm1, %v2570_v29 }
 0x18c   : > { %3149 = vmatmul.mubr.msk.bf16.vlgmr.msra.gmra.mxu1 %vm1628_vm7, %v3859_v60 }
 0x18d   : > { %3159 = vmatmul.mubr.msk.bf16.vlgmr.msra.gmra.mxu0 %vm513_vm1, %v2571_v54  ;;  %3152 = vmatprep.mubr.msk.bf16.mxu1 %vm1628_vm7, %v1858_v33 }
 0x18e   : > { %3162 = vmatprep.mubr.msk.bf16.mxu0 %vm513_vm1, %v2572_v21 }
 0x194   : > { %3153 = vmatmul.mubr.msk.bf16.gmra.mxu1 %vm1628_vm7, %v2471_v61 }
 0x195   : > { %3163 = vmatmul.mubr.msk.bf16.gmra.mxu0 %vm513_vm1, %v2573_v2 }
 0x20c   : > { %v3070_v37 = vpop.f32.mrf.mxu1 }
 0x20d   : > { %v3080_v18 = vpop.f32.mrf.mxu0 }
 0x20e   : > { %v1736_v7 = vpop.f32.mrf.mxu1  ;;  %v1825_v31 = vadd.f32 %v3080_v18, %v3070_v37 }
 0x20f   : > { %v1816_v32 = vpop.f32.mrf.mxu0 }
 0x210   : > { %v3071_v63 = vpop.f32.mrf.mxu1  ;;  %v1817_v48 = vadd.f32 %v1816_v32, %v1736_v7 }
 0x211   : > { %v3081_v19 = vpop.f32.mrf.mxu0 }
 0x212   : > { %v1739_v9 = vpop.f32.mrf.mxu1  ;;  %v1828_v26 = vadd.f32 %v3081_v19, %v3071_v63 }
 0x213   : > { %v1819_v22 = vpop.f32.mrf.mxu0 }
 0x214   : > { %v3074_v41 = vpop.f32.mrf.mxu1  ;;  %v1820_v54 = vadd.f32 %v1819_v22, %v1739_v9 }
 0x215   : > { %v3084_v36 = vpop.f32.mrf.mxu0 }
 0x216   : > { %v1752_v1 = vpop.f32.mrf.mxu1  ;;  %v1841_v2 = vadd.f32 %v3084_v36, %v3074_v41 }
 0x217   : > { %v1832_v58 = vpop.f32.mrf.mxu0 }
 0x218   : > { %v3075_v46 = vpop.f32.mrf.mxu1 }
 0x219   : > { %v3085_v11 = vpop.f32.mrf.mxu0 }
 0x21a   : > { %v3928_v45 = vpop.f32.mrf.mxu1 }
 0x21b   : > { %v3930_v42 = vpop.f32.mrf.mxu0 }
 0x21c   : > { %v3090_v51 = vpop.f32.mrf.mxu1 }
 0x21d   : > { %v3100_v39 = vpop.f32.mrf.mxu0  ;;  %v1943_v29 = vadd.f32 %v3090_v51, %v1825_v31  ;;  %v1844_v31 = vadd.f32 %v3085_v11, %v3075_v46 }
 0x21e   : > { %v1910_v15 = vpop.f32.mrf.mxu1 }
 0x21f   : > { %v2012_v23 = vpop.f32.mrf.mxu0  ;;  %v1941_v52 = vadd.f32 %v1910_v15, %v1817_v48  ;;  %v2045_v21 = vadd.f32 %v3100_v39, %v1943_v29  ;;  %v1836_v39 = vadd.f32 %v3930_v42, %v3928_v45 }
 0x220   : > { %v3091_v60 = vpop.f32.mrf.mxu1 }
 0x221   : > { %v3101_v56 = vpop.f32.mrf.mxu0  ;;  %v1944_v38 = vadd.f32 %v3091_v60, %v1828_v26  ;;  %v2043_v61 = vadd.f32 %v2012_v23, %v1941_v52 }
 0x222   : > { %v1913_v62 = vpop.f32.mrf.mxu1 }
 0x223   : > { %v2015_v14 = vpop.f32.mrf.mxu0  ;;  %v1942_v37 = vadd.f32 %v1913_v62, %v1820_v54  ;;  %v2046_v7 = vadd.f32 %v3101_v56, %v1944_v38 }
 0x224   : > { %v3094_v16 = vpop.f32.mrf.mxu1 }
 0x225   : > { %v3104_v17 = vpop.f32.mrf.mxu0  ;;  %v1947_v32 = vadd.f32 %v3094_v16, %v1841_v2  ;;  %v2044_v48 = vadd.f32 %v2015_v14, %v1942_v37 }
 0x226   : > { %v1926_v25 = vpop.f32.mrf.mxu1 }
 0x227   : > { %v2028_v3 = vpop.f32.mrf.mxu0  ;;  %v2049_v60 = vadd.f32 %v3104_v17, %v1947_v32 }
 0x228   : > { %v3095_v33 = vpop.f32.mrf.mxu1 }
 0x229   : > { %v3932_v0 = vpop.f32.mrf.mxu0  ;;  %v1948_v41 = vadd.f32 %v3095_v33, %v1844_v31 }
 0x22a   : > { %v1929_v12 = vpop.f32.mrf.mxu1 }
 0x22b   : > { %v3934_v43 = vpop.f32.mrf.mxu0  ;;  %v1946_v16 = vadd.f32 %v1929_v12, %v1836_v39 }
 0x22c   : > { %v3110_v55 = vpop.f32.mrf.mxu1 }
 0x22d   : > { %v3120_v20 = vpop.f32.mrf.mxu0  ;;  %v2147_v18 = vadd.f32 %v3110_v55, %v2045_v21  ;;  %v2048_v17 = vadd.f32 %v3934_v43, %v1946_v16 }
 0x22e   : > { %v2114_v10 = vpop.f32.mrf.mxu1 }
 0x22f   : > { %v2216_v57 = vpop.f32.mrf.mxu0  ;;  %v2145_v51 = vadd.f32 %v2114_v10, %v2043_v61  ;;  %v2249_v9 = vadd.f32 %v3120_v20, %v2147_v18  ;;  %v2050_v20 = vadd.f32 %v3932_v0, %v1948_v41 }
 0x230   : > { %v3111_v35 = vpop.f32.mrf.mxu1 }
 0x231   : > { %v3121_v27 = vpop.f32.mrf.mxu0  ;;  %v2148_v22 = vadd.f32 %v3111_v35, %v2046_v7 }
 0x232   : > { %v2117_v13 = vpop.f32.mrf.mxu1 }
 0x233   : > { %v2219_v50 = vpop.f32.mrf.mxu0 }
 0x234   : > { %v3114_v28 = vpop.f32.mrf.mxu1 }
 0x235   : > { %v3936_v4 = vpop.f32.mrf.mxu0  ;;  %v2151_v55 = vadd.f32 %v3114_v28, %v2049_v60 }
 0x236   : > { %v2130_v30 = vpop.f32.mrf.mxu1 }
 0x237   : > { %v3938_v40 = vpop.f32.mrf.mxu0  ;;  %v2253_v12 = vadd.f32 %v3936_v4, %v2151_v55 }
 0x238   : > { %v3115_v44 = vpop.f32.mrf.mxu1 }
 0x239   : > { %v3940_v5 = vpop.f32.mrf.mxu0 }
 0x23a   : > { %3992 = vst [vmem:[#allocation4_spill] sm:$0xff] %v3940_v5  ;;  %v3942_v8 = vpop.f32.mrf.mxu1  ;;  %v1833_v5 = vadd.f32 %v1832_v58, %v1752_v1  ;;  %v2247_v1 = vadd.f32 %v2216_v57, %v2145_v51  ;;  %v2146_v58 = vadd.f32 %v2117_v13, %v2044_v48  ;;  %v2152_v57 = vadd.f32 %v3115_v44, %v2050_v20 }
 0x23b   : > { %3993 = vst [vmem:[#allocation5_spill] sm:$0xff] %v3942_v8  ;;  %v3944_v47 = vpop.f32.mrf.mxu0 }
 0x23c   : > { %3994 = vst [vmem:[#allocation6_spill] sm:$0xff] %v3944_v47  ;;  %v3130_v24 = vpop.f32.mrf.mxu1  ;;  %v1945_v63 = vadd.f32 %v1926_v25, %v1833_v5  ;;  %v2250_v25 = vadd.f32 %v3121_v27, %v2148_v22  ;;  %v2248_v42 = vadd.f32 %v2219_v50, %v2146_v58 }
 0x23d   : > { %v3140_v49 = vpop.f32.mrf.mxu0  ;;  %v2352_v56 = vadd.f32 %v3130_v24, %v2249_v9 }
 0x23e   : > { %v2319_v6 = vpop.f32.mrf.mxu1  ;;  %v2047_v62 = vadd.f32 %v2028_v3, %v1945_v63 }
 0x23f   : > { %v2421_v53 = vpop.f32.mrf.mxu0  ;;  %v2350_v14 = vadd.f32 %v2319_v6, %v2247_v1  ;;  %v2454_v33 = vadd.f32 %v3140_v49, %v2352_v56 }
 0x240   : > { %v3131_v34 = vpop.f32.mrf.mxu1  ;;  %v2149_v10 = vadd.f32 %v2130_v30, %v2047_v62 }
 0x241   : > { %v3141_v59 = vpop.f32.mrf.mxu0  ;;  %v2353_v5 = vadd.f32 %v3131_v34, %v2250_v25  ;;  %v2452_v29 = vadd.f32 %v2421_v53, %v2350_v14  ;;  %v3996_v52 = vld [vmem:[#allocation4_spill] sm:$0xff] }
 0x242   : > { %v2322_v8 = vpop.f32.mrf.mxu1  ;;  %v2251_v24 = vadd.f32 %v3938_v40, %v2149_v10  ;;  %v3995_v0 = vld [vmem:[#allocation5_spill] sm:$0xff] }
 0x243   : > { %v2424_v47 = vpop.f32.mrf.mxu0  ;;  %v2351_v27 = vadd.f32 %v2322_v8, %v2248_v42  ;;  %v2150_v30 = vadd.f32 %v3995_v0, %v2048_v17  ;;  %v2455_v44 = vadd.f32 %v3141_v59, %v2353_v5  ;;  %v2254_v8 = vadd.f32 %v3996_v52, %v2152_v57  ;;  %v3997_v34 = vld [vmem:[#allocation6_spill] sm:$0xff] }
 0x244   : > { %v3134_v19 = vpop.f32.mrf.mxu1 }
 0x245   : > { %v3144_v15 = vpop.f32.mrf.mxu0  ;;  %v2356_v49 = vadd.f32 %v3134_v19, %v2253_v12  ;;  %v2453_v40 = vadd.f32 %v2424_v47, %v2351_v27  ;;  %v2252_v2 = vadd.f32 %v3997_v34, %v2150_v30 }
 0x246   : > { %v2335_v36 = vpop.f32.mrf.mxu1 }
 0x247   : > { %v2437_v23 = vpop.f32.mrf.mxu0  ;;  %v2354_v54 = vadd.f32 %v2335_v36, %v2251_v24  ;;  %v2458_v59 = vadd.f32 %v3144_v15, %v2356_v49 }
 0x248   : > { %v3135_v46 = vpop.f32.mrf.mxu1 }
 0x249   : > { %v3145_v11 = vpop.f32.mrf.mxu0  ;;  %v2357_v18 = vadd.f32 %v3135_v46, %v2254_v8  ;;  %v2456_v31 = vadd.f32 %v2437_v23, %v2354_v54 }
 0x24a   : > { %v2338_v35 = vpop.f32.mrf.mxu1 }
 0x24b   : > { %v2440_v45 = vpop.f32.mrf.mxu0  ;;  %v2355_v63 = vadd.f32 %v2338_v35, %v2252_v2  ;;  %v2459_v39 = vadd.f32 %v3145_v11, %v2357_v18 }
 0x24c   : > { %v3150_v13 = vpop.f32.mrf.mxu1 }
 0x24d   : > { %v3160_v3 = vpop.f32.mrf.mxu0  ;;  %v2556_v28 = vadd.f32 %v3150_v13, %v2454_v33  ;;  %v2457_v1 = vadd.f32 %v2440_v45, %v2355_v63 }
 0x24e   : > { %v2523_v50 = vpop.f32.mrf.mxu1 }
 0x24f   : > { %v2624_v43 = vpop.f32.mrf.mxu0  ;;  %v2657_v26 = vadd.f32 %v3160_v3, %v2556_v28  ;;  %v2554_v4 = vadd.f32 %v2523_v50, %v2452_v29 }
 0x250   : > { %v3151_v6 = vpop.f32.mrf.mxu1 }
 0x251   : > { %v3161_v53 = vpop.f32.mrf.mxu0  ;;  %2665 = vst.msk [vmem:[%s3957_s20 + $0x10] sm:$0xff] %vm1628_vm7, %v2657_v26  ;;  %v2655_v21 = vadd.f32 %v2624_v43, %v2554_v4  ;;  %v2557_v38 = vadd.f32 %v3151_v6, %v2455_v44 }
 0x252   : > { %v2526_v61 = vpop.f32.mrf.mxu1 }
 0x253   : > { %v2627_v37 = vpop.f32.mrf.mxu0  ;;  %2663 = vst.msk [vmem:[%s3957_s20] sm:$0xff] %vm1628_vm7, %v2655_v21  ;;  %v2658_v7 = vadd.f32 %v3161_v53, %v2557_v38  ;;  %v2555_v32 = vadd.f32 %v2526_v61, %v2453_v40 }
 0x254   : > { %v3154_v51 = vpop.f32.mrf.mxu1 }
 0x255   : > { %v3164_v47 = vpop.f32.mrf.mxu0  ;;  %2666 = vst.msk [vmem:[%s3957_s20 + $0x18] sm:$0xff] %vm1628_vm7, %v2658_v7  ;;  %v2656_v19 = vadd.f32 %v2627_v37, %v2555_v32  ;;  %v2560_v48 = vadd.f32 %v3154_v51, %v2458_v59 }
 0x256   : > { %v2539_v9 = vpop.f32.mrf.mxu1 }
 0x257   : > { %v2640_v22 = vpop.f32.mrf.mxu0  ;;  %2664 = vst.msk [vmem:[%s3957_s20 + $0x8] sm:$0xff] %vm1628_vm7, %v2656_v19  ;;  %v2661_v15 = vadd.f32 %v3164_v47, %v2560_v48  ;;  %v2558_v41 = vadd.f32 %v2539_v9, %v2456_v31 }
 0x258   : > { %v3155_v36 = vpop.f32.mrf.mxu1 }
 0x259   : > { %v3165_v60 = vpop.f32.mrf.mxu0  ;;  %2669 = vst.msk [vmem:[%s3957_s20 + $0x30] sm:$0xff] %vm1628_vm7, %v2661_v15  ;;  %v2659_v23 = vadd.f32 %v2640_v22, %v2558_v41  ;;  %v2561_v58 = vadd.f32 %v3155_v36, %v2459_v39 }
 0x25a   : > { %v2542_v56 = vpop.f32.mrf.mxu1 }
 0x25b   : > { %2667 = vst.msk [vmem:[%s3957_s20 + $0x20] sm:$0xff] %vm1628_vm7, %v2659_v23  ;;  %v2662_v62 = vadd.f32 %v3165_v60, %v2561_v58  ;;  %v2559_v16 = vadd.f32 %v2542_v56, %v2457_v1  ;;  %v2643_v46 = vpop.f32.mrf.mxu0 }
 0x25d   : > { %2670 = vst.msk [vmem:[%s3957_s20 + $0x38] sm:$0xff] %vm1628_vm7, %v2662_v62  ;;  %v2660_v11 = vadd.f32 %v2643_v46, %v2559_v16 }
 0x25f   : > { %2668 = vst.msk [vmem:[%s3957_s20 + $0x28] sm:$0xff] %vm1628_vm7, %v2660_v11 }
 0x260 PF: > { %s18_s27 = sadd.s32 1, %s3203_s27  }
 0x261   : > { %p15_p4 = scmp.ge.s32.totalorder %s18_s27, 4  }
 0x263   :  { %17 = sbr.rel (!%p15_p4) target bundleno = 1 (0x1), region = 171 }

</bundles_post_ra>
